<compile_context>
chip_gen: v7x
topology: tpu7x:2x2x1
jax: 0.10.0
libtpu: 0.0.40
codegen_flags: <defaults>
</compile_context>

<pallas_src>
import numpy as np
import jax
import jax.numpy as jnp
from jax.experimental import pallas as pl
from jax.experimental.pallas import tpu as pltpu

FACTOR = 64                 # factor_num (embedding dim D)
ROW_TILE = 128              # row tile (raise to 256/512 on v6e/v7x at scale)
K_TILE = 128                # item (reduction) tile for the adjacency matmul
LOGIT_PAD = 128             # discriminator layers padded to lane-dense 128 cols
NEG_SLOPE = 0.2             # LeakyReLU slope in FairGo filter_layer
MM_DTYPE = jnp.bfloat16     # matmul-input dtype (f32 accumulation everywhere)


# ------------------------------ small helpers --------------------------------

def _round_up(n, m):
    return (n + m - 1) // m * m


def _pad_rows(x, mult):
    pad = _round_up(x.shape[0], mult) - x.shape[0]
    if pad:
        x = jnp.pad(x, ((0, pad),) + ((0, 0),) * (x.ndim - 1))
    return x


def _leaky(x):
    return jnp.where(x > 0, x, NEG_SLOPE * x)


def _mm(a, b):
    # bf16 MXU inputs, f32 accumulation (v6e/v7x fast path, fine on v5e).
    return jnp.dot(a.astype(MM_DTYPE), b.astype(MM_DTYPE),
                   preferred_element_type=jnp.float32)


def _filter_mlp(x, w1, w2, w3, b):
    # AttributeFilter: D -> 2D -> D -> D.  b is a (3, 128) zero-padded stack.
    h1 = _leaky(_mm(x, w1) + b[0:1, :])
    h2 = _leaky(_mm(h1, w2) + b[1:2, :FACTOR])
    return _mm(h2, w3) + b[2:3, :FACTOR]


def _disc_mlp(h, w1, w2, w3, b):
    # DisClf: D -> D/4 -> D/8 -> 2, every layer zero-padded to 128 lanes
    # (padding with zero weights/biases leaves logits[:, :2] exact).
    h1 = _leaky(_mm(h, w1) + b[0:1, :])
    h2 = _leaky(_mm(h1, w2) + b[1:2, :])
    return _mm(h2, w3) + b[2:3, :]


# ------------------------------ Pallas kernels -------------------------------

def item_filter_mix_kernel(c_ref, x_ref, fw1_ref, fw2_ref, fw3_ref, fb_ref,
                           f2_ref, mix_ref):
    """Fused f1/f2 AttributeFilter over item rows + d_mask-weighted mix."""
    x = x_ref[...]
    c = c_ref[...]                                   # (1, 2) mix coefficients
    f1 = _filter_mlp(x, fw1_ref[0], fw2_ref[0], fw3_ref[0], fb_ref[0])
    f2 = _filter_mlp(x, fw1_ref[1], fw2_ref[1], fw3_ref[1], fb_ref[1])
    f2_ref[...] = f2
    mix_ref[...] = (c[:, 0:1] * f1 + c[:, 1:2] * f2).astype(mix_ref.dtype)


def user_batch_fused_kernel(c_ref, x_ref, itb_ref,
                            fw1_ref, fw2_ref, fw3_ref, fb_ref,
                            dw1_ref, dw2_ref, dw3_ref, db_ref,
                            lg_ref, la_ref, st_ref):
    """Fused: f1/f2 filters + mix + gender/age discriminators + rating head."""
    x = x_ref[...]
    c = c_ref[...]
    f1 = _filter_mlp(x, fw1_ref[0], fw2_ref[0], fw3_ref[0], fb_ref[0])
    f2 = _filter_mlp(x, fw1_ref[1], fw2_ref[1], fw3_ref[1], fb_ref[1])
    mixed = c[:, 0:1] * f1 + c[:, 1:2] * f2
    lg_ref[...] = _disc_mlp(mixed, dw1_ref[0], dw2_ref[0], dw3_ref[0], db_ref[0])
    la_ref[...] = _disc_mlp(mixed, dw1_ref[1], dw2_ref[1], dw3_ref[1], db_ref[1])
    # rating head (uses the age-filter output): pack pred / l2 into one
    # lane-dense (TN, 128) block: col 0 = prediction, col 1 = sum(u^2 + i^2).
    it = itb_ref[...]
    pred = jnp.sum(f2 * it, axis=-1, keepdims=True)
    l2 = jnp.sum(f2 * f2 + it * it, axis=-1, keepdims=True)
    col = jax.lax.broadcasted_iota(jnp.int32, st_ref.shape, 1)
    st_ref[...] = jnp.where(col == 0, pred, jnp.where(col == 1, l2, 0.0))


def adj_disc_kernel(adj_ref, mix_ref, dw1_ref, dw2_ref, dw3_ref, db_ref,
                    lg_ref, la_ref, acc_ref):
    """K-tiled adj @ mixed_item_f with both local discriminators fused into the
    finalize step (user_f_local never touches HBM)."""
    @pl.when(pl.program_id(1) == 0)
    def _():
        acc_ref[...] = jnp.zeros_like(acc_ref)

    acc_ref[...] += jnp.dot(adj_ref[...], mix_ref[...],
                            preferred_element_type=jnp.float32)

    @pl.when(pl.program_id(1) == pl.num_programs(1) - 1)
    def _():
        h = acc_ref[...]
        lg_ref[...] = _disc_mlp(h, dw1_ref[0], dw2_ref[0], dw3_ref[0], db_ref[0])
        la_ref[...] = _disc_mlp(h, dw1_ref[1], dw2_ref[1], dw3_ref[1], db_ref[1])


# -------------------------------- wrappers ------------------------------------

def _full1(shape):
    nd = len(shape)
    return pl.BlockSpec(shape, lambda i: (0,) * nd)


def _full2(shape):
    nd = len(shape)
    return pl.BlockSpec(shape, lambda i, k: (0,) * nd)


def item_filter_mix(x, fparams, coeffs):
    fw1, fw2, fw3, fb = fparams
    x = _pad_rows(x.astype(MM_DTYPE), max(ROW_TILE, K_TILE))
    n, d = x.shape
    row_spec = pl.BlockSpec((ROW_TILE, d), lambda i: (i, 0))
    return pl.pallas_call(
        item_filter_mix_kernel,
        out_shape=(jax.ShapeDtypeStruct((n, d), jnp.float32),
                   jax.ShapeDtypeStruct((n, d), MM_DTYPE)),
        grid=(n // ROW_TILE,),
        in_specs=[
            pl.BlockSpec((1, 2), lambda i: (0, 0)),
            row_spec,
            _full1(fw1.shape), _full1(fw2.shape),
            _full1(fw3.shape), _full1(fb.shape),
        ],
        out_specs=(row_spec, row_spec),
        compiler_params=pltpu.CompilerParams(
            dimension_semantics=("parallel",)),
    )(coeffs, x, fw1, fw2, fw3, fb)


def user_batch_fused(x, item_b, fparams, dparams, coeffs):
    fw1, fw2, fw3, fb = fparams
    dw1, dw2, dw3, db = dparams
    x = _pad_rows(x.astype(MM_DTYPE), ROW_TILE)
    item_b = _pad_rows(item_b, ROW_TILE)
    n, d = x.shape
    row_spec = pl.BlockSpec((ROW_TILE, d), lambda i: (i, 0))
    logit_spec = pl.BlockSpec((ROW_TILE, LOGIT_PAD), lambda i: (i, 0))
    out_shape = (jax.ShapeDtypeStruct((n, LOGIT_PAD), jnp.float32),) * 3
    return pl.pallas_call(
        user_batch_fused_kernel,
        out_shape=out_shape,
        grid=(n // ROW_TILE,),
        in_specs=[
            pl.BlockSpec((1, 2), lambda i: (0, 0)),
            row_spec,
            pl.BlockSpec((ROW_TILE, d), lambda i: (i, 0)),
            _full1(fw1.shape), _full1(fw2.shape),
            _full1(fw3.shape), _full1(fb.shape),
            _full1(dw1.shape), _full1(dw2.shape),
            _full1(dw3.shape), _full1(db.shape),
        ],
        out_specs=(logit_spec, logit_spec, logit_spec),
        compiler_params=pltpu.CompilerParams(
            dimension_semantics=("parallel",)),
    )(coeffs, x, item_b, fw1, fw2, fw3, fb, dw1, dw2, dw3, db)


def adj_matmul_disc(adj, item_mix, dparams):
    dw1, dw2, dw3, db = dparams
    item_mix = _pad_rows(item_mix, K_TILE)
    n_items, d = item_mix.shape
    adj = adj.astype(MM_DTYPE)
    u_pad = _round_up(adj.shape[0], ROW_TILE) - adj.shape[0]
    i_pad = n_items - adj.shape[1]
    adj = jnp.pad(adj, ((0, u_pad), (0, i_pad)))
    n_users = adj.shape[0]
    logit_spec = pl.BlockSpec((ROW_TILE, LOGIT_PAD), lambda i, k: (i, 0))
    out_shape = (jax.ShapeDtypeStruct((n_users, LOGIT_PAD), jnp.float32),) * 2
    return pl.pallas_call(
        adj_disc_kernel,
        out_shape=out_shape,
        grid=(n_users // ROW_TILE, n_items // K_TILE),
        in_specs=[
            pl.BlockSpec((ROW_TILE, K_TILE), lambda i, k: (i, k)),
            pl.BlockSpec((K_TILE, d), lambda i, k: (k, 0)),
            _full2(dw1.shape), _full2(dw2.shape),
            _full2(dw3.shape), _full2(db.shape),
        ],
        out_specs=(logit_spec, logit_spec),
        scratch_shapes=[pltpu.VMEM((ROW_TILE, d), jnp.float32)],
        compiler_params=pltpu.CompilerParams(
            dimension_semantics=("parallel", "arbitrary")),
    )(adj, item_mix, dw1, dw2, dw3, db)


# ------------------------------ glue / losses ---------------------------------

def cross_entropy_mean(logits, labels):
    # PyTorch nn.CrossEntropyLoss (mean reduction) semantics
    lse = jax.nn.logsumexp(logits, axis=-1)
    picked = jnp.take_along_axis(
        logits, labels[:, None].astype(jnp.int32), axis=-1)[:, 0]
    return jnp.mean(lse - picked)


def informax_forward(fparams, dparams, adj, user_batch, rating_batch, item_batch,
                     d_mask, gcn_user_embs, gcn_item_embs, users_features):
    sum_d = d_mask[0] + d_mask[1]
    coeffs = (d_mask / sum_d).astype(jnp.float32).reshape(1, 2)

    labels_gender = users_features[:, 0]
    labels_age = users_features[:, 1]
    n_users = gcn_user_embs.shape[0]
    batch = user_batch.shape[0]

    # items: fused f1/f2 filters + d_mask mix (single pass over item rows)
    item_f2, item_mix = item_filter_mix(gcn_item_embs, fparams, coeffs)

    # graph-aggregated users: adj @ (c1*item_f1 + c2*item_f2) by linearity,
    # local discriminators fused into the matmul finalize.
    logits_g_loc, logits_a_loc = adj_matmul_disc(adj, item_mix, dparams)
    d_loss1_local = cross_entropy_mean(logits_g_loc[:n_users, :2], labels_gender)
    d_loss2_local = cross_entropy_mean(logits_a_loc[:n_users, :2], labels_age)

    # user batch: fused filters + mix + discriminators + rating head.
    # TODO(synk): row gathers stay in XLA glue; an in-kernel Element(1) gather
    #             would force 1-row tiles and defeat the 128-row MXU tiling.
    u_emb_batch = gcn_user_embs[user_batch]
    item_b = item_f2[item_batch]
    logits_g, logits_a, stats = user_batch_fused(
        u_emb_batch, item_b, fparams, dparams, coeffs)
    d_loss1 = cross_entropy_mean(logits_g[:batch, :2], labels_gender[user_batch])
    d_loss2 = cross_entropy_mean(logits_a[:batch, :2], labels_age[user_batch])

    prediction = stats[:batch, 0]
    l2_rows = stats[:batch, 1]

    w_f0, w_f1 = 2.0, 1.0
    d_loss = (d_mask[0] * d_loss1 * w_f0 + d_mask[1] * d_loss2 * w_f1) / sum_d
    d_loss_local = d_mask[0] * d_loss1_local * w_f0 + d_mask[1] * d_loss2_local * w_f1

    loss_part = jnp.mean((prediction - rating_batch) ** 2)       # nn.MSELoss
    l2_regulization = 0.001 * l2_rows
    loss_p_square = loss_part + jnp.mean(l2_regulization)

    _lambda = 0.2
    d_loss_all = _lambda * (d_loss + 0.5 * d_loss_local)
    g_loss_all = 0.1 * loss_p_square - 10.0 * d_loss_all
    g_d_loss_all = -1.0 * d_loss_all
    return d_loss_all, g_loss_all, g_d_loss_all


# ------------------------------ param init / pack -----------------------------

def _linear(key, fan_in, fan_out):
    kw, kb = jax.random.split(key)
    bound = 1.0 / np.sqrt(fan_in)
    w = jax.random.uniform(kw, (fan_in, fan_out), jnp.float32, -bound, bound)
    b = jax.random.uniform(kb, (1, fan_out), jnp.float32, -bound, bound)
    return w, b


def init_filter(key, d):
    k1, k2, k3 = jax.random.split(key, 3)
    w1, b1 = _linear(k1, d, 2 * d)
    w2, b2 = _linear(k2, 2 * d, d)
    w3, b3 = _linear(k3, d, d)
    return (w1, b1, w2, b2, w3, b3)


def init_disc(key, d, out_dim=2):
    k1, k2, k3 = jax.random.split(key, 3)
    w1, b1 = _linear(k1, d, d // 4)
    w2, b2 = _linear(k2, d // 4, d // 8)
    w3, b3 = _linear(k3, d // 8, out_dim)
    return (w1, b1, w2, b2, w3, b3)


def _pad2(a, rows, cols):
    return jnp.pad(a, ((0, rows - a.shape[0]), (0, cols - a.shape[1])))


def _bias_stack(b1, b2, b3, width=LOGIT_PAD):
    return jnp.concatenate(
        [_pad2(b1, 1, width), _pad2(b2, 1, width), _pad2(b3, 1, width)], axis=0)


def pack_filters(f1, f2):
    """Stack gender/age AttributeFilter params along a leading axis of 2."""
    w1 = jnp.stack([f1[0], f2[0]]).astype(MM_DTYPE)          # (2, D, 2D)
    w2 = jnp.stack([f1[2], f2[2]]).astype(MM_DTYPE)          # (2, 2D, D)
    w3 = jnp.stack([f1[4], f2[4]]).astype(MM_DTYPE)          # (2, D, D)
    b = jnp.stack([_bias_stack(f1[1], f1[3], f1[5]),
                   _bias_stack(f2[1], f2[3], f2[5])])        # (2, 3, 128) f32
    return (w1, w2, w3, b)


def pack_discs(d1, d2, d):
    """Stack gender/age DisClf params, zero-padded to 128 lanes per layer."""
    def padded(p):
        return (_pad2(p[0], d, LOGIT_PAD),
                _pad2(p[2], LOGIT_PAD, LOGIT_PAD),
                _pad2(p[4], LOGIT_PAD, LOGIT_PAD))
    a, c = padded(d1), padded(d2)
    w1 = jnp.stack([a[0], c[0]]).astype(MM_DTYPE)            # (2, D, 128)
    w2 = jnp.stack([a[1], c[1]]).astype(MM_DTYPE)            # (2, 128, 128)
    w3 = jnp.stack([a[2], c[2]]).astype(MM_DTYPE)            # (2, 128, 128)
    bias = jnp.stack([_bias_stack(d1[1], d1[3], d1[5]),
                      _bias_stack(d2[1], d2[3], d2[5])])     # (2, 3, 128) f32
    return (w1, w2, w3, bias)


# ---------------------------------- main ---------------------------------------

if __name__ == "__main__":
    USER_NUM, ITEM_NUM, BATCH, D = 32, 48, 16, FACTOR

    root = jax.random.PRNGKey(0)
    ks = jax.random.split(root, 10)

    f1 = init_filter(ks[0], D)       # model_f1 (gender filter)
    f2 = init_filter(ks[1], D)       # model_f2 (age filter)
    d1 = init_disc(ks[2], D)         # model_d1 (gender discriminator)
    d2 = init_disc(ks[3], D)         # model_d2 (age discriminator)
    fparams = pack_filters(f1, f2)
    dparams = pack_discs(d1, d2, D)

    gcn_user_embs = jax.random.normal(ks[4], (USER_NUM, D), jnp.float32)
    gcn_item_embs = jax.random.normal(ks[5], (ITEM_NUM, D), jnp.float32)
    users_features = jax.random.randint(ks[6], (USER_NUM, 2), 0, 2, jnp.int32)

    # sparse user-item adjacency -> dense stand-in for the Pallas matmul
    # TODO(synk): at real lastfm scale a CSR/scalar-prefetch kernel replaces this.
    adj_dense = (jax.random.uniform(ks[7], (USER_NUM, ITEM_NUM)) < 0.1).astype(jnp.float32)
    adj_dense = adj_dense / jnp.maximum(adj_dense.sum(axis=1, keepdims=True), 1.0)

    user_batch = jax.random.randint(ks[8], (BATCH,), 0, USER_NUM, jnp.int32)
    item_batch = jax.random.randint(ks[9], (BATCH,), 0, ITEM_NUM, jnp.int32)
    rating_batch = jax.random.uniform(jax.random.fold_in(root, 99), (BATCH,), jnp.float32)

    # d_mask: replicate torch.randint resample-until-nonzero loop, deterministically
    rng = np.random.RandomState(0)
    while True:
        dm = rng.randint(0, 2, size=2)
        if dm.sum() > 0:
            break
    d_mask = jnp.asarray(dm, jnp.float32)

    fwd = jax.jit(informax_forward)
    d_loss_all, g_loss_all, g_d_loss_all = fwd(
        fparams, dparams, adj_dense, user_batch, rating_batch, item_batch,
        d_mask, gcn_user_embs, gcn_item_embs, users_features)
    jax.block_until_ready((d_loss_all, g_loss_all, g_d_loss_all))

    for v in (d_loss_all, g_loss_all, g_d_loss_all):
        assert np.isfinite(np.asarray(v)).all()
    print("KERNEL_OK")
</pallas_src>

<mosaic_0001>
module attributes {stable_mosaic.version = 11 : i64} {
  func.func @adj_disc_kernel(%arg0: i32, %arg1: i32, %arg2: memref<128x128xbf16, #tpu.memory_space<vmem>>, %arg3: memref<128x64xbf16, #tpu.memory_space<vmem>>, %arg4: memref<2x64x128xbf16, #tpu.memory_space<vmem>>, %arg5: memref<2x128x128xbf16, #tpu.memory_space<vmem>>, %arg6: memref<2x128x128xbf16, #tpu.memory_space<vmem>>, %arg7: memref<2x3x128xf32, #tpu.memory_space<vmem>>, %arg8: memref<128x128xf32, #tpu.memory_space<vmem>>, %arg9: memref<128x128xf32, #tpu.memory_space<vmem>>, %arg10: memref<128x64xf32, #tpu.memory_space<vmem>>) attributes {dimension_semantics = [#tpu.dimension_semantics<parallel>, #tpu.dimension_semantics<arbitrary>], iteration_bounds = array<i64: 1, 1>, scalar_prefetch = 0 : i64, scratch_operands = 1 : i64, tpu.core_type = #tpu.core_type<tc>, window_params = [{transform_indices = @transform_0, window_bounds = array<i64: 128, 128>}, {transform_indices = @transform_1, window_bounds = array<i64: 128, 64>}, {pipeline_mode = #tpu.pipeline_mode<synchronous>, transform_indices = @transform_2, window_bounds = array<i64: 2, 64, 128>}, {pipeline_mode = #tpu.pipeline_mode<synchronous>, transform_indices = @transform_3, window_bounds = array<i64: 2, 128, 128>}, {pipeline_mode = #tpu.pipeline_mode<synchronous>, transform_indices = @transform_4, window_bounds = array<i64: 2, 128, 128>}, {pipeline_mode = #tpu.pipeline_mode<synchronous>, transform_indices = @transform_5, window_bounds = array<i64: 2, 3, 128>}, {transform_indices = @transform_6, window_bounds = array<i64: 128, 128>}, {transform_indices = @transform_7, window_bounds = array<i64: 128, 128>}]} {
    %c0_i32 = arith.constant 0 : i32
    %0 = arith.cmpi eq, %arg1, %c0_i32 : i32
    %1 = arith.extui %0 : i1 to i32
    %c0_i32_0 = arith.constant 0 : i32
    %2 = arith.cmpi ne, %1, %c0_i32_0 : i32
    scf.if %2 {
      %cst_10 = arith.constant 0.000000e+00 : f32
      %12 = vector.broadcast %cst_10 : f32 to vector<128x64xf32>
      %c0_11 = arith.constant 0 : index
      %c0_12 = arith.constant 0 : index
      %13 = vector.load %arg10[%c0_11, %c0_12] : memref<128x64xf32, #tpu.memory_space<vmem>>, vector<128x64xf32>
      tpu.vector_store %arg10[%c0_11, %c0_12], %12 {strides = array<i32>} : memref<128x64xf32, #tpu.memory_space<vmem>>, vector<128x64xf32>,
    } else {
    }
    %c0 = arith.constant 0 : index
    %c0_1 = arith.constant 0 : index
    %3 = vector.load %arg10[%c0, %c0_1] : memref<128x64xf32, #tpu.memory_space<vmem>>, vector<128x64xf32>
    %c0_2 = arith.constant 0 : index
    %c0_3 = arith.constant 0 : index
    %4 = vector.load %arg2[%c0_2, %c0_3] : memref<128x128xbf16, #tpu.memory_space<vmem>>, vector<128x128xbf16>
    %c0_4 = arith.constant 0 : index
    %c0_5 = arith.constant 0 : index
    %5 = vector.load %arg3[%c0_4, %c0_5] : memref<128x64xbf16, #tpu.memory_space<vmem>>, vector<128x64xbf16>
    %cst = arith.constant dense<0.000000e+00> : vector<128x64xf32>
    %6 = tpu.matmul %4, %5, %cst {dimension_numbers = #tpu.dot_dimension_numbers<[1], [0], [0], [1], [0, 0, 1, 1], [], []>} : vector<128x128xbf16>, vector<128x64xbf16>, vector<128x64xf32> -> vector<128x64xf32>
    %7 = arith.addf %3, %6 : vector<128x64xf32>
    %c0_6 = arith.constant 0 : index
    %c0_7 = arith.constant 0 : index
    %8 = vector.load %arg10[%c0_6, %c0_7] : memref<128x64xf32, #tpu.memory_space<vmem>>, vector<128x64xf32>
    tpu.vector_store %arg10[%c0_6, %c0_7], %7 {strides = array<i32>} : memref<128x64xf32, #tpu.memory_space<vmem>>, vector<128x64xf32>,
    %c0_i32_8 = arith.constant 0 : i32
    %9 = arith.cmpi eq, %arg1, %c0_i32_8 : i32
    %10 = arith.extui %9 : i1 to i32
    %c0_i32_9 = arith.constant 0 : i32
    %11 = arith.cmpi ne, %10, %c0_i32_9 : i32
    scf.if %11 {
      %c0_10 = arith.constant 0 : index
      %c0_11 = arith.constant 0 : index
      %12 = vector.load %arg10[%c0_10, %c0_11] : memref<128x64xf32, #tpu.memory_space<vmem>>, vector<128x64xf32>
      %c0_12 = arith.constant 0 : index
      %c0_13 = arith.constant 0 : index
      %c0_14 = arith.constant 0 : index
      %13 = vector.load %arg4[%c0_12, %c0_13, %c0_14] : memref<2x64x128xbf16, #tpu.memory_space<vmem>>, vector<1x64x128xbf16>
      %14 = vector.shape_cast %13 : vector<1x64x128xbf16> to vector<64x128xbf16>
      %c0_15 = arith.constant 0 : index
      %c0_16 = arith.constant 0 : index
      %c0_17 = arith.constant 0 : index
      %15 = vector.load %arg5[%c0_15, %c0_16, %c0_17] : memref<2x128x128xbf16, #tpu.memory_space<vmem>>, vector<1x128x128xbf16>
      %16 = vector.shape_cast %15 : vector<1x128x128xbf16> to vector<128x128xbf16>
      %c0_18 = arith.constant 0 : index
      %c0_19 = arith.constant 0 : index
      %c0_20 = arith.constant 0 : index
      %17 = vector.load %arg6[%c0_18, %c0_19, %c0_20] : memref<2x128x128xbf16, #tpu.memory_space<vmem>>, vector<1x128x128xbf16>
      %18 = vector.shape_cast %17 : vector<1x128x128xbf16> to vector<128x128xbf16>
      %c0_21 = arith.constant 0 : index
      %c0_22 = arith.constant 0 : index
      %c0_23 = arith.constant 0 : index
      %19 = vector.load %arg7[%c0_21, %c0_22, %c0_23] : memref<2x3x128xf32, #tpu.memory_space<vmem>>, vector<1x3x128xf32>
      %20 = vector.shape_cast %19 : vector<1x3x128xf32> to vector<3x128xf32>
      %21 = arith.truncf %12 : vector<128x64xf32> to vector<128x64xbf16>
      %cst_24 = arith.constant dense<0.000000e+00> : vector<128x128xf32>
      %22 = tpu.matmul %21, %14, %cst_24 {dimension_numbers = #tpu.dot_dimension_numbers<[1], [0], [0], [1], [0, 0, 1, 1], [], []>} : vector<128x64xbf16>, vector<64x128xbf16>, vector<128x128xf32> -> vector<128x128xf32>
      %23 = vector.extract_strided_slice %20 {offsets = [0, 0], sizes = [1, 128], strides = [1, 1]} : vector<3x128xf32> to vector<1x128xf32>
      %24 = vector.broadcast %23 : vector<1x128xf32> to vector<128x128xf32>
      %25 = arith.addf %22, %24 : vector<128x128xf32>
      %cst_25 = arith.constant 0.000000e+00 : f32
      %26 = vector.broadcast %cst_25 : f32 to vector<128x128xf32>
      %27 = arith.cmpf ogt, %25, %26 : vector<128x128xf32>
      %cst_26 = arith.constant 2.000000e-01 : f32
      %28 = vector.broadcast %cst_26 : f32 to vector<128x128xf32>
      %29 = arith.mulf %28, %25 : vector<128x128xf32>
      %30 = arith.select %27, %25, %29 : vector<128x128xi1>, vector<128x128xf32>
      %31 = arith.truncf %30 : vector<128x128xf32> to vector<128x128xbf16>
      %cst_27 = arith.constant dense<0.000000e+00> : vector<128x128xf32>
      %32 = tpu.matmul %31, %16, %cst_27 {dimension_numbers = #tpu.dot_dimension_numbers<[1], [0], [0], [1], [0, 0, 1, 1], [], []>} : vector<128x128xbf16>, vector<128x128xbf16>, vector<128x128xf32> -> vector<128x128xf32>
      %33 = vector.extract_strided_slice %20 {offsets = [1, 0], sizes = [1, 128], strides = [1, 1]} : vector<3x128xf32> to vector<1x128xf32>
      %34 = vector.broadcast %33 : vector<1x128xf32> to vector<128x128xf32>
      %35 = arith.addf %32, %34 : vector<128x128xf32>
      %cst_28 = arith.constant 0.000000e+00 : f32
      %36 = vector.broadcast %cst_28 : f32 to vector<128x128xf32>
      %37 = arith.cmpf ogt, %35, %36 : vector<128x128xf32>
      %cst_29 = arith.constant 2.000000e-01 : f32
      %38 = vector.broadcast %cst_29 : f32 to vector<128x128xf32>
      %39 = arith.mulf %38, %35 : vector<128x128xf32>
      %40 = arith.select %37, %35, %39 : vector<128x128xi1>, vector<128x128xf32>
      %41 = arith.truncf %40 : vector<128x128xf32> to vector<128x128xbf16>
      %cst_30 = arith.constant dense<0.000000e+00> : vector<128x128xf32>
      %42 = tpu.matmul %41, %18, %cst_30 {dimension_numbers = #tpu.dot_dimension_numbers<[1], [0], [0], [1], [0, 0, 1, 1], [], []>} : vector<128x128xbf16>, vector<128x128xbf16>, vector<128x128xf32> -> vector<128x128xf32>
      %43 = vector.extract_strided_slice %20 {offsets = [2, 0], sizes = [1, 128], strides = [1, 1]} : vector<3x128xf32> to vector<1x128xf32>
      %44 = vector.broadcast %43 : vector<1x128xf32> to vector<128x128xf32>
      %45 = arith.addf %42, %44 : vector<128x128xf32>
      %c0_31 = arith.constant 0 : index
      %c0_32 = arith.constant 0 : index
      %46 = vector.load %arg8[%c0_31, %c0_32] : memref<128x128xf32, #tpu.memory_space<vmem>>, vector<128x128xf32>
      tpu.vector_store %arg8[%c0_31, %c0_32], %45 {strides = array<i32>} : memref<128x128xf32, #tpu.memory_space<vmem>>, vector<128x128xf32>,
      %c1 = arith.constant 1 : index
      %c0_33 = arith.constant 0 : index
      %c0_34 = arith.constant 0 : index
      %47 = vector.load %arg4[%c1, %c0_33, %c0_34] : memref<2x64x128xbf16, #tpu.memory_space<vmem>>, vector<1x64x128xbf16>
      %48 = vector.shape_cast %47 : vector<1x64x128xbf16> to vector<64x128xbf16>
      %c1_35 = arith.constant 1 : index
      %c0_36 = arith.constant 0 : index
      %c0_37 = arith.constant 0 : index
      %49 = vector.load %arg5[%c1_35, %c0_36, %c0_37] : memref<2x128x128xbf16, #tpu.memory_space<vmem>>, vector<1x128x128xbf16>
      %50 = vector.shape_cast %49 : vector<1x128x128xbf16> to vector<128x128xbf16>
      %c1_38 = arith.constant 1 : index
      %c0_39 = arith.constant 0 : index
      %c0_40 = arith.constant 0 : index
      %51 = vector.load %arg6[%c1_38, %c0_39, %c0_40] : memref<2x128x128xbf16, #tpu.memory_space<vmem>>, vector<1x128x128xbf16>
      %52 = vector.shape_cast %51 : vector<1x128x128xbf16> to vector<128x128xbf16>
      %c1_41 = arith.constant 1 : index
      %c0_42 = arith.constant 0 : index
      %c0_43 = arith.constant 0 : index
      %53 = vector.load %arg7[%c1_41, %c0_42, %c0_43] : memref<2x3x128xf32, #tpu.memory_space<vmem>>, vector<1x3x128xf32>
      %54 = vector.shape_cast %53 : vector<1x3x128xf32> to vector<3x128xf32>
      %55 = arith.truncf %12 : vector<128x64xf32> to vector<128x64xbf16>
      %cst_44 = arith.constant dense<0.000000e+00> : vector<128x128xf32>
      %56 = tpu.matmul %55, %48, %cst_44 {dimension_numbers = #tpu.dot_dimension_numbers<[1], [0], [0], [1], [0, 0, 1, 1], [], []>} : vector<128x64xbf16>, vector<64x128xbf16>, vector<128x128xf32> -> vector<128x128xf32>
      %57 = vector.extract_strided_slice %54 {offsets = [0, 0], sizes = [1, 128], strides = [1, 1]} : vector<3x128xf32> to vector<1x128xf32>
      %58 = vector.broadcast %57 : vector<1x128xf32> to vector<128x128xf32>
      %59 = arith.addf %56, %58 : vector<128x128xf32>
      %cst_45 = arith.constant 0.000000e+00 : f32
      %60 = vector.broadcast %cst_45 : f32 to vector<128x128xf32>
      %61 = arith.cmpf ogt, %59, %60 : vector<128x128xf32>
      %cst_46 = arith.constant 2.000000e-01 : f32
      %62 = vector.broadcast %cst_46 : f32 to vector<128x128xf32>
      %63 = arith.mulf %62, %59 : vector<128x128xf32>
      %64 = arith.select %61, %59, %63 : vector<128x128xi1>, vector<128x128xf32>
      %65 = arith.truncf %64 : vector<128x128xf32> to vector<128x128xbf16>
      %cst_47 = arith.constant dense<0.000000e+00> : vector<128x128xf32>
      %66 = tpu.matmul %65, %50, %cst_47 {dimension_numbers = #tpu.dot_dimension_numbers<[1], [0], [0], [1], [0, 0, 1, 1], [], []>} : vector<128x128xbf16>, vector<128x128xbf16>, vector<128x128xf32> -> vector<128x128xf32>
      %67 = vector.extract_strided_slice %54 {offsets = [1, 0], sizes = [1, 128], strides = [1, 1]} : vector<3x128xf32> to vector<1x128xf32>
      %68 = vector.broadcast %67 : vector<1x128xf32> to vector<128x128xf32>
      %69 = arith.addf %66, %68 : vector<128x128xf32>
      %cst_48 = arith.constant 0.000000e+00 : f32
      %70 = vector.broadcast %cst_48 : f32 to vector<128x128xf32>
      %71 = arith.cmpf ogt, %69, %70 : vector<128x128xf32>
      %cst_49 = arith.constant 2.000000e-01 : f32
      %72 = vector.broadcast %cst_49 : f32 to vector<128x128xf32>
      %73 = arith.mulf %72, %69 : vector<128x128xf32>
      %74 = arith.select %71, %69, %73 : vector<128x128xi1>, vector<128x128xf32>
      %75 = arith.truncf %74 : vector<128x128xf32> to vector<128x128xbf16>
      %cst_50 = arith.constant dense<0.000000e+00> : vector<128x128xf32>
      %76 = tpu.matmul %75, %52, %cst_50 {dimension_numbers = #tpu.dot_dimension_numbers<[1], [0], [0], [1], [0, 0, 1, 1], [], []>} : vector<128x128xbf16>, vector<128x128xbf16>, vector<128x128xf32> -> vector<128x128xf32>
      %77 = vector.extract_strided_slice %54 {offsets = [2, 0], sizes = [1, 128], strides = [1, 1]} : vector<3x128xf32> to vector<1x128xf32>
      %78 = vector.broadcast %77 : vector<1x128xf32> to vector<128x128xf32>
      %79 = arith.addf %76, %78 : vector<128x128xf32>
      %c0_51 = arith.constant 0 : index
      %c0_52 = arith.constant 0 : index
      %80 = vector.load %arg9[%c0_51, %c0_52] : memref<128x128xf32, #tpu.memory_space<vmem>>, vector<128x128xf32>
      tpu.vector_store %arg9[%c0_51, %c0_52], %79 {strides = array<i32>} : memref<128x128xf32, #tpu.memory_space<vmem>>, vector<128x128xf32>,
    } else {
    }
    return
  }
  func.func @transform_0(%arg0: i32, %arg1: i32) -> (i32, i32) {
    %c0_i32 = arith.constant 0 : i32
    return %arg0, %arg1 : i32, i32
  }
  func.func @transform_1(%arg0: i32, %arg1: i32) -> (i32, i32) {
    %c0_i32 = arith.constant 0 : i32
    %c0_i32_0 = arith.constant 0 : i32
    return %arg1, %c0_i32 : i32, i32
  }
  func.func @transform_2(%arg0: i32, %arg1: i32) -> (i32, i32, i32) {
    %c0_i32 = arith.constant 0 : i32
    %c0_i32_0 = arith.constant 0 : i32
    %c0_i32_1 = arith.constant 0 : i32
    %c0_i32_2 = arith.constant 0 : i32
    return %c0_i32, %c0_i32_0, %c0_i32_1 : i32, i32, i32
  }
  func.func @transform_3(%arg0: i32, %arg1: i32) -> (i32, i32, i32) {
    %c0_i32 = arith.constant 0 : i32
    %c0_i32_0 = arith.constant 0 : i32
    %c0_i32_1 = arith.constant 0 : i32
    %c0_i32_2 = arith.constant 0 : i32
    return %c0_i32, %c0_i32_0, %c0_i32_1 : i32, i32, i32
  }
  func.func @transform_4(%arg0: i32, %arg1: i32) -> (i32, i32, i32) {
    %c0_i32 = arith.constant 0 : i32
    %c0_i32_0 = arith.constant 0 : i32
    %c0_i32_1 = arith.constant 0 : i32
    %c0_i32_2 = arith.constant 0 : i32
    return %c0_i32, %c0_i32_0, %c0_i32_1 : i32, i32, i32
  }
  func.func @transform_5(%arg0: i32, %arg1: i32) -> (i32, i32, i32) {
    %c0_i32 = arith.constant 0 : i32
    %c0_i32_0 = arith.constant 0 : i32
    %c0_i32_1 = arith.constant 0 : i32
    %c0_i32_2 = arith.constant 0 : i32
    return %c0_i32, %c0_i32_0, %c0_i32_1 : i32, i32, i32
  }
  func.func @transform_6(%arg0: i32, %arg1: i32) -> (i32, i32) {
    %c0_i32 = arith.constant 0 : i32
    %c0_i32_0 = arith.constant 0 : i32
    return %arg0, %c0_i32 : i32, i32
  }
  func.func @transform_7(%arg0: i32, %arg1: i32) -> (i32, i32) {
    %c0_i32 = arith.constant 0 : i32
    %c0_i32_0 = arith.constant 0 : i32
    return %arg0, %c0_i32 : i32, i32
  }
}

module attributes {stable_mosaic.version = 11 : i64} {
  func.func @item_filter_mix_kernel(%arg0: i32, %arg1: memref<1x2xf32, #tpu.memory_space<vmem>>, %arg2: memref<128x64xbf16, #tpu.memory_space<vmem>>, %arg3: memref<2x64x128xbf16, #tpu.memory_space<vmem>>, %arg4: memref<2x128x64xbf16, #tpu.memory_space<vmem>>, %arg5: memref<2x64x64xbf16, #tpu.memory_space<vmem>>, %arg6: memref<2x3x128xf32, #tpu.memory_space<vmem>>, %arg7: memref<128x64xf32, #tpu.memory_space<vmem>>, %arg8: memref<128x64xbf16, #tpu.memory_space<vmem>>) attributes {dimension_semantics = [#tpu.dimension_semantics<parallel>], iteration_bounds = array<i64: 1>, scalar_prefetch = 0 : i64, scratch_operands = 0 : i64, tpu.core_type = #tpu.core_type<tc>, window_params = [{pipeline_mode = #tpu.pipeline_mode<synchronous>, transform_indices = @transform_0, window_bounds = array<i64: 1, 2>}, {transform_indices = @transform_1, window_bounds = array<i64: 128, 64>}, {pipeline_mode = #tpu.pipeline_mode<synchronous>, transform_indices = @transform_2, window_bounds = array<i64: 2, 64, 128>}, {pipeline_mode = #tpu.pipeline_mode<synchronous>, transform_indices = @transform_3, window_bounds = array<i64: 2, 128, 64>}, {pipeline_mode = #tpu.pipeline_mode<synchronous>, transform_indices = @transform_4, window_bounds = array<i64: 2, 64, 64>}, {pipeline_mode = #tpu.pipeline_mode<synchronous>, transform_indices = @transform_5, window_bounds = array<i64: 2, 3, 128>}, {transform_indices = @transform_6, window_bounds = array<i64: 128, 64>}, {transform_indices = @transform_7, window_bounds = array<i64: 128, 64>}]} {
    %c0 = arith.constant 0 : index
    %c0_0 = arith.constant 0 : index
    %0 = vector.load %arg2[%c0, %c0_0] : memref<128x64xbf16, #tpu.memory_space<vmem>>, vector<128x64xbf16>
    %c0_1 = arith.constant 0 : index
    %c0_2 = arith.constant 0 : index
    %1 = vector.load %arg1[%c0_1, %c0_2] : memref<1x2xf32, #tpu.memory_space<vmem>>, vector<1x2xf32>
    %c0_3 = arith.constant 0 : index
    %c0_4 = arith.constant 0 : index
    %c0_5 = arith.constant 0 : index
    %2 = vector.load %arg3[%c0_3, %c0_4, %c0_5] : memref<2x64x128xbf16, #tpu.memory_space<vmem>>, vector<1x64x128xbf16>
    %3 = vector.shape_cast %2 : vector<1x64x128xbf16> to vector<64x128xbf16>
    %c0_6 = arith.constant 0 : index
    %c0_7 = arith.constant 0 : index
    %c0_8 = arith.constant 0 : index
    %4 = vector.load %arg4[%c0_6, %c0_7, %c0_8] : memref<2x128x64xbf16, #tpu.memory_space<vmem>>, vector<1x128x64xbf16>
    %5 = vector.shape_cast %4 : vector<1x128x64xbf16> to vector<128x64xbf16>
    %c0_9 = arith.constant 0 : index
    %c0_10 = arith.constant 0 : index
    %c0_11 = arith.constant 0 : index
    %6 = vector.load %arg5[%c0_9, %c0_10, %c0_11] : memref<2x64x64xbf16, #tpu.memory_space<vmem>>, vector<1x64x64xbf16>
    %7 = vector.shape_cast %6 : vector<1x64x64xbf16> to vector<64x64xbf16>
    %c0_12 = arith.constant 0 : index
    %c0_13 = arith.constant 0 : index
    %c0_14 = arith.constant 0 : index
    %8 = vector.load %arg6[%c0_12, %c0_13, %c0_14] : memref<2x3x128xf32, #tpu.memory_space<vmem>>, vector<1x3x128xf32>
    %9 = vector.shape_cast %8 : vector<1x3x128xf32> to vector<3x128xf32>
    %cst = arith.constant dense<0.000000e+00> : vector<128x128xf32>
    %10 = tpu.matmul %0, %3, %cst {dimension_numbers = #tpu.dot_dimension_numbers<[1], [0], [0], [1], [0, 0, 1, 1], [], []>} : vector<128x64xbf16>, vector<64x128xbf16>, vector<128x128xf32> -> vector<128x128xf32>
    %11 = vector.extract_strided_slice %9 {offsets = [0, 0], sizes = [1, 128], strides = [1, 1]} : vector<3x128xf32> to vector<1x128xf32>
    %12 = vector.broadcast %11 : vector<1x128xf32> to vector<128x128xf32>
    %13 = arith.addf %10, %12 : vector<128x128xf32>
    %cst_15 = arith.constant 0.000000e+00 : f32
    %14 = vector.broadcast %cst_15 : f32 to vector<128x128xf32>
    %15 = arith.cmpf ogt, %13, %14 : vector<128x128xf32>
    %cst_16 = arith.constant 2.000000e-01 : f32
    %16 = vector.broadcast %cst_16 : f32 to vector<128x128xf32>
    %17 = arith.mulf %16, %13 : vector<128x128xf32>
    %18 = arith.select %15, %13, %17 : vector<128x128xi1>, vector<128x128xf32>
    %19 = arith.truncf %18 : vector<128x128xf32> to vector<128x128xbf16>
    %cst_17 = arith.constant dense<0.000000e+00> : vector<128x64xf32>
    %20 = tpu.matmul %19, %5, %cst_17 {dimension_numbers = #tpu.dot_dimension_numbers<[1], [0], [0], [1], [0, 0, 1, 1], [], []>} : vector<128x128xbf16>, vector<128x64xbf16>, vector<128x64xf32> -> vector<128x64xf32>
    %21 = vector.extract_strided_slice %9 {offsets = [1, 0], sizes = [1, 64], strides = [1, 1]} : vector<3x128xf32> to vector<1x64xf32>
    %22 = vector.broadcast %21 : vector<1x64xf32> to vector<128x64xf32>
    %23 = arith.addf %20, %22 : vector<128x64xf32>
    %cst_18 = arith.constant 0.000000e+00 : f32
    %24 = vector.broadcast %cst_18 : f32 to vector<128x64xf32>
    %25 = arith.cmpf ogt, %23, %24 : vector<128x64xf32>
    %cst_19 = arith.constant 2.000000e-01 : f32
    %26 = vector.broadcast %cst_19 : f32 to vector<128x64xf32>
    %27 = arith.mulf %26, %23 : vector<128x64xf32>
    %28 = arith.select %25, %23, %27 : vector<128x64xi1>, vector<128x64xf32>
    %29 = arith.truncf %28 : vector<128x64xf32> to vector<128x64xbf16>
    %cst_20 = arith.constant dense<0.000000e+00> : vector<128x64xf32>
    %30 = tpu.matmul %29, %7, %cst_20 {dimension_numbers = #tpu.dot_dimension_numbers<[1], [0], [0], [1], [0, 0, 1, 1], [], []>} : vector<128x64xbf16>, vector<64x64xbf16>, vector<128x64xf32> -> vector<128x64xf32>
    %31 = vector.extract_strided_slice %9 {offsets = [2, 0], sizes = [1, 64], strides = [1, 1]} : vector<3x128xf32> to vector<1x64xf32>
    %32 = vector.broadcast %31 : vector<1x64xf32> to vector<128x64xf32>
    %33 = arith.addf %30, %32 : vector<128x64xf32>
    %c1 = arith.constant 1 : index
    %c0_21 = arith.constant 0 : index
    %c0_22 = arith.constant 0 : index
    %34 = vector.load %arg3[%c1, %c0_21, %c0_22] : memref<2x64x128xbf16, #tpu.memory_space<vmem>>, vector<1x64x128xbf16>
    %35 = vector.shape_cast %34 : vector<1x64x128xbf16> to vector<64x128xbf16>
    %c1_23 = arith.constant 1 : index
    %c0_24 = arith.constant 0 : index
    %c0_25 = arith.constant 0 : index
    %36 = vector.load %arg4[%c1_23, %c0_24, %c0_25] : memref<2x128x64xbf16, #tpu.memory_space<vmem>>, vector<1x128x64xbf16>
    %37 = vector.shape_cast %36 : vector<1x128x64xbf16> to vector<128x64xbf16>
    %c1_26 = arith.constant 1 : index
    %c0_27 = arith.constant 0 : index
    %c0_28 = arith.constant 0 : index
    %38 = vector.load %arg5[%c1_26, %c0_27, %c0_28] : memref<2x64x64xbf16, #tpu.memory_space<vmem>>, vector<1x64x64xbf16>
    %39 = vector.shape_cast %38 : vector<1x64x64xbf16> to vector<64x64xbf16>
    %c1_29 = arith.constant 1 : index
    %c0_30 = arith.constant 0 : index
    %c0_31 = arith.constant 0 : index
    %40 = vector.load %arg6[%c1_29, %c0_30, %c0_31] : memref<2x3x128xf32, #tpu.memory_space<vmem>>, vector<1x3x128xf32>
    %41 = vector.shape_cast %40 : vector<1x3x128xf32> to vector<3x128xf32>
    %cst_32 = arith.constant dense<0.000000e+00> : vector<128x128xf32>
    %42 = tpu.matmul %0, %35, %cst_32 {dimension_numbers = #tpu.dot_dimension_numbers<[1], [0], [0], [1], [0, 0, 1, 1], [], []>} : vector<128x64xbf16>, vector<64x128xbf16>, vector<128x128xf32> -> vector<128x128xf32>
    %43 = vector.extract_strided_slice %41 {offsets = [0, 0], sizes = [1, 128], strides = [1, 1]} : vector<3x128xf32> to vector<1x128xf32>
    %44 = vector.broadcast %43 : vector<1x128xf32> to vector<128x128xf32>
    %45 = arith.addf %42, %44 : vector<128x128xf32>
    %cst_33 = arith.constant 0.000000e+00 : f32
    %46 = vector.broadcast %cst_33 : f32 to vector<128x128xf32>
    %47 = arith.cmpf ogt, %45, %46 : vector<128x128xf32>
    %cst_34 = arith.constant 2.000000e-01 : f32
    %48 = vector.broadcast %cst_34 : f32 to vector<128x128xf32>
    %49 = arith.mulf %48, %45 : vector<128x128xf32>
    %50 = arith.select %47, %45, %49 : vector<128x128xi1>, vector<128x128xf32>
    %51 = arith.truncf %50 : vector<128x128xf32> to vector<128x128xbf16>
    %cst_35 = arith.constant dense<0.000000e+00> : vector<128x64xf32>
    %52 = tpu.matmul %51, %37, %cst_35 {dimension_numbers = #tpu.dot_dimension_numbers<[1], [0], [0], [1], [0, 0, 1, 1], [], []>} : vector<128x128xbf16>, vector<128x64xbf16>, vector<128x64xf32> -> vector<128x64xf32>
    %53 = vector.extract_strided_slice %41 {offsets = [1, 0], sizes = [1, 64], strides = [1, 1]} : vector<3x128xf32> to vector<1x64xf32>
    %54 = vector.broadcast %53 : vector<1x64xf32> to vector<128x64xf32>
    %55 = arith.addf %52, %54 : vector<128x64xf32>
    %cst_36 = arith.constant 0.000000e+00 : f32
    %56 = vector.broadcast %cst_36 : f32 to vector<128x64xf32>
    %57 = arith.cmpf ogt, %55, %56 : vector<128x64xf32>
    %cst_37 = arith.constant 2.000000e-01 : f32
    %58 = vector.broadcast %cst_37 : f32 to vector<128x64xf32>
    %59 = arith.mulf %58, %55 : vector<128x64xf32>
    %60 = arith.select %57, %55, %59 : vector<128x64xi1>, vector<128x64xf32>
    %61 = arith.truncf %60 : vector<128x64xf32> to vector<128x64xbf16>
    %cst_38 = arith.constant dense<0.000000e+00> : vector<128x64xf32>
    %62 = tpu.matmul %61, %39, %cst_38 {dimension_numbers = #tpu.dot_dimension_numbers<[1], [0], [0], [1], [0, 0, 1, 1], [], []>} : vector<128x64xbf16>, vector<64x64xbf16>, vector<128x64xf32> -> vector<128x64xf32>
    %63 = vector.extract_strided_slice %41 {offsets = [2, 0], sizes = [1, 64], strides = [1, 1]} : vector<3x128xf32> to vector<1x64xf32>
    %64 = vector.broadcast %63 : vector<1x64xf32> to vector<128x64xf32>
    %65 = arith.addf %62, %64 : vector<128x64xf32>
    %c0_39 = arith.constant 0 : index
    %c0_40 = arith.constant 0 : index
    %66 = vector.load %arg7[%c0_39, %c0_40] : memref<128x64xf32, #tpu.memory_space<vmem>>, vector<128x64xf32>
    tpu.vector_store %arg7[%c0_39, %c0_40], %65 {strides = array<i32>} : memref<128x64xf32, #tpu.memory_space<vmem>>, vector<128x64xf32>,
    %67 = vector.extract_strided_slice %1 {offsets = [0, 0], sizes = [1, 1], strides = [1, 1]} : vector<1x2xf32> to vector<1x1xf32>
    %68 = vector.broadcast %67 : vector<1x1xf32> to vector<128x64xf32>
    %69 = arith.mulf %68, %33 : vector<128x64xf32>
    %70 = vector.extract_strided_slice %1 {offsets = [0, 1], sizes = [1, 1], strides = [1, 1]} : vector<1x2xf32> to vector<1x1xf32>
    %71 = vector.broadcast %70 : vector<1x1xf32> to vector<128x64xf32>
    %72 = arith.mulf %71, %65 : vector<128x64xf32>
    %73 = arith.addf %69, %72 : vector<128x64xf32>
    %74 = arith.truncf %73 : vector<128x64xf32> to vector<128x64xbf16>
    %c0_41 = arith.constant 0 : index
    %c0_42 = arith.constant 0 : index
    %75 = vector.load %arg8[%c0_41, %c0_42] : memref<128x64xbf16, #tpu.memory_space<vmem>>, vector<128x64xbf16>
    tpu.vector_store %arg8[%c0_41, %c0_42], %74 {strides = array<i32>} : memref<128x64xbf16, #tpu.memory_space<vmem>>, vector<128x64xbf16>,
    return
  }
  func.func @transform_0(%arg0: i32) -> (i32, i32) {
    %c0_i32 = arith.constant 0 : i32
    %c0_i32_0 = arith.constant 0 : i32
    %c0_i32_1 = arith.constant 0 : i32
    return %c0_i32, %c0_i32_0 : i32, i32
  }
  func.func @transform_1(%arg0: i32) -> (i32, i32) {
    %c0_i32 = arith.constant 0 : i32
    %c0_i32_0 = arith.constant 0 : i32
    return %arg0, %c0_i32 : i32, i32
  }
  func.func @transform_2(%arg0: i32) -> (i32, i32, i32) {
    %c0_i32 = arith.constant 0 : i32
    %c0_i32_0 = arith.constant 0 : i32
    %c0_i32_1 = arith.constant 0 : i32
    %c0_i32_2 = arith.constant 0 : i32
    return %c0_i32, %c0_i32_0, %c0_i32_1 : i32, i32, i32
  }
  func.func @transform_3(%arg0: i32) -> (i32, i32, i32) {
    %c0_i32 = arith.constant 0 : i32
    %c0_i32_0 = arith.constant 0 : i32
    %c0_i32_1 = arith.constant 0 : i32
    %c0_i32_2 = arith.constant 0 : i32
    return %c0_i32, %c0_i32_0, %c0_i32_1 : i32, i32, i32
  }
  func.func @transform_4(%arg0: i32) -> (i32, i32, i32) {
    %c0_i32 = arith.constant 0 : i32
    %c0_i32_0 = arith.constant 0 : i32
    %c0_i32_1 = arith.constant 0 : i32
    %c0_i32_2 = arith.constant 0 : i32
    return %c0_i32, %c0_i32_0, %c0_i32_1 : i32, i32, i32
  }
  func.func @transform_5(%arg0: i32) -> (i32, i32, i32) {
    %c0_i32 = arith.constant 0 : i32
    %c0_i32_0 = arith.constant 0 : i32
    %c0_i32_1 = arith.constant 0 : i32
    %c0_i32_2 = arith.constant 0 : i32
    return %c0_i32, %c0_i32_0, %c0_i32_1 : i32, i32, i32
  }
  func.func @transform_6(%arg0: i32) -> (i32, i32) {
    %c0_i32 = arith.constant 0 : i32
    %c0_i32_0 = arith.constant 0 : i32
    return %arg0, %c0_i32 : i32, i32
  }
  func.func @transform_7(%arg0: i32) -> (i32, i32) {
    %c0_i32 = arith.constant 0 : i32
    %c0_i32_0 = arith.constant 0 : i32
    return %arg0, %c0_i32 : i32, i32
  }
}

module attributes {stable_mosaic.version = 11 : i64} {
  func.func @user_batch_fused_kernel(%arg0: i32, %arg1: memref<1x2xf32, #tpu.memory_space<vmem>>, %arg2: memref<128x64xbf16, #tpu.memory_space<vmem>>, %arg3: memref<128x64xf32, #tpu.memory_space<vmem>>, %arg4: memref<2x64x128xbf16, #tpu.memory_space<vmem>>, %arg5: memref<2x128x64xbf16, #tpu.memory_space<vmem>>, %arg6: memref<2x64x64xbf16, #tpu.memory_space<vmem>>, %arg7: memref<2x3x128xf32, #tpu.memory_space<vmem>>, %arg8: memref<2x64x128xbf16, #tpu.memory_space<vmem>>, %arg9: memref<2x128x128xbf16, #tpu.memory_space<vmem>>, %arg10: memref<2x128x128xbf16, #tpu.memory_space<vmem>>, %arg11: memref<2x3x128xf32, #tpu.memory_space<vmem>>, %arg12: memref<128x128xf32, #tpu.memory_space<vmem>>, %arg13: memref<128x128xf32, #tpu.memory_space<vmem>>, %arg14: memref<128x128xf32, #tpu.memory_space<vmem>>) attributes {dimension_semantics = [#tpu.dimension_semantics<parallel>], iteration_bounds = array<i64: 1>, scalar_prefetch = 0 : i64, scratch_operands = 0 : i64, tpu.core_type = #tpu.core_type<tc>, window_params = [{pipeline_mode = #tpu.pipeline_mode<synchronous>, transform_indices = @transform_0, window_bounds = array<i64: 1, 2>}, {transform_indices = @transform_1, window_bounds = array<i64: 128, 64>}, {transform_indices = @transform_2, window_bounds = array<i64: 128, 64>}, {pipeline_mode = #tpu.pipeline_mode<synchronous>, transform_indices = @transform_3, window_bounds = array<i64: 2, 64, 128>}, {pipeline_mode = #tpu.pipeline_mode<synchronous>, transform_indices = @transform_4, window_bounds = array<i64: 2, 128, 64>}, {pipeline_mode = #tpu.pipeline_mode<synchronous>, transform_indices = @transform_5, window_bounds = array<i64: 2, 64, 64>}, {pipeline_mode = #tpu.pipeline_mode<synchronous>, transform_indices = @transform_6, window_bounds = array<i64: 2, 3, 128>}, {pipeline_mode = #tpu.pipeline_mode<synchronous>, transform_indices = @transform_7, window_bounds = array<i64: 2, 64, 128>}, {pipeline_mode = #tpu.pipeline_mode<synchronous>, transform_indices = @transform_8, window_bounds = array<i64: 2, 128, 128>}, {pipeline_mode = #tpu.pipeline_mode<synchronous>, transform_indices = @transform_9, window_bounds = array<i64: 2, 128, 128>}, {pipeline_mode = #tpu.pipeline_mode<synchronous>, transform_indices = @transform_10, window_bounds = array<i64: 2, 3, 128>}, {transform_indices = @transform_11, window_bounds = array<i64: 128, 128>}, {transform_indices = @transform_12, window_bounds = array<i64: 128, 128>}, {transform_indices = @transform_13, window_bounds = array<i64: 128, 128>}]} {
    %c0 = arith.constant 0 : index
    %c0_0 = arith.constant 0 : index
    %0 = vector.load %arg2[%c0, %c0_0] : memref<128x64xbf16, #tpu.memory_space<vmem>>, vector<128x64xbf16>
    %c0_1 = arith.constant 0 : index
    %c0_2 = arith.constant 0 : index
    %1 = vector.load %arg1[%c0_1, %c0_2] : memref<1x2xf32, #tpu.memory_space<vmem>>, vector<1x2xf32>
    %c0_3 = arith.constant 0 : index
    %c0_4 = arith.constant 0 : index
    %c0_5 = arith.constant 0 : index
    %2 = vector.load %arg4[%c0_3, %c0_4, %c0_5] : memref<2x64x128xbf16, #tpu.memory_space<vmem>>, vector<1x64x128xbf16>
    %3 = vector.shape_cast %2 : vector<1x64x128xbf16> to vector<64x128xbf16>
    %c0_6 = arith.constant 0 : index
    %c0_7 = arith.constant 0 : index
    %c0_8 = arith.constant 0 : index
    %4 = vector.load %arg5[%c0_6, %c0_7, %c0_8] : memref<2x128x64xbf16, #tpu.memory_space<vmem>>, vector<1x128x64xbf16>
    %5 = vector.shape_cast %4 : vector<1x128x64xbf16> to vector<128x64xbf16>
    %c0_9 = arith.constant 0 : index
    %c0_10 = arith.constant 0 : index
    %c0_11 = arith.constant 0 : index
    %6 = vector.load %arg6[%c0_9, %c0_10, %c0_11] : memref<2x64x64xbf16, #tpu.memory_space<vmem>>, vector<1x64x64xbf16>
    %7 = vector.shape_cast %6 : vector<1x64x64xbf16> to vector<64x64xbf16>
    %c0_12 = arith.constant 0 : index
    %c0_13 = arith.constant 0 : index
    %c0_14 = arith.constant 0 : index
    %8 = vector.load %arg7[%c0_12, %c0_13, %c0_14] : memref<2x3x128xf32, #tpu.memory_space<vmem>>, vector<1x3x128xf32>
    %9 = vector.shape_cast %8 : vector<1x3x128xf32> to vector<3x128xf32>
    %cst = arith.constant dense<0.000000e+00> : vector<128x128xf32>
    %10 = tpu.matmul %0, %3, %cst {dimension_numbers = #tpu.dot_dimension_numbers<[1], [0], [0], [1], [0, 0, 1, 1], [], []>} : vector<128x64xbf16>, vector<64x128xbf16>, vector<128x128xf32> -> vector<128x128xf32>
    %11 = vector.extract_strided_slice %9 {offsets = [0, 0], sizes = [1, 128], strides = [1, 1]} : vector<3x128xf32> to vector<1x128xf32>
    %12 = vector.broadcast %11 : vector<1x128xf32> to vector<128x128xf32>
    %13 = arith.addf %10, %12 : vector<128x128xf32>
    %cst_15 = arith.constant 0.000000e+00 : f32
    %14 = vector.broadcast %cst_15 : f32 to vector<128x128xf32>
    %15 = arith.cmpf ogt, %13, %14 : vector<128x128xf32>
    %cst_16 = arith.constant 2.000000e-01 : f32
    %16 = vector.broadcast %cst_16 : f32 to vector<128x128xf32>
    %17 = arith.mulf %16, %13 : vector<128x128xf32>
    %18 = arith.select %15, %13, %17 : vector<128x128xi1>, vector<128x128xf32>
    %19 = arith.truncf %18 : vector<128x128xf32> to vector<128x128xbf16>
    %cst_17 = arith.constant dense<0.000000e+00> : vector<128x64xf32>
    %20 = tpu.matmul %19, %5, %cst_17 {dimension_numbers = #tpu.dot_dimension_numbers<[1], [0], [0], [1], [0, 0, 1, 1], [], []>} : vector<128x128xbf16>, vector<128x64xbf16>, vector<128x64xf32> -> vector<128x64xf32>
    %21 = vector.extract_strided_slice %9 {offsets = [1, 0], sizes = [1, 64], strides = [1, 1]} : vector<3x128xf32> to vector<1x64xf32>
    %22 = vector.broadcast %21 : vector<1x64xf32> to vector<128x64xf32>
    %23 = arith.addf %20, %22 : vector<128x64xf32>
    %cst_18 = arith.constant 0.000000e+00 : f32
    %24 = vector.broadcast %cst_18 : f32 to vector<128x64xf32>
    %25 = arith.cmpf ogt, %23, %24 : vector<128x64xf32>
    %cst_19 = arith.constant 2.000000e-01 : f32
    %26 = vector.broadcast %cst_19 : f32 to vector<128x64xf32>
    %27 = arith.mulf %26, %23 : vector<128x64xf32>
    %28 = arith.select %25, %23, %27 : vector<128x64xi1>, vector<128x64xf32>
    %29 = arith.truncf %28 : vector<128x64xf32> to vector<128x64xbf16>
    %cst_20 = arith.constant dense<0.000000e+00> : vector<128x64xf32>
    %30 = tpu.matmul %29, %7, %cst_20 {dimension_numbers = #tpu.dot_dimension_numbers<[1], [0], [0], [1], [0, 0, 1, 1], [], []>} : vector<128x64xbf16>, vector<64x64xbf16>, vector<128x64xf32> -> vector<128x64xf32>
    %31 = vector.extract_strided_slice %9 {offsets = [2, 0], sizes = [1, 64], strides = [1, 1]} : vector<3x128xf32> to vector<1x64xf32>
    %32 = vector.broadcast %31 : vector<1x64xf32> to vector<128x64xf32>
    %33 = arith.addf %30, %32 : vector<128x64xf32>
    %c1 = arith.constant 1 : index
    %c0_21 = arith.constant 0 : index
    %c0_22 = arith.constant 0 : index
    %34 = vector.load %arg4[%c1, %c0_21, %c0_22] : memref<2x64x128xbf16, #tpu.memory_space<vmem>>, vector<1x64x128xbf16>
    %35 = vector.shape_cast %34 : vector<1x64x128xbf16> to vector<64x128xbf16>
    %c1_23 = arith.constant 1 : index
    %c0_24 = arith.constant 0 : index
    %c0_25 = arith.constant 0 : index
    %36 = vector.load %arg5[%c1_23, %c0_24, %c0_25] : memref<2x128x64xbf16, #tpu.memory_space<vmem>>, vector<1x128x64xbf16>
    %37 = vector.shape_cast %36 : vector<1x128x64xbf16> to vector<128x64xbf16>
    %c1_26 = arith.constant 1 : index
    %c0_27 = arith.constant 0 : index
    %c0_28 = arith.constant 0 : index
    %38 = vector.load %arg6[%c1_26, %c0_27, %c0_28] : memref<2x64x64xbf16, #tpu.memory_space<vmem>>, vector<1x64x64xbf16>
    %39 = vector.shape_cast %38 : vector<1x64x64xbf16> to vector<64x64xbf16>
    %c1_29 = arith.constant 1 : index
    %c0_30 = arith.constant 0 : index
    %c0_31 = arith.constant 0 : index
    %40 = vector.load %arg7[%c1_29, %c0_30, %c0_31] : memref<2x3x128xf32, #tpu.memory_space<vmem>>, vector<1x3x128xf32>
    %41 = vector.shape_cast %40 : vector<1x3x128xf32> to vector<3x128xf32>
    %cst_32 = arith.constant dense<0.000000e+00> : vector<128x128xf32>
    %42 = tpu.matmul %0, %35, %cst_32 {dimension_numbers = #tpu.dot_dimension_numbers<[1], [0], [0], [1], [0, 0, 1, 1], [], []>} : vector<128x64xbf16>, vector<64x128xbf16>, vector<128x128xf32> -> vector<128x128xf32>
    %43 = vector.extract_strided_slice %41 {offsets = [0, 0], sizes = [1, 128], strides = [1, 1]} : vector<3x128xf32> to vector<1x128xf32>
    %44 = vector.broadcast %43 : vector<1x128xf32> to vector<128x128xf32>
    %45 = arith.addf %42, %44 : vector<128x128xf32>
    %cst_33 = arith.constant 0.000000e+00 : f32
    %46 = vector.broadcast %cst_33 : f32 to vector<128x128xf32>
    %47 = arith.cmpf ogt, %45, %46 : vector<128x128xf32>
    %cst_34 = arith.constant 2.000000e-01 : f32
    %48 = vector.broadcast %cst_34 : f32 to vector<128x128xf32>
    %49 = arith.mulf %48, %45 : vector<128x128xf32>
    %50 = arith.select %47, %45, %49 : vector<128x128xi1>, vector<128x128xf32>
    %51 = arith.truncf %50 : vector<128x128xf32> to vector<128x128xbf16>
    %cst_35 = arith.constant dense<0.000000e+00> : vector<128x64xf32>
    %52 = tpu.matmul %51, %37, %cst_35 {dimension_numbers = #tpu.dot_dimension_numbers<[1], [0], [0], [1], [0, 0, 1, 1], [], []>} : vector<128x128xbf16>, vector<128x64xbf16>, vector<128x64xf32> -> vector<128x64xf32>
    %53 = vector.extract_strided_slice %41 {offsets = [1, 0], sizes = [1, 64], strides = [1, 1]} : vector<3x128xf32> to vector<1x64xf32>
    %54 = vector.broadcast %53 : vector<1x64xf32> to vector<128x64xf32>
    %55 = arith.addf %52, %54 : vector<128x64xf32>
    %cst_36 = arith.constant 0.000000e+00 : f32
    %56 = vector.broadcast %cst_36 : f32 to vector<128x64xf32>
    %57 = arith.cmpf ogt, %55, %56 : vector<128x64xf32>
    %cst_37 = arith.constant 2.000000e-01 : f32
    %58 = vector.broadcast %cst_37 : f32 to vector<128x64xf32>
    %59 = arith.mulf %58, %55 : vector<128x64xf32>
    %60 = arith.select %57, %55, %59 : vector<128x64xi1>, vector<128x64xf32>
    %61 = arith.truncf %60 : vector<128x64xf32> to vector<128x64xbf16>
    %cst_38 = arith.constant dense<0.000000e+00> : vector<128x64xf32>
    %62 = tpu.matmul %61, %39, %cst_38 {dimension_numbers = #tpu.dot_dimension_numbers<[1], [0], [0], [1], [0, 0, 1, 1], [], []>} : vector<128x64xbf16>, vector<64x64xbf16>, vector<128x64xf32> -> vector<128x64xf32>
    %63 = vector.extract_strided_slice %41 {offsets = [2, 0], sizes = [1, 64], strides = [1, 1]} : vector<3x128xf32> to vector<1x64xf32>
    %64 = vector.broadcast %63 : vector<1x64xf32> to vector<128x64xf32>
    %65 = arith.addf %62, %64 : vector<128x64xf32>
    %66 = vector.extract_strided_slice %1 {offsets = [0, 0], sizes = [1, 1], strides = [1, 1]} : vector<1x2xf32> to vector<1x1xf32>
    %67 = vector.broadcast %66 : vector<1x1xf32> to vector<128x64xf32>
    %68 = arith.mulf %67, %33 : vector<128x64xf32>
    %69 = vector.extract_strided_slice %1 {offsets = [0, 1], sizes = [1, 1], strides = [1, 1]} : vector<1x2xf32> to vector<1x1xf32>
    %70 = vector.broadcast %69 : vector<1x1xf32> to vector<128x64xf32>
    %71 = arith.mulf %70, %65 : vector<128x64xf32>
    %72 = arith.addf %68, %71 : vector<128x64xf32>
    %c0_39 = arith.constant 0 : index
    %c0_40 = arith.constant 0 : index
    %c0_41 = arith.constant 0 : index
    %73 = vector.load %arg8[%c0_39, %c0_40, %c0_41] : memref<2x64x128xbf16, #tpu.memory_space<vmem>>, vector<1x64x128xbf16>
    %74 = vector.shape_cast %73 : vector<1x64x128xbf16> to vector<64x128xbf16>
    %c0_42 = arith.constant 0 : index
    %c0_43 = arith.constant 0 : index
    %c0_44 = arith.constant 0 : index
    %75 = vector.load %arg9[%c0_42, %c0_43, %c0_44] : memref<2x128x128xbf16, #tpu.memory_space<vmem>>, vector<1x128x128xbf16>
    %76 = vector.shape_cast %75 : vector<1x128x128xbf16> to vector<128x128xbf16>
    %c0_45 = arith.constant 0 : index
    %c0_46 = arith.constant 0 : index
    %c0_47 = arith.constant 0 : index
    %77 = vector.load %arg10[%c0_45, %c0_46, %c0_47] : memref<2x128x128xbf16, #tpu.memory_space<vmem>>, vector<1x128x128xbf16>
    %78 = vector.shape_cast %77 : vector<1x128x128xbf16> to vector<128x128xbf16>
    %c0_48 = arith.constant 0 : index
    %c0_49 = arith.constant 0 : index
    %c0_50 = arith.constant 0 : index
    %79 = vector.load %arg11[%c0_48, %c0_49, %c0_50] : memref<2x3x128xf32, #tpu.memory_space<vmem>>, vector<1x3x128xf32>
    %80 = vector.shape_cast %79 : vector<1x3x128xf32> to vector<3x128xf32>
    %81 = arith.truncf %72 : vector<128x64xf32> to vector<128x64xbf16>
    %cst_51 = arith.constant dense<0.000000e+00> : vector<128x128xf32>
    %82 = tpu.matmul %81, %74, %cst_51 {dimension_numbers = #tpu.dot_dimension_numbers<[1], [0], [0], [1], [0, 0, 1, 1], [], []>} : vector<128x64xbf16>, vector<64x128xbf16>, vector<128x128xf32> -> vector<128x128xf32>
    %83 = vector.extract_strided_slice %80 {offsets = [0, 0], sizes = [1, 128], strides = [1, 1]} : vector<3x128xf32> to vector<1x128xf32>
    %84 = vector.broadcast %83 : vector<1x128xf32> to vector<128x128xf32>
    %85 = arith.addf %82, %84 : vector<128x128xf32>
    %cst_52 = arith.constant 0.000000e+00 : f32
    %86 = vector.broadcast %cst_52 : f32 to vector<128x128xf32>
    %87 = arith.cmpf ogt, %85, %86 : vector<128x128xf32>
    %cst_53 = arith.constant 2.000000e-01 : f32
    %88 = vector.broadcast %cst_53 : f32 to vector<128x128xf32>
    %89 = arith.mulf %88, %85 : vector<128x128xf32>
    %90 = arith.select %87, %85, %89 : vector<128x128xi1>, vector<128x128xf32>
    %91 = arith.truncf %90 : vector<128x128xf32> to vector<128x128xbf16>
    %cst_54 = arith.constant dense<0.000000e+00> : vector<128x128xf32>
    %92 = tpu.matmul %91, %76, %cst_54 {dimension_numbers = #tpu.dot_dimension_numbers<[1], [0], [0], [1], [0, 0, 1, 1], [], []>} : vector<128x128xbf16>, vector<128x128xbf16>, vector<128x128xf32> -> vector<128x128xf32>
    %93 = vector.extract_strided_slice %80 {offsets = [1, 0], sizes = [1, 128], strides = [1, 1]} : vector<3x128xf32> to vector<1x128xf32>
    %94 = vector.broadcast %93 : vector<1x128xf32> to vector<128x128xf32>
    %95 = arith.addf %92, %94 : vector<128x128xf32>
    %cst_55 = arith.constant 0.000000e+00 : f32
    %96 = vector.broadcast %cst_55 : f32 to vector<128x128xf32>
    %97 = arith.cmpf ogt, %95, %96 : vector<128x128xf32>
    %cst_56 = arith.constant 2.000000e-01 : f32
    %98 = vector.broadcast %cst_56 : f32 to vector<128x128xf32>
    %99 = arith.mulf %98, %95 : vector<128x128xf32>
    %100 = arith.select %97, %95, %99 : vector<128x128xi1>, vector<128x128xf32>
    %101 = arith.truncf %100 : vector<128x128xf32> to vector<128x128xbf16>
    %cst_57 = arith.constant dense<0.000000e+00> : vector<128x128xf32>
    %102 = tpu.matmul %101, %78, %cst_57 {dimension_numbers = #tpu.dot_dimension_numbers<[1], [0], [0], [1], [0, 0, 1, 1], [], []>} : vector<128x128xbf16>, vector<128x128xbf16>, vector<128x128xf32> -> vector<128x128xf32>
    %103 = vector.extract_strided_slice %80 {offsets = [2, 0], sizes = [1, 128], strides = [1, 1]} : vector<3x128xf32> to vector<1x128xf32>
    %104 = vector.broadcast %103 : vector<1x128xf32> to vector<128x128xf32>
    %105 = arith.addf %102, %104 : vector<128x128xf32>
    %c0_58 = arith.constant 0 : index
    %c0_59 = arith.constant 0 : index
    %106 = vector.load %arg12[%c0_58, %c0_59] : memref<128x128xf32, #tpu.memory_space<vmem>>, vector<128x128xf32>
    tpu.vector_store %arg12[%c0_58, %c0_59], %105 {strides = array<i32>} : memref<128x128xf32, #tpu.memory_space<vmem>>, vector<128x128xf32>,
    %c1_60 = arith.constant 1 : index
    %c0_61 = arith.constant 0 : index
    %c0_62 = arith.constant 0 : index
    %107 = vector.load %arg8[%c1_60, %c0_61, %c0_62] : memref<2x64x128xbf16, #tpu.memory_space<vmem>>, vector<1x64x128xbf16>
    %108 = vector.shape_cast %107 : vector<1x64x128xbf16> to vector<64x128xbf16>
    %c1_63 = arith.constant 1 : index
    %c0_64 = arith.constant 0 : index
    %c0_65 = arith.constant 0 : index
    %109 = vector.load %arg9[%c1_63, %c0_64, %c0_65] : memref<2x128x128xbf16, #tpu.memory_space<vmem>>, vector<1x128x128xbf16>
    %110 = vector.shape_cast %109 : vector<1x128x128xbf16> to vector<128x128xbf16>
    %c1_66 = arith.constant 1 : index
    %c0_67 = arith.constant 0 : index
    %c0_68 = arith.constant 0 : index
    %111 = vector.load %arg10[%c1_66, %c0_67, %c0_68] : memref<2x128x128xbf16, #tpu.memory_space<vmem>>, vector<1x128x128xbf16>
    %112 = vector.shape_cast %111 : vector<1x128x128xbf16> to vector<128x128xbf16>
    %c1_69 = arith.constant 1 : index
    %c0_70 = arith.constant 0 : index
    %c0_71 = arith.constant 0 : index
    %113 = vector.load %arg11[%c1_69, %c0_70, %c0_71] : memref<2x3x128xf32, #tpu.memory_space<vmem>>, vector<1x3x128xf32>
    %114 = vector.shape_cast %113 : vector<1x3x128xf32> to vector<3x128xf32>
    %115 = arith.truncf %72 : vector<128x64xf32> to vector<128x64xbf16>
    %cst_72 = arith.constant dense<0.000000e+00> : vector<128x128xf32>
    %116 = tpu.matmul %115, %108, %cst_72 {dimension_numbers = #tpu.dot_dimension_numbers<[1], [0], [0], [1], [0, 0, 1, 1], [], []>} : vector<128x64xbf16>, vector<64x128xbf16>, vector<128x128xf32> -> vector<128x128xf32>
    %117 = vector.extract_strided_slice %114 {offsets = [0, 0], sizes = [1, 128], strides = [1, 1]} : vector<3x128xf32> to vector<1x128xf32>
    %118 = vector.broadcast %117 : vector<1x128xf32> to vector<128x128xf32>
    %119 = arith.addf %116, %118 : vector<128x128xf32>
    %cst_73 = arith.constant 0.000000e+00 : f32
    %120 = vector.broadcast %cst_73 : f32 to vector<128x128xf32>
    %121 = arith.cmpf ogt, %119, %120 : vector<128x128xf32>
    %cst_74 = arith.constant 2.000000e-01 : f32
    %122 = vector.broadcast %cst_74 : f32 to vector<128x128xf32>
    %123 = arith.mulf %122, %119 : vector<128x128xf32>
    %124 = arith.select %121, %119, %123 : vector<128x128xi1>, vector<128x128xf32>
    %125 = arith.truncf %124 : vector<128x128xf32> to vector<128x128xbf16>
    %cst_75 = arith.constant dense<0.000000e+00> : vector<128x128xf32>
    %126 = tpu.matmul %125, %110, %cst_75 {dimension_numbers = #tpu.dot_dimension_numbers<[1], [0], [0], [1], [0, 0, 1, 1], [], []>} : vector<128x128xbf16>, vector<128x128xbf16>, vector<128x128xf32> -> vector<128x128xf32>
    %127 = vector.extract_strided_slice %114 {offsets = [1, 0], sizes = [1, 128], strides = [1, 1]} : vector<3x128xf32> to vector<1x128xf32>
    %128 = vector.broadcast %127 : vector<1x128xf32> to vector<128x128xf32>
    %129 = arith.addf %126, %128 : vector<128x128xf32>
    %cst_76 = arith.constant 0.000000e+00 : f32
    %130 = vector.broadcast %cst_76 : f32 to vector<128x128xf32>
    %131 = arith.cmpf ogt, %129, %130 : vector<128x128xf32>
    %cst_77 = arith.constant 2.000000e-01 : f32
    %132 = vector.broadcast %cst_77 : f32 to vector<128x128xf32>
    %133 = arith.mulf %132, %129 : vector<128x128xf32>
    %134 = arith.select %131, %129, %133 : vector<128x128xi1>, vector<128x128xf32>
    %135 = arith.truncf %134 : vector<128x128xf32> to vector<128x128xbf16>
    %cst_78 = arith.constant dense<0.000000e+00> : vector<128x128xf32>
    %136 = tpu.matmul %135, %112, %cst_78 {dimension_numbers = #tpu.dot_dimension_numbers<[1], [0], [0], [1], [0, 0, 1, 1], [], []>} : vector<128x128xbf16>, vector<128x128xbf16>, vector<128x128xf32> -> vector<128x128xf32>
    %137 = vector.extract_strided_slice %114 {offsets = [2, 0], sizes = [1, 128], strides = [1, 1]} : vector<3x128xf32> to vector<1x128xf32>
    %138 = vector.broadcast %137 : vector<1x128xf32> to vector<128x128xf32>
    %139 = arith.addf %136, %138 : vector<128x128xf32>
    %c0_79 = arith.constant 0 : index
    %c0_80 = arith.constant 0 : index
    %140 = vector.load %arg13[%c0_79, %c0_80] : memref<128x128xf32, #tpu.memory_space<vmem>>, vector<128x128xf32>
    tpu.vector_store %arg13[%c0_79, %c0_80], %139 {strides = array<i32>} : memref<128x128xf32, #tpu.memory_space<vmem>>, vector<128x128xf32>,
    %c0_81 = arith.constant 0 : index
    %c0_82 = arith.constant 0 : index
    %141 = vector.load %arg3[%c0_81, %c0_82] : memref<128x64xf32, #tpu.memory_space<vmem>>, vector<128x64xf32>
    %142 = arith.mulf %65, %141 : vector<128x64xf32>
    %cst_83 = arith.constant dense<0.000000e+00> : vector<128xf32>
    %143 = vector.multi_reduction <add>, %142, %cst_83 [1] : vector<128x64xf32> to vector<128xf32>
    %144 = vector.shape_cast %143 : vector<128xf32> to vector<128x1xf32>
    %145 = arith.mulf %65, %65 : vector<128x64xf32>
    %146 = arith.mulf %141, %141 : vector<128x64xf32>
    %147 = arith.addf %145, %146 : vector<128x64xf32>
    %cst_84 = arith.constant dense<0.000000e+00> : vector<128xf32>
    %148 = vector.multi_reduction <add>, %147, %cst_84 [1] : vector<128x64xf32> to vector<128xf32>
    %149 = vector.shape_cast %148 : vector<128xf32> to vector<128x1xf32>
    %150 = tpu.iota {dimensions = array<i32: 1>} : vector<128x128xi32>
    %c0_i32 = arith.constant 0 : i32
    %151 = vector.broadcast %c0_i32 : i32 to vector<128x128xi32>
    %152 = arith.cmpi eq, %150, %151 : vector<128x128xi32>
    %c1_i32 = arith.constant 1 : i32
    %153 = vector.broadcast %c1_i32 : i32 to vector<128x128xi32>
    %154 = arith.cmpi eq, %150, %153 : vector<128x128xi32>
    %cst_85 = arith.constant 0.000000e+00 : f32
    %155 = vector.shape_cast %149 : vector<128x1xf32> to vector<128x1xf32>
    %156 = vector.broadcast %155 : vector<128x1xf32> to vector<128x128xf32>
    %157 = vector.broadcast %cst_85 : f32 to vector<128x128xf32>
    %158 = arith.select %154, %156, %157 : vector<128x128xi1>, vector<128x128xf32>
    %159 = vector.shape_cast %144 : vector<128x1xf32> to vector<128x1xf32>
    %160 = vector.broadcast %159 : vector<128x1xf32> to vector<128x128xf32>
    %161 = arith.select %152, %160, %158 : vector<128x128xi1>, vector<128x128xf32>
    %c0_86 = arith.constant 0 : index
    %c0_87 = arith.constant 0 : index
    %162 = vector.load %arg14[%c0_86, %c0_87] : memref<128x128xf32, #tpu.memory_space<vmem>>, vector<128x128xf32>
    tpu.vector_store %arg14[%c0_86, %c0_87], %161 {strides = array<i32>} : memref<128x128xf32, #tpu.memory_space<vmem>>, vector<128x128xf32>,
    return
  }
  func.func @transform_0(%arg0: i32) -> (i32, i32) {
    %c0_i32 = arith.constant 0 : i32
    %c0_i32_0 = arith.constant 0 : i32
    %c0_i32_1 = arith.constant 0 : i32
    return %c0_i32, %c0_i32_0 : i32, i32
  }
  func.func @transform_1(%arg0: i32) -> (i32, i32) {
    %c0_i32 = arith.constant 0 : i32
    %c0_i32_0 = arith.constant 0 : i32
    return %arg0, %c0_i32 : i32, i32
  }
  func.func @transform_2(%arg0: i32) -> (i32, i32) {
    %c0_i32 = arith.constant 0 : i32
    %c0_i32_0 = arith.constant 0 : i32
    return %arg0, %c0_i32 : i32, i32
  }
  func.func @transform_3(%arg0: i32) -> (i32, i32, i32) {
    %c0_i32 = arith.constant 0 : i32
    %c0_i32_0 = arith.constant 0 : i32
    %c0_i32_1 = arith.constant 0 : i32
    %c0_i32_2 = arith.constant 0 : i32
    return %c0_i32, %c0_i32_0, %c0_i32_1 : i32, i32, i32
  }
  func.func @transform_4(%arg0: i32) -> (i32, i32, i32) {
    %c0_i32 = arith.constant 0 : i32
    %c0_i32_0 = arith.constant 0 : i32
    %c0_i32_1 = arith.constant 0 : i32
    %c0_i32_2 = arith.constant 0 : i32
    return %c0_i32, %c0_i32_0, %c0_i32_1 : i32, i32, i32
  }
  func.func @transform_5(%arg0: i32) -> (i32, i32, i32) {
    %c0_i32 = arith.constant 0 : i32
    %c0_i32_0 = arith.constant 0 : i32
    %c0_i32_1 = arith.constant 0 : i32
    %c0_i32_2 = arith.constant 0 : i32
    return %c0_i32, %c0_i32_0, %c0_i32_1 : i32, i32, i32
  }
  func.func @transform_6(%arg0: i32) -> (i32, i32, i32) {
    %c0_i32 = arith.constant 0 : i32
    %c0_i32_0 = arith.constant 0 : i32
    %c0_i32_1 = arith.constant 0 : i32
    %c0_i32_2 = arith.constant 0 : i32
    return %c0_i32, %c0_i32_0, %c0_i32_1 : i32, i32, i32
  }
  func.func @transform_7(%arg0: i32) -> (i32, i32, i32) {
    %c0_i32 = arith.constant 0 : i32
    %c0_i32_0 = arith.constant 0 : i32
    %c0_i32_1 = arith.constant 0 : i32
    %c0_i32_2 = arith.constant 0 : i32
    return %c0_i32, %c0_i32_0, %c0_i32_1 : i32, i32, i32
  }
  func.func @transform_8(%arg0: i32) -> (i32, i32, i32) {
    %c0_i32 = arith.constant 0 : i32
    %c0_i32_0 = arith.constant 0 : i32
    %c0_i32_1 = arith.constant 0 : i32
    %c0_i32_2 = arith.constant 0 : i32
    return %c0_i32, %c0_i32_0, %c0_i32_1 : i32, i32, i32
  }
  func.func @transform_9(%arg0: i32) -> (i32, i32, i32) {
    %c0_i32 = arith.constant 0 : i32
    %c0_i32_0 = arith.constant 0 : i32
    %c0_i32_1 = arith.constant 0 : i32
    %c0_i32_2 = arith.constant 0 : i32
    return %c0_i32, %c0_i32_0, %c0_i32_1 : i32, i32, i32
  }
  func.func @transform_10(%arg0: i32) -> (i32, i32, i32) {
    %c0_i32 = arith.constant 0 : i32
    %c0_i32_0 = arith.constant 0 : i32
    %c0_i32_1 = arith.constant 0 : i32
    %c0_i32_2 = arith.constant 0 : i32
    return %c0_i32, %c0_i32_0, %c0_i32_1 : i32, i32, i32
  }
  func.func @transform_11(%arg0: i32) -> (i32, i32) {
    %c0_i32 = arith.constant 0 : i32
    %c0_i32_0 = arith.constant 0 : i32
    return %arg0, %c0_i32 : i32, i32
  }
  func.func @transform_12(%arg0: i32) -> (i32, i32) {
    %c0_i32 = arith.constant 0 : i32
    %c0_i32_0 = arith.constant 0 : i32
    return %arg0, %c0_i32 : i32, i32
  }
  func.func @transform_13(%arg0: i32) -> (i32, i32) {
    %c0_i32 = arith.constant 0 : i32
    %c0_i32_0 = arith.constant 0 : i32
    return %arg0, %c0_i32 : i32, i32
  }
}

</mosaic_0001>

<bundles_post_ra>
// kernel: informax_forward.3
= control target key start
LH: loop header
LB: loop body
LE: loop exit
PB: predicated region body
PF: predicated region fallthrough
CT: control target
= control target key end

     0   :  { %vm144_vm0 = vcmask 523264   ;;  %v76_v24 = vlaneseq  ;;  %s2426_s2 = inlined_call_operand.vmem [shape: bf16[2,64,128], index: 2, kind: input, shape index: {}]   ;;  %s2427_s1 = inlined_call_operand.vmem [shape: bf16[128,64], index: 1, kind: input, shape index: {}]   ;;  %s2428_s3 = inlined_call_operand.vmem [shape: bf16[2,128,64], index: 3, kind: input, shape index: {}]   ;;  %s2429_s4 = inlined_call_operand.vmem [shape: bf16[2,64,64], index: 4, kind: input, shape index: {}]   ;;  %s2430_s5 = inlined_call_operand.vmem [shape: f32[2,3,128], index: 5, kind: input, shape index: {}]   ;;  %s2431_s0 = inlined_call_operand.vmem [shape: f32[1,2], index: 0, kind: input, shape index: {}]   ;;  %s2432_s6 = inlined_call_operand.vmem [shape: f32[128,64], index: 6, kind: output, shape index: {0}]   ;;  %s2433_s7 = inlined_call_operand.vmem [shape: bf16[128,64], index: 7, kind: output, shape index: {1}]  }
   0x1   :  { %v1804_v0 = vld [vmem:[%s2426_s2] sm:$0xff]   ;;  %v1805_v1 = vld [vmem:[%s2426_s2 + $0x8] sm:$0xff]   ;;  %v1806_v2 = vld [vmem:[%s2426_s2 + $0x10] sm:$0xff]  }
   0x2   :  { %1632 = vmatprep.subr.bf16.mxu0 %v1804_v0  ;;  %v1898_v3 = vld [vmem:[%s2427_s1] sm:$0xff]   ;;  %v1807_v4 = vld [vmem:[%s2426_s2 + $0x18] sm:$0xff]   ;;  %v1817_v6 = vld [vmem:[%s2428_s3 + $0x8] sm:$0xff]   ;;  %v1990_v25 = vshrl.u32 %v76_v24, 7 }
   0x3   :  { %1633 = vmatpush3.bf16.msra.mxu0 %v1804_v0  ;;  %1640 = vmatprep.mubr.msk.bf16.mxu0 %vm144_vm0, %v1898_v3  ;;  %v1816_v5 = vld [vmem:[%s2428_s3] sm:$0xff]   ;;  %v1914_v7 = vld [vmem:[%s2427_s1 + $0x8] sm:$0xff]   ;;  %v1919_v8 = vld [vmem:[%s2427_s1 + $0x10] sm:$0xff]  }
   0x4   :  { %1634 = vmatprep.subr.bf16.mxu0 %v1805_v1  ;;  %1656 = vmatprep.subr.bf16.mxu1 %v1816_v5  ;;  %v1818_v9 = vld [vmem:[%s2428_s3 + $0x10] sm:$0xff]   ;;  %v1819_v10 = vld [vmem:[%s2428_s3 + $0x18] sm:$0xff]   ;;  %v1939_v12 = vld [vmem:[%s2427_s1 + $0x20] sm:$0xff]   ;;  %v78_v26 = vsub.s32 0, %v1990_v25 }
   0x5   :  { %1657 = vmatpush3.bf16.msra.mxu1 %v1816_v5  ;;  %v1934_v11 = vld [vmem:[%s2427_s1 + $0x18] sm:$0xff]   ;;  %v1820_v13 = vld [vmem:[%s2428_s3 + $0x20] sm:$0xff]   ;;  %v1821_v14 = vld [vmem:[%s2428_s3 + $0x28] sm:$0xff]  }
   0x6   :  { %1658 = vmatprep.subr.bf16.mxu1 %v1817_v6  ;;  %v1954_v15 = vld [vmem:[%s2427_s1 + $0x28] sm:$0xff]   ;;  %v1959_v16 = vld [vmem:[%s2427_s1 + $0x30] sm:$0xff]   ;;  %v1968_v17 = vld [vmem:[%s2427_s1 + $0x38] sm:$0xff]  }
   0x7   :  { %1635 = vmatpush3.bf16.msra.mxu0 %v1805_v1  ;;  %v1822_v18 = vld [vmem:[%s2428_s3 + $0x30] sm:$0xff]   ;;  %v1823_v19 = vld [vmem:[%s2428_s3 + $0x38] sm:$0xff]   ;;  %v1824_v20 = vld [vmem:[%s2426_s2 + $0x20] sm:$0xff]  }
   0x8   :  { %1636 = vmatprep.subr.bf16.mxu0 %v1806_v2  ;;  %v1828_v21 = vld [vmem:[%s2429_s4] sm:$0xff]   ;;  %v1829_v22 = vld [vmem:[%s2429_s4 + $0x8] sm:$0xff]   ;;  %v1830_v23 = vld [vmem:[%s2429_s4 + $0x10] sm:$0xff]  }
   0x9   :  { %1659 = vmatpush3.bf16.msra.mxu1 %v1817_v6  ;;  %v1996_v27 = vld [vmem:[%s2430_s5] sm:$0x7]  ;;  %v1825_v52 = vld [vmem:[%s2426_s2 + $0x28] sm:$0xff]   ;;  %v1826_v60 = vld [vmem:[%s2426_s2 + $0x30] sm:$0xff]  }
   0xa   :  { %1660 = vmatprep.subr.bf16.mxu1 %v1818_v9  ;;  %v2001_v28 = vrot.slane %v1996_v27, %v78_v26 }
   0xb   :  { %1637 = vmatpush3.bf16.msra.mxu0 %v1806_v2 }
   0xc   :  { %1638 = vmatprep.subr.bf16.mxu0 %v1807_v4 }
   0xd   :  { %1661 = vmatpush3.bf16.msra.mxu1 %v1818_v9 }
   0xe   :  { %1662 = vmatprep.subr.bf16.mxu1 %v1819_v10 }
   0xf   :  { %1639 = vmatpush3.bf16.msra.mxu0 %v1807_v4 }
  0x10   :  { %1688 = vmatprep.subr.bf16.mxu0 %v1828_v21 }
  0x11   :  { %1663 = vmatpush3.bf16.msra.mxu1 %v1819_v10 }
  0x12   :  { %1641 = vmatmul.mubr.msk.bf16.vlgmr.msra.gmra.mrb[0].mxu0 %vm144_vm0, %v1914_v7  ;;  %1664 = vmatprep.subr.bf16.mxu1 %v1820_v13 }
  0x13   :  { %1644 = vmatprep.mubr.msk.bf16.mxu0 %vm144_vm0, %v1919_v8  ;;  %1689 = vmatpush3.bf16.msra.mxu0 %v1828_v21 }
  0x14   :  { %1690 = vmatprep.subr.bf16.mxu0 %v1829_v22 }
  0x15   :  { %1665 = vmatpush3.bf16.msra.mxu1 %v1820_v13  ;;  %v1827_v13 = vld [vmem:[%s2426_s2 + $0x38] sm:$0xff]  }
  0x16   :  { %1666 = vmatprep.subr.bf16.mxu1 %v1821_v14 }
  0x17   :  { %1691 = vmatpush3.bf16.msra.mxu0 %v1829_v22 }
  0x18   :  { %1692 = vmatprep.subr.bf16.mxu0 %v1830_v23 }
  0x19   :  { %1667 = vmatpush3.bf16.msra.mxu1 %v1821_v14 }
  0x1a   :  { %1645 = vmatmul.mubr.msk.bf16.gmra.mrb[4].mxu0 %vm144_vm0, %v1934_v11  ;;  %1668 = vmatprep.subr.bf16.mxu1 %v1822_v18 }
  0x1b   :  { %1648 = vmatprep.mubr.msk.bf16.mxu0 %vm144_vm0, %v1939_v12  ;;  %1693 = vmatpush3.bf16.msra.mxu0 %v1830_v23 }
  0x1d   :  { %1669 = vmatpush3.bf16.msra.mxu1 %v1822_v18 }
  0x1e   :  { %1670 = vmatprep.subr.bf16.mxu1 %v1823_v19 }
  0x21   :  { %1671 = vmatpush3.bf16.msra.mxu1 %v1823_v19 }
  0x22   :  { %1649 = vmatmul.mubr.msk.bf16.gmra.mrb[8].mxu0 %vm144_vm0, %v1954_v15  ;;  %1712 = vmatprep.subr.bf16.mxu1 %v1824_v20 }
  0x23   :  { %1652 = vmatprep.mubr.msk.bf16.mxu0 %vm144_vm0, %v1959_v16 }
  0x2a   :  { %1653 = vmatmul.mubr.msk.bf16.gmra.mrb[12].mxu0 %vm144_vm0, %v1968_v17 }
  0xe5   :  { %v1642_v29 = vpop.f32.mrb[0].mxu0 }
  0xe6   :  { %v212_v30 = vadd.f32 %v1642_v29, %v2001_v28  ;;  %v203_v31 = vpop.f32.mrb[1].mxu0 }
  0xe7   :  { %v204_v32 = vadd.f32 %v203_v31, %v2001_v28  ;;  %v1643_v33 = vpop.f32.mrb[2].mxu0 }
  0xe8   :  { %v284_v34 = vmul.f32 0.2, %v212_v30  ;;  %v215_v35 = vadd.f32 %v1643_v33, %v2001_v28  ;;  %v206_v36 = vpop.f32.mrb[3].mxu0  ;;  %vm268_vm1 = vcmp.gt.f32.partialorder %v212_v30, 0.0 }
  0xe9   :  { %v282_v37 = vmul.f32 0.2, %v204_v32  ;;  %v207_v38 = vadd.f32 %v206_v36, %v2001_v28  ;;  %vm266_vm3 = vcmp.gt.f32.partialorder %v204_v32, 0.0 }
  0xea   :  { %vm269_vm2 = vcmp.gt.f32.partialorder %v215_v35, 0.0  ;;  %v285_v39 = vmul.f32 0.2, %v215_v35  ;;  %v300_v41 = vsel %vm268_vm1, %v212_v30, %v284_v34 }
  0xeb   :  { %v283_v40 = vmul.f32 0.2, %v207_v38  ;;  %vm267_vm4 = vcmp.gt.f32.partialorder %v207_v38, 0.0  ;;  %v298_v44 = vsel %vm266_vm3, %v204_v32, %v282_v37 }
  0xec   :  { %v301_v42 = vsel %vm269_vm2, %v215_v35, %v285_v39 }
  0xed   :  { %v1646_v43 = vpop.f32.mrb[4].mxu0  ;;  %v299_v45 = vsel %vm267_vm4, %v207_v38, %v283_v40  ;;  %v315_v46 = vpack.c.bf16 %v301_v42, %v300_v41 }
  0xee   :  { %v228_v47 = vadd.f32 %v1646_v43, %v2001_v28  ;;  %v219_v48 = vpop.f32.mrb[5].mxu0  ;;  %v314_v49 = vpack.c.bf16 %v299_v45, %v298_v44 }
  0xef   :  { %v220_v50 = vadd.f32 %v219_v48, %v2001_v28  ;;  %v1647_v51 = vpop.f32.mrb[6].mxu0 }
  0xf0   :  { %v288_v53 = vmul.f32 0.2, %v228_v47  ;;  %v231_v54 = vadd.f32 %v1647_v51, %v2001_v28  ;;  %v222_v55 = vpop.f32.mrb[7].mxu0  ;;  %1672 = vmatprep.mubr.bf16.mxu1 %v314_v49  ;;  %vm272_vm5 = vcmp.gt.f32.partialorder %v228_v47, 0.0 }
  0xf1   :  { %v286_v56 = vmul.f32 0.2, %v220_v50  ;;  %v223_v57 = vadd.f32 %v222_v55, %v2001_v28  ;;  %1673 = vmatmul.mubr.bf16.vlgmr.msra.gmra.mrb[0].mxu1 %v315_v46  ;;  %vm270_vm6 = vcmp.gt.f32.partialorder %v220_v50, 0.0 }
  0xf2   :  { %vm273_vm7 = vcmp.gt.f32.partialorder %v231_v54, 0.0  ;;  %v289_v58 = vmul.f32 0.2, %v231_v54  ;;  %1713 = vmatpush3.bf16.msra.mxu1 %v1824_v20  ;;  %v304_v61 = vsel %vm272_vm5, %v228_v47, %v288_v53 }
  0xf3   :  { %vm271_vm8 = vcmp.gt.f32.partialorder %v223_v57, 0.0  ;;  %v287_v59 = vmul.f32 0.2, %v223_v57  ;;  %1714 = vmatprep.subr.bf16.mxu1 %v1825_v52  ;;  %v302_v0 = vsel %vm270_vm6, %v220_v50, %v286_v56 }
  0xf4   :  { %v305_v62 = vsel %vm273_vm7, %v231_v54, %v289_v58 }
  0xf5   :  { %v1650_v63 = vpop.f32.mrb[8].mxu0  ;;  %v303_v1 = vsel %vm271_vm8, %v223_v57, %v287_v59  ;;  %v317_v2 = vpack.c.bf16 %v305_v62, %v304_v61 }
  0xf6   :  { %v244_v4 = vadd.f32 %v1650_v63, %v2001_v28  ;;  %v235_v5 = vpop.f32.mrb[9].mxu0  ;;  %v316_v6 = vpack.c.bf16 %v303_v1, %v302_v0  ;;  %1715 = vmatpush3.bf16.msra.mxu1 %v1825_v52 }
  0xf7   :  { %v236_v9 = vadd.f32 %v235_v5, %v2001_v28  ;;  %v1651_v10 = vpop.f32.mrb[10].mxu0  ;;  %1716 = vmatprep.subr.bf16.mxu1 %v1826_v60 }
  0xf8   :  { %v292_v14 = vmul.f32 0.2, %v244_v4  ;;  %v247_v18 = vadd.f32 %v1651_v10, %v2001_v28  ;;  %v238_v19 = vpop.f32.mrb[11].mxu0  ;;  %1676 = vmatprep.mubr.bf16.mxu1 %v316_v6  ;;  %vm276_vm9 = vcmp.gt.f32.partialorder %v244_v4, 0.0 }
  0xf9   :  { %v290_v20 = vmul.f32 0.2, %v236_v9  ;;  %v239_v21 = vadd.f32 %v238_v19, %v2001_v28  ;;  %1677 = vmatmul.mubr.bf16.gmra.mrb[4].mxu1 %v317_v2  ;;  %vm274_vm10 = vcmp.gt.f32.partialorder %v236_v9, 0.0 }
  0xfa   :  { %vm277_vm11 = vcmp.gt.f32.partialorder %v247_v18, 0.0  ;;  %v293_v22 = vmul.f32 0.2, %v247_v18  ;;  %1717 = vmatpush3.bf16.msra.mxu1 %v1826_v60  ;;  %v308_v24 = vsel %vm276_vm9, %v244_v4, %v292_v14 }
  0xfb   :  { %vm275_vm12 = vcmp.gt.f32.partialorder %v239_v21, 0.0  ;;  %v291_v23 = vmul.f32 0.2, %v239_v21  ;;  %1718 = vmatprep.subr.bf16.mxu1 %v1827_v13  ;;  %v306_v31 = vsel %vm274_vm10, %v236_v9, %v290_v20 }
  0xfc   :  { %v309_v29 = vsel %vm277_vm11, %v247_v18, %v293_v22 }
  0xfd   :  { %v1654_v30 = vpop.f32.mrb[12].mxu0  ;;  %v307_v32 = vsel %vm275_vm12, %v239_v21, %v291_v23  ;;  %v319_v33 = vpack.c.bf16 %v309_v29, %v308_v24  ;;  %v1834_v24 = vld [vmem:[%s2428_s3 + $0x50] sm:$0xff]  }
  0xfe   :  { %v260_v34 = vadd.f32 %v1654_v30, %v2001_v28  ;;  %v251_v35 = vpop.f32.mrb[13].mxu0  ;;  %v318_v36 = vpack.c.bf16 %v307_v32, %v306_v31  ;;  %1719 = vmatpush3.bf16.msra.mxu1 %v1827_v13  ;;  %v1833_v13 = vld [vmem:[%s2428_s3 + $0x48] sm:$0xff]  }
  0xff   :  { %v252_v37 = vadd.f32 %v251_v35, %v2001_v28  ;;  %v1655_v38 = vpop.f32.mrb[14].mxu0 }
 0x100   :  { %v296_v39 = vmul.f32 0.2, %v260_v34  ;;  %v263_v40 = vadd.f32 %v1655_v38, %v2001_v28  ;;  %v254_v41 = vpop.f32.mrb[15].mxu0  ;;  %1680 = vmatprep.mubr.bf16.mxu1 %v318_v36  ;;  %vm280_vm13 = vcmp.gt.f32.partialorder %v260_v34, 0.0 }
 0x101   :  { %v294_v42 = vmul.f32 0.2, %v252_v37  ;;  %v255_v43 = vadd.f32 %v254_v41, %v2001_v28  ;;  %1681 = vmatmul.mubr.bf16.gmra.mrb[8].mxu1 %v319_v33  ;;  %vm278_vm14 = vcmp.gt.f32.partialorder %v252_v37, 0.0 }
 0x102   :  { %vm281_vm15 = vcmp.gt.f32.partialorder %v263_v40, 0.0  ;;  %v297_v44 = vmul.f32 0.2, %v263_v40  ;;  %v312_v46 = vsel %vm280_vm13, %v260_v34, %v296_v39 }
 0x103   :  { %vm279_vm1 = vcmp.gt.f32.partialorder %v255_v43, 0.0  ;;  %v295_v45 = vmul.f32 0.2, %v255_v43  ;;  %v310_v48 = vsel %vm278_vm14, %v252_v37, %v294_v42 }
 0x104   :  { %v313_v47 = vsel %vm281_vm15, %v263_v40, %v297_v44  ;;  %v1835_v40 = vld [vmem:[%s2428_s3 + $0x58] sm:$0xff]  }
 0x105   :  { %v311_v49 = vsel %vm279_vm1, %v255_v43, %v295_v45  ;;  %v321_v50 = vpack.c.bf16 %v313_v47, %v312_v46 }
 0x106   :  { %v320_v51 = vpack.c.bf16 %v311_v49, %v310_v48  ;;  %v1836_v48 = vld [vmem:[%s2428_s3 + $0x60] sm:$0xff]  }
 0x108   :  { %1684 = vmatprep.mubr.bf16.mxu1 %v320_v51 }
 0x109   :  { %1685 = vmatmul.mubr.bf16.gmra.mrb[12].mxu1 %v321_v50 }
 0x10a   :  { %1720 = vmatprep.mubr.msk.bf16.mxu1 %vm144_vm0, %v1898_v3  ;;  %v1831_v3 = vld [vmem:[%s2429_s4 + $0x18] sm:$0xff]  }
 0x10b   :  { %1694 = vmatprep.subr.bf16.mxu0 %v1831_v3 }
 0x10c   :  { %1695 = vmatpush3.bf16.msra.mxu0 %v1831_v3 }
 0x111   :  { %1721 = vmatmul.mubr.msk.bf16.vlgmr.msra.gmra.mrb[16].mxu1 %vm144_vm0, %v1914_v7  ;;  %v1832_v7 = vld [vmem:[%s2428_s3 + $0x40] sm:$0xff]  }
 0x112   :  { %1724 = vmatprep.mubr.msk.bf16.mxu1 %vm144_vm0, %v1919_v8  ;;  %1736 = vmatprep.subr.bf16.mxu0 %v1832_v7  ;;  %v1844_v8 = vmov 0  }
 0x113   :  { %1802 = vset.pattern.permute.xlu0 %v1844_v8 }
 0x119   :  { %1725 = vmatmul.mubr.msk.bf16.gmra.mrb[20].mxu1 %vm144_vm0, %v1934_v11  ;;  %v2053_v11 = vld [vmem:[%s2431_s0] ss:$0 sm:$0xff] }
 0x11a   :  { %1728 = vmatprep.mubr.msk.bf16.mxu1 %vm144_vm0, %v1939_v12  ;;  %1270 = vperm.xlu0 %1802, %v2053_v11   ;;  %v324_v12 = vsub.s32 1, %v1990_v25 }
 0x121   :  { %1729 = vmatmul.mubr.msk.bf16.gmra.mrb[24].mxu1 %vm144_vm0, %v1954_v15  ;;  %v2060_v15 = vrot.slane %v1996_v27, %v324_v12 }
 0x122   :  { %1732 = vmatprep.mubr.msk.bf16.mxu1 %vm144_vm0, %v1959_v16 }
 0x129   :  { %1733 = vmatmul.mubr.msk.bf16.gmra.mrb[28].mxu1 %vm144_vm0, %v1968_v17 }
 0x1c4   :  { %v1674_v16 = vpop.f32.mrb[0].mxu1 }
 0x1c5   :  { %v417_v17 = vadd.f32 %v1674_v16, %v2060_v15  ;;  %v408_v28 = vpop.f32.mrb[1].mxu1 }
 0x1c6   :  { %v409_v52 = vadd.f32 %v408_v28, %v2060_v15  ;;  %v1675_v53 = vpop.f32.mrb[2].mxu1 }
 0x1c7   :  { %v489_v54 = vmul.f32 0.2, %v417_v17  ;;  %v420_v55 = vadd.f32 %v1675_v53, %v2060_v15  ;;  %v411_v56 = vpop.f32.mrb[3].mxu1  ;;  %vm473_vm2 = vcmp.gt.f32.partialorder %v417_v17, 0.0 }
 0x1c8   :  { %v487_v57 = vmul.f32 0.2, %v409_v52  ;;  %v412_v58 = vadd.f32 %v411_v56, %v2060_v15  ;;  %vm471_vm3 = vcmp.gt.f32.partialorder %v409_v52, 0.0 }
 0x1c9   :  { %vm474_vm4 = vcmp.gt.f32.partialorder %v420_v55, 0.0  ;;  %v490_v59 = vmul.f32 0.2, %v420_v55  ;;  %v505_v61 = vsel %vm473_vm2, %v417_v17, %v489_v54  ;;  %v1837_v54 = vld [vmem:[%s2428_s3 + $0x68] sm:$0xff]  }
 0x1ca   :  { %vm472_vm5 = vcmp.gt.f32.partialorder %v412_v58, 0.0  ;;  %v488_v60 = vmul.f32 0.2, %v412_v58  ;;  %v503_v63 = vsel %vm471_vm3, %v409_v52, %v487_v57 }
 0x1cb   :  { %v506_v62 = vsel %vm474_vm4, %v420_v55, %v490_v59  ;;  %v2098_v55 = vld [vmem:[%s2430_s5 + $0x4] sm:$0x7] }
 0x1cc   :  { %v520_v0 = vpack.c.bf16 %v506_v62, %v505_v61  ;;  %v504_v1 = vsel %vm472_vm5, %v412_v58, %v488_v60  ;;  %v1678_v2 = vpop.f32.mrb[4].mxu1  ;;  %v2107_v62 = vrot.slane %v2098_v55, %v78_v26 }
 0x1cd   :  { %v519_v4 = vpack.c.bf16 %v504_v1, %v503_v63  ;;  %v433_v5 = vadd.f32 %v1678_v2, %v2060_v15  ;;  %v424_v6 = vpop.f32.mrb[5].mxu1 }
 0x1ce   :  { %v425_v9 = vadd.f32 %v424_v6, %v2060_v15  ;;  %v1679_v10 = vpop.f32.mrb[6].mxu1 }
 0x1cf   :  { %v493_v14 = vmul.f32 0.2, %v433_v5  ;;  %v436_v18 = vadd.f32 %v1679_v10, %v2060_v15  ;;  %v427_v19 = vpop.f32.mrb[7].mxu1  ;;  %1696 = vmatprep.mubr.msk.bf16.mxu0 %vm144_vm0, %v519_v4  ;;  %vm477_vm6 = vcmp.gt.f32.partialorder %v433_v5, 0.0 }
 0x1d0   :  { %v491_v20 = vmul.f32 0.2, %v425_v9  ;;  %v428_v21 = vadd.f32 %v427_v19, %v2060_v15  ;;  %1697 = vmatmul.mubr.msk.bf16.vlgmr.msra.gmra.mrb[16].mxu0 %vm144_vm0, %v520_v0  ;;  %vm475_vm7 = vcmp.gt.f32.partialorder %v425_v9, 0.0  ;;  %v1838_v0 = vld [vmem:[%s2428_s3 + $0x70] sm:$0xff]  }
 0x1d1   :  { %vm478_vm8 = vcmp.gt.f32.partialorder %v436_v18, 0.0  ;;  %v494_v22 = vmul.f32 0.2, %v436_v18  ;;  %1737 = vmatpush3.bf16.msra.mxu0 %v1832_v7  ;;  %v509_v29 = vsel %vm477_vm6, %v433_v5, %v493_v14 }
 0x1d2   :  { %vm476_vm9 = vcmp.gt.f32.partialorder %v428_v21, 0.0  ;;  %v492_v23 = vmul.f32 0.2, %v428_v21  ;;  %1738 = vmatprep.subr.bf16.mxu0 %v1833_v13  ;;  %v507_v31 = vsel %vm475_vm7, %v425_v9, %v491_v20 }
 0x1d3   :  { %v510_v30 = vsel %vm478_vm8, %v436_v18, %v494_v22  ;;  %v1839_v18 = vld [vmem:[%s2428_s3 + $0x78] sm:$0xff]  }
 0x1d4   :  { %v522_v32 = vpack.c.bf16 %v510_v30, %v509_v29  ;;  %v508_v33 = vsel %vm476_vm9, %v428_v21, %v492_v23  ;;  %v1682_v34 = vpop.f32.mrb[8].mxu1 }
 0x1d5   :  { %v521_v35 = vpack.c.bf16 %v508_v33, %v507_v31  ;;  %v449_v36 = vadd.f32 %v1682_v34, %v2060_v15  ;;  %1739 = vmatpush3.bf16.msra.mxu0 %v1833_v13  ;;  %v440_v37 = vpop.f32.mrb[9].mxu1 }
 0x1d6   :  { %v441_v38 = vadd.f32 %v440_v37, %v2060_v15  ;;  %v1683_v39 = vpop.f32.mrb[10].mxu1  ;;  %1740 = vmatprep.subr.bf16.mxu0 %v1834_v24 }
 0x1d7   :  { %v497_v41 = vmul.f32 0.2, %v449_v36  ;;  %v452_v42 = vadd.f32 %v1683_v39, %v2060_v15  ;;  %v443_v43 = vpop.f32.mrb[11].mxu1  ;;  %1700 = vmatprep.mubr.msk.bf16.mxu0 %vm144_vm0, %v521_v35  ;;  %vm481_vm10 = vcmp.gt.f32.partialorder %v449_v36, 0.0 }
 0x1d8   :  { %v495_v44 = vmul.f32 0.2, %v441_v38  ;;  %v444_v45 = vadd.f32 %v443_v43, %v2060_v15  ;;  %1701 = vmatmul.mubr.msk.bf16.gmra.mrb[20].mxu0 %vm144_vm0, %v522_v32  ;;  %vm479_vm11 = vcmp.gt.f32.partialorder %v441_v38, 0.0 }
 0x1d9   :  { %vm482_vm12 = vcmp.gt.f32.partialorder %v452_v42, 0.0  ;;  %v498_v46 = vmul.f32 0.2, %v452_v42  ;;  %1741 = vmatpush3.bf16.msra.mxu0 %v1834_v24  ;;  %v513_v49 = vsel %vm481_vm10, %v449_v36, %v497_v41 }
 0x1da   :  { %vm480_vm13 = vcmp.gt.f32.partialorder %v444_v45, 0.0  ;;  %v496_v47 = vmul.f32 0.2, %v444_v45  ;;  %1742 = vmatprep.subr.bf16.mxu0 %v1835_v40  ;;  %v511_v51 = vsel %vm479_vm11, %v441_v38, %v495_v44 }
 0x1db   :  { %v514_v50 = vsel %vm482_vm12, %v452_v42, %v498_v46 }
 0x1dc   :  { %v524_v3 = vpack.c.bf16 %v514_v50, %v513_v49  ;;  %v512_v7 = vsel %vm480_vm13, %v444_v45, %v496_v47  ;;  %v1686_v8 = vpop.f32.mrb[12].mxu1 }
 0x1dd   :  { %v523_v16 = vpack.c.bf16 %v512_v7, %v511_v51  ;;  %v465_v17 = vadd.f32 %v1686_v8, %v2060_v15  ;;  %1743 = vmatpush3.bf16.msra.mxu0 %v1835_v40  ;;  %v456_v28 = vpop.f32.mrb[13].mxu1 }
 0x1de   :  { %v457_v52 = vadd.f32 %v456_v28, %v2060_v15  ;;  %v1687_v53 = vpop.f32.mrb[14].mxu1  ;;  %1744 = vmatprep.subr.bf16.mxu0 %v1836_v48 }
 0x1df   :  { %v501_v56 = vmul.f32 0.2, %v465_v17  ;;  %v468_v57 = vadd.f32 %v1687_v53, %v2060_v15  ;;  %v459_v58 = vpop.f32.mrb[15].mxu1  ;;  %1704 = vmatprep.mubr.msk.bf16.mxu0 %vm144_vm0, %v523_v16  ;;  %vm485_vm14 = vcmp.gt.f32.partialorder %v465_v17, 0.0 }
 0x1e0   :  { %v499_v59 = vmul.f32 0.2, %v457_v52  ;;  %v460_v60 = vadd.f32 %v459_v58, %v2060_v15  ;;  %1705 = vmatmul.mubr.msk.bf16.gmra.mrb[24].mxu0 %vm144_vm0, %v524_v3  ;;  %vm483_vm15 = vcmp.gt.f32.partialorder %v457_v52, 0.0 }
 0x1e1   :  { %vm486_vm1 = vcmp.gt.f32.partialorder %v468_v57, 0.0  ;;  %v502_v61 = vmul.f32 0.2, %v468_v57  ;;  %1745 = vmatpush3.bf16.msra.mxu0 %v1836_v48  ;;  %v517_v1 = vsel %vm485_vm14, %v465_v17, %v501_v56 }
 0x1e2   :  { %vm484_vm2 = vcmp.gt.f32.partialorder %v460_v60, 0.0  ;;  %v500_v63 = vmul.f32 0.2, %v460_v60  ;;  %1746 = vmatprep.subr.bf16.mxu0 %v1837_v54  ;;  %v515_v2 = vsel %vm483_vm15, %v457_v52, %v499_v59 }
 0x1e3   :  { %v518_v15 = vsel %vm486_vm1, %v468_v57, %v502_v61 }
 0x1e4   :  { %v526_v4 = vpack.c.bf16 %v518_v15, %v517_v1  ;;  %v516_v5 = vsel %vm484_vm2, %v460_v60, %v500_v63  ;;  %v1722_v6 = vpop.f32.mrb[16].mxu1 }
 0x1e5   :  { %v525_v9 = vpack.c.bf16 %v516_v5, %v515_v2  ;;  %v784_v10 = vadd.f32 %v1722_v6, %v2107_v62  ;;  %1747 = vmatpush3.bf16.msra.mxu0 %v1837_v54  ;;  %v775_v13 = vpop.f32.mrb[17].mxu1 }
 0x1e6   :  { %v776_v26 = vadd.f32 %v775_v13, %v2107_v62  ;;  %v1723_v14 = vpop.f32.mrb[18].mxu1  ;;  %1748 = vmatprep.subr.bf16.mxu0 %v1838_v0 }
 0x1e7   :  { %v856_v19 = vmul.f32 0.2, %v784_v10  ;;  %v787_v20 = vadd.f32 %v1723_v14, %v2107_v62  ;;  %1708 = vmatprep.mubr.msk.bf16.mxu0 %vm144_vm0, %v525_v9  ;;  %v778_v21 = vpop.f32.mrb[19].mxu1  ;;  %vm840_vm3 = vcmp.gt.f32.partialorder %v784_v10, 0.0 }
 0x1e8   :  { %v854_v22 = vmul.f32 0.2, %v776_v26  ;;  %v779_v23 = vadd.f32 %v778_v21, %v2107_v62  ;;  %1709 = vmatmul.mubr.msk.bf16.gmra.mrb[28].mxu0 %vm144_vm0, %v526_v4  ;;  %vm838_vm4 = vcmp.gt.f32.partialorder %v776_v26, 0.0 }
 0x1e9   :  { %vm841_vm5 = vcmp.gt.f32.partialorder %v787_v20, 0.0  ;;  %v857_v24 = vmul.f32 0.2, %v787_v20  ;;  %1749 = vmatpush3.bf16.msra.mxu0 %v1838_v0  ;;  %v872_v30 = vsel %vm840_vm3, %v784_v10, %v856_v19 }
 0x1ea   :  { %vm839_vm6 = vcmp.gt.f32.partialorder %v779_v23, 0.0  ;;  %v855_v29 = vmul.f32 0.2, %v779_v23  ;;  %1750 = vmatprep.subr.bf16.mxu0 %v1839_v18  ;;  %v870_v34 = vsel %vm838_vm4, %v776_v26, %v854_v22 }
 0x1eb   :  { %v873_v31 = vsel %vm841_vm5, %v787_v20, %v857_v24 }
 0x1ec   :  { %v887_v32 = vpack.c.bf16 %v873_v31, %v872_v30  ;;  %v1726_v33 = vpop.f32.mrb[20].mxu1  ;;  %v871_v35 = vsel %vm839_vm6, %v779_v23, %v855_v29 }
 0x1ed   :  { %v800_v36 = vadd.f32 %v1726_v33, %v2107_v62  ;;  %1751 = vmatpush3.bf16.msra.mxu0 %v1839_v18  ;;  %v791_v37 = vpop.f32.mrb[21].mxu1  ;;  %v886_v38 = vpack.c.bf16 %v871_v35, %v870_v34  ;;  %v1842_v33 = vld [vmem:[%s2429_s4 + $0x30] sm:$0xff]   ;;  %v1843_v34 = vld [vmem:[%s2429_s4 + $0x38] sm:$0xff]   ;;  %v1845_v35 = vmov 1  }
 0x1ee   :  { %v792_v39 = vadd.f32 %v791_v37, %v2107_v62  ;;  %v1727_v40 = vpop.f32.mrb[22].mxu1  ;;  %1803 = vset.pattern.permute.xlu0 %v1845_v35 }
 0x1ef   :  { %v860_v41 = vmul.f32 0.2, %v800_v36  ;;  %v803_v42 = vadd.f32 %v1727_v40, %v2107_v62  ;;  %v794_v43 = vpop.f32.mrb[23].mxu1  ;;  %1752 = vmatprep.mubr.bf16.mxu0 %v886_v38  ;;  %vm844_vm7 = vcmp.gt.f32.partialorder %v800_v36, 0.0  ;;  %1290 = vperm.xlu0 %1803, %v2053_v11  }
 0x1f0   :  { %v858_v44 = vmul.f32 0.2, %v792_v39  ;;  %v795_v45 = vadd.f32 %v794_v43, %v2107_v62  ;;  %1753 = vmatmul.mubr.bf16.vlgmr.msra.gmra.mrb[32].mxu0 %v887_v32  ;;  %vm842_vm8 = vcmp.gt.f32.partialorder %v792_v39, 0.0  ;;  %v1840_v32 = vld [vmem:[%s2429_s4 + $0x20] sm:$0xff]  }
 0x1f1   :  { %vm845_vm9 = vcmp.gt.f32.partialorder %v803_v42, 0.0  ;;  %v861_v46 = vmul.f32 0.2, %v803_v42  ;;  %v876_v48 = vsel %vm844_vm7, %v800_v36, %v860_v41  ;;  %1792 = vmatprep.subr.bf16.mxu1 %v1840_v32  ;;  %1768 = vmatprep.subr.bf16.mxu0 %v1840_v32 }
 0x1f2   :  { %vm843_vm10 = vcmp.gt.f32.partialorder %v795_v45, 0.0  ;;  %v859_v47 = vmul.f32 0.2, %v795_v45  ;;  %v874_v51 = vsel %vm842_vm8, %v792_v39, %v858_v44  ;;  %1796 = vmatpush3.bf16.msra.mxu1 %v1840_v32  ;;  %1769 = vmatpush3.bf16.msra.mxu0 %v1840_v32 }
 0x1f3   :  { %v877_v49 = vsel %vm845_vm9, %v803_v42, %v861_v46 }
 0x1f4   :  { %v1730_v50 = vpop.f32.mrb[24].mxu1  ;;  %v875_v3 = vsel %vm843_vm10, %v795_v45, %v859_v47  ;;  %v889_v7 = vpack.c.bf16 %v877_v49, %v876_v48 }
 0x1f5   :  { %v816_v8 = vadd.f32 %v1730_v50, %v2107_v62  ;;  %v807_v16 = vpop.f32.mrb[25].mxu1  ;;  %v888_v17 = vpack.c.bf16 %v875_v3, %v874_v51  ;;  %v2181_v51 = vrot.slane %v2098_v55, %v324_v12 }
 0x1f6   :  { %v808_v28 = vadd.f32 %v807_v16, %v2107_v62  ;;  %v1731_v52 = vpop.f32.mrb[26].mxu1 }
 0x1f7   :  { %v864_v53 = vmul.f32 0.2, %v816_v8  ;;  %v819_v54 = vadd.f32 %v1731_v52, %v2107_v62  ;;  %v810_v56 = vpop.f32.mrb[27].mxu1  ;;  %1756 = vmatprep.mubr.bf16.mxu0 %v888_v17  ;;  %vm848_vm11 = vcmp.gt.f32.partialorder %v816_v8, 0.0 }
 0x1f8   :  { %v862_v57 = vmul.f32 0.2, %v808_v28  ;;  %v811_v58 = vadd.f32 %v810_v56, %v2107_v62  ;;  %1757 = vmatmul.mubr.bf16.gmra.mrb[36].mxu0 %v889_v7  ;;  %vm846_vm12 = vcmp.gt.f32.partialorder %v808_v28, 0.0 }
 0x1f9   :  { %vm849_vm13 = vcmp.gt.f32.partialorder %v819_v54, 0.0  ;;  %v865_v59 = vmul.f32 0.2, %v819_v54  ;;  %v880_v61 = vsel %vm848_vm11, %v816_v8, %v864_v53 }
 0x1fa   :  { %vm847_vm14 = vcmp.gt.f32.partialorder %v811_v58, 0.0  ;;  %v863_v60 = vmul.f32 0.2, %v811_v58  ;;  %v878_v1 = vsel %vm846_vm12, %v808_v28, %v862_v57 }
 0x1fb   :  { %v881_v63 = vsel %vm849_vm13, %v819_v54, %v865_v59 }
 0x1fc   :  { %v1734_v0 = vpop.f32.mrb[28].mxu1  ;;  %v879_v15 = vsel %vm847_vm14, %v811_v58, %v863_v60  ;;  %v891_v2 = vpack.c.bf16 %v881_v63, %v880_v61 }
 0x1fd   :  { %v832_v4 = vadd.f32 %v1734_v0, %v2107_v62  ;;  %v823_v5 = vpop.f32.mrb[29].mxu1  ;;  %v890_v6 = vpack.c.bf16 %v879_v15, %v878_v1 }
 0x1fe   :  { %v824_v9 = vadd.f32 %v823_v5, %v2107_v62  ;;  %v1735_v10 = vpop.f32.mrb[30].mxu1 }
 0x1ff   :  { %v868_v13 = vmul.f32 0.2, %v832_v4  ;;  %v835_v26 = vadd.f32 %v1735_v10, %v2107_v62  ;;  %v826_v14 = vpop.f32.mrb[31].mxu1  ;;  %1760 = vmatprep.mubr.bf16.mxu0 %v890_v6  ;;  %vm852_vm15 = vcmp.gt.f32.partialorder %v832_v4, 0.0 }
 0x200   :  { %v866_v18 = vmul.f32 0.2, %v824_v9  ;;  %v827_v19 = vadd.f32 %v826_v14, %v2107_v62  ;;  %1761 = vmatmul.mubr.bf16.gmra.mrb[40].mxu0 %v891_v2  ;;  %vm850_vm1 = vcmp.gt.f32.partialorder %v824_v9, 0.0  ;;  %v1841_v62 = vld [vmem:[%s2429_s4 + $0x28] sm:$0xff]  }
 0x201   :  { %vm853_vm2 = vcmp.gt.f32.partialorder %v835_v26, 0.0  ;;  %v869_v20 = vmul.f32 0.2, %v835_v26  ;;  %v884_v22 = vsel %vm852_vm15, %v832_v4, %v868_v13  ;;  %1793 = vmatprep.subr.bf16.mxu1 %v1841_v62  ;;  %1770 = vmatprep.subr.bf16.mxu0 %v1841_v62 }
 0x202   :  { %vm851_vm3 = vcmp.gt.f32.partialorder %v827_v19, 0.0  ;;  %v867_v21 = vmul.f32 0.2, %v827_v19  ;;  %v882_v24 = vsel %vm850_vm1, %v824_v9, %v866_v18  ;;  %1797 = vmatpush3.bf16.msra.mxu1 %v1841_v62  ;;  %1771 = vmatpush3.bf16.msra.mxu0 %v1841_v62 }
 0x203   :  { %v885_v23 = vsel %vm853_vm2, %v835_v26, %v869_v20  ;;  %1794 = vmatprep.subr.bf16.mxu1 %v1842_v33  ;;  %1772 = vmatprep.subr.bf16.mxu0 %v1842_v33 }
 0x204   :  { %v883_v29 = vsel %vm851_vm3, %v827_v19, %v867_v21  ;;  %v893_v30 = vpack.c.bf16 %v885_v23, %v884_v22 }
 0x205   :  { %v892_v31 = vpack.c.bf16 %v883_v29, %v882_v24 }
 0x206   :  { %1798 = vmatpush3.bf16.msra.mxu1 %v1842_v33  ;;  %1773 = vmatpush3.bf16.msra.mxu0 %v1842_v33 }
 0x207   :  { %1764 = vmatprep.mubr.bf16.mxu0 %v892_v31  ;;  %1774 = vmatprep.subr.bf16.mxu0 %v1843_v34 }
 0x208   :  { %1765 = vmatmul.mubr.bf16.gmra.mrb[44].mxu0 %v893_v30  ;;  %1795 = vmatprep.subr.bf16.mxu1 %v1843_v34 }
 0x20a   :  { %1775 = vmatpush3.bf16.msra.mxu0 %v1843_v34  ;;  %1799 = vmatpush3.bf16.msra.mxu1 %v1843_v34 }
 0x2a3   :  { %v2146_v36 = vpop.f32.mrb[16].mxu0 }
 0x2a4   :  { %v2148_v37 = vpop.f32.mrb[17].mxu0 }
 0x2a5   :  { %v2150_v38 = vpop.f32.mrb[18].mxu0 }
 0x2a6   :  { %v2152_v39 = vpop.f32.mrb[19].mxu0 }
 0x2ab   :  { %v2154_v40 = vpop.f32.mrb[20].mxu0 }
 0x2ac   :  { %v2156_v41 = vpop.f32.mrb[21].mxu0 }
 0x2ad   :  { %v2158_v42 = vpop.f32.mrb[22].mxu0 }
 0x2ae   :  { %v2160_v43 = vpop.f32.mrb[23].mxu0 }
 0x2b3   :  { %v2162_v44 = vpop.f32.mrb[24].mxu0 }
 0x2b4   :  { %v2164_v45 = vpop.f32.mrb[25].mxu0 }
 0x2b5   :  { %v2166_v11 = vpop.f32.mrb[26].mxu0 }
 0x2b6   :  { %v2168_v46 = vpop.f32.mrb[27].mxu0 }
 0x2bb   :  { %v2170_v47 = vpop.f32.mrb[28].mxu0 }
 0x2bc   :  { %v2172_v48 = vpop.f32.mrb[29].mxu0 }
 0x2bd   :  { %v2174_v49 = vpop.f32.mrb[30].mxu0 }
 0x2be   :  { %v2176_v50 = vpop.f32.mrb[31].mxu0 }
 0x2c3   :  { %v1754_v3 = vpop.f32.mrb[32].mxu0 }
 0x2c4   :  { %v989_v7 = vadd.f32 %v1754_v3, %v2181_v51  ;;  %v980_v8 = vpop.f32.mrb[33].mxu0 }
 0x2c5   :  { %v981_v16 = vadd.f32 %v980_v8, %v2181_v51  ;;  %v1755_v17 = vpop.f32.mrb[34].mxu0 }
 0x2c6   :  { %v1061_v28 = vmul.f32 0.2, %v989_v7  ;;  %v992_v52 = vadd.f32 %v1755_v17, %v2181_v51  ;;  %v983_v53 = vpop.f32.mrb[35].mxu0  ;;  %vm1045_vm4 = vcmp.gt.f32.partialorder %v989_v7, 0.0 }
 0x2c7   :  { %v1059_v54 = vmul.f32 0.2, %v981_v16  ;;  %v984_v56 = vadd.f32 %v983_v53, %v2181_v51  ;;  %vm1043_vm5 = vcmp.gt.f32.partialorder %v981_v16, 0.0 }
 0x2c8   :  { %vm1046_vm6 = vcmp.gt.f32.partialorder %v992_v52, 0.0  ;;  %v1062_v57 = vmul.f32 0.2, %v992_v52  ;;  %v1077_v58 = vsel %vm1045_vm4, %v989_v7, %v1061_v28 }
 0x2c9   :  { %vm1044_vm7 = vcmp.gt.f32.partialorder %v984_v56, 0.0  ;;  %v1060_v12 = vmul.f32 0.2, %v984_v56  ;;  %v1075_v60 = vsel %vm1043_vm5, %v981_v16, %v1059_v54  ;;  %vm1389_vm5 = vcmask 519168  }
 0x2ca   :  { %v1078_v59 = vsel %vm1046_vm6, %v992_v52, %v1062_v57 }
 0x2cb   :  { %v1092_v61 = vpack.c.bf16 %v1078_v59, %v1077_v58  ;;  %v1076_v63 = vsel %vm1044_vm7, %v984_v56, %v1060_v12  ;;  %v1758_v0 = vpop.f32.mrb[36].mxu0 }
 0x2cc   :  { %v1091_v1 = vpack.c.bf16 %v1076_v63, %v1075_v60  ;;  %v1005_v15 = vadd.f32 %v1758_v0, %v2181_v51  ;;  %v996_v2 = vpop.f32.mrb[37].mxu0 }
 0x2cd   :  { %v997_v4 = vadd.f32 %v996_v2, %v2181_v51  ;;  %v1759_v5 = vpop.f32.mrb[38].mxu0 }
 0x2ce   :  { %v1065_v6 = vmul.f32 0.2, %v1005_v15  ;;  %v1008_v9 = vadd.f32 %v1759_v5, %v2181_v51  ;;  %v999_v10 = vpop.f32.mrb[39].mxu0  ;;  %1776 = vmatprep.mubr.msk.bf16.mxu0 %vm144_vm0, %v1091_v1  ;;  %vm1049_vm8 = vcmp.gt.f32.partialorder %v1005_v15, 0.0 }
 0x2cf   :  { %v1063_v13 = vmul.f32 0.2, %v997_v4  ;;  %v1000_v26 = vadd.f32 %v999_v10, %v2181_v51  ;;  %1777 = vmatmul.mubr.msk.bf16.vlgmr.msra.gmra.mrb[48].mxu0 %vm144_vm0, %v1092_v61  ;;  %vm1047_vm9 = vcmp.gt.f32.partialorder %v997_v4, 0.0 }
 0x2d0   :  { %vm1050_vm10 = vcmp.gt.f32.partialorder %v1008_v9, 0.0  ;;  %v1066_v14 = vmul.f32 0.2, %v1008_v9  ;;  %v1081_v19 = vsel %vm1049_vm8, %v1005_v15, %v1065_v6 }
 0x2d1   :  { %vm1048_vm11 = vcmp.gt.f32.partialorder %v1000_v26, 0.0  ;;  %v1064_v18 = vmul.f32 0.2, %v1000_v26  ;;  %v1079_v21 = vsel %vm1047_vm9, %v997_v4, %v1063_v13 }
 0x2d2   :  { %v1082_v20 = vsel %vm1050_vm10, %v1008_v9, %v1066_v14  ;;  %v529_v14 = vsub.s32 2, %v1990_v25 }
 0x2d3   :  { %v1094_v22 = vpack.c.bf16 %v1082_v20, %v1081_v19  ;;  %v1080_v23 = vsel %vm1048_vm11, %v1000_v26, %v1064_v18  ;;  %v1762_v24 = vpop.f32.mrb[40].mxu0  ;;  %v2211_v18 = vpop.permute.xlu0 %1270 }
 0x2d4   :  { %v1093_v29 = vpack.c.bf16 %v1080_v23, %v1079_v21  ;;  %v1021_v30 = vadd.f32 %v1762_v24, %v2181_v51  ;;  %v1012_v31 = vpop.f32.mrb[41].mxu0  ;;  %v2214_v19 = vrot.slane %v2098_v55, %v529_v14 }
 0x2d5   :  { %v1013_v32 = vadd.f32 %v1012_v31, %v2181_v51  ;;  %v1763_v62 = vpop.f32.mrb[42].mxu0 }
 0x2d6   :  { %v1069_v33 = vmul.f32 0.2, %v1021_v30  ;;  %v1024_v34 = vadd.f32 %v1763_v62, %v2181_v51  ;;  %v1015_v35 = vpop.f32.mrb[43].mxu0  ;;  %1780 = vmatprep.mubr.msk.bf16.mxu1 %vm144_vm0, %v1093_v29  ;;  %vm1053_vm12 = vcmp.gt.f32.partialorder %v1021_v30, 0.0 }
 0x2d7   :  { %v1067_v3 = vmul.f32 0.2, %v1013_v32  ;;  %v1016_v7 = vadd.f32 %v1015_v35, %v2181_v51  ;;  %1781 = vmatmul.mubr.msk.bf16.vlgmr.msra.gmra.mrb[32].mxu1 %vm144_vm0, %v1094_v22  ;;  %vm1051_vm13 = vcmp.gt.f32.partialorder %v1013_v32, 0.0  ;;  %v2220_v23 = vpop.permute.xlu0 %1290 }
 0x2d8   :  { %vm1054_vm14 = vcmp.gt.f32.partialorder %v1024_v34, 0.0  ;;  %v1070_v8 = vmul.f32 0.2, %v1024_v34  ;;  %v1085_v17 = vsel %vm1053_vm12, %v1021_v30, %v1069_v33 }
 0x2d9   :  { %vm1052_vm15 = vcmp.gt.f32.partialorder %v1016_v7, 0.0  ;;  %v1068_v16 = vmul.f32 0.2, %v1016_v7  ;;  %v1083_v52 = vsel %vm1051_vm13, %v1013_v32, %v1067_v3 }
 0x2da   :  { %v1086_v28 = vsel %vm1054_vm14, %v1024_v34, %v1070_v8 }
 0x2db   :  { %v1096_v53 = vpack.c.bf16 %v1086_v28, %v1085_v17  ;;  %v1084_v54 = vsel %vm1052_vm15, %v1016_v7, %v1068_v16  ;;  %v1766_v56 = vpop.f32.mrb[44].mxu0 }
 0x2dc   :  { %v1095_v57 = vpack.c.bf16 %v1084_v54, %v1083_v52  ;;  %v1037_v12 = vadd.f32 %v1766_v56, %v2181_v51  ;;  %v1028_v58 = vpop.f32.mrb[45].mxu0 }
 0x2dd   :  { %v1029_v59 = vadd.f32 %v1028_v58, %v2181_v51  ;;  %v1767_v60 = vpop.f32.mrb[46].mxu0 }
 0x2de   :  { %v1073_v61 = vmul.f32 0.2, %v1037_v12  ;;  %v1040_v63 = vadd.f32 %v1767_v60, %v2181_v51  ;;  %v1031_v0 = vpop.f32.mrb[47].mxu0  ;;  %1784 = vmatprep.mubr.msk.bf16.mxu1 %vm144_vm0, %v1095_v57  ;;  %vm1057_vm1 = vcmp.gt.f32.partialorder %v1037_v12, 0.0 }
 0x2df   :  { %v1071_v1 = vmul.f32 0.2, %v1029_v59  ;;  %v1032_v15 = vadd.f32 %v1031_v0, %v2181_v51  ;;  %1785 = vmatmul.mubr.msk.bf16.gmra.mrb[36].mxu1 %vm144_vm0, %v1096_v53  ;;  %vm1055_vm2 = vcmp.gt.f32.partialorder %v1029_v59, 0.0  ;;  %v2209_v51 = vrot.slane %v1996_v27, %v529_v14 }
 0x2e0   :  { %vm1058_vm3 = vcmp.gt.f32.partialorder %v1040_v63, 0.0  ;;  %v1074_v2 = vmul.f32 0.2, %v1040_v63  ;;  %v1089_v5 = vsel %vm1057_vm1, %v1037_v12, %v1073_v61 }
 0x2e1   :  { %vm1056_vm4 = vcmp.gt.f32.partialorder %v1032_v15, 0.0  ;;  %v1072_v4 = vmul.f32 0.2, %v1032_v15  ;;  %v1087_v9 = vsel %vm1055_vm2, %v1029_v59, %v1071_v1  ;;  %v622_v20 = vadd.f32 %v2146_v36, %v2209_v51 }
 0x2e2   :  { %v1090_v6 = vsel %vm1058_vm3, %v1040_v63, %v1074_v2  ;;  %v614_v21 = vadd.f32 %v2148_v37, %v2209_v51  ;;  %v625_v25 = vadd.f32 %v2150_v38, %v2209_v51  ;;  %v617_v29 = vadd.f32 %v2152_v39, %v2209_v51 }
 0x2e3   :  { %v1098_v10 = vpack.c.bf16 %v1090_v6, %v1089_v5  ;;  %v1088_v13 = vsel %vm1056_vm4, %v1032_v15, %v1072_v4  ;;  %v1275_v37 = vmul.f32 %v2211_v18, %v622_v20  ;;  %v638_v16 = vadd.f32 %v2154_v40, %v2209_v51 }
 0x2e4   :  { %v1097_v26 = vpack.c.bf16 %v1088_v13, %v1087_v9  ;;  %v1273_v39 = vmul.f32 %v2211_v18, %v614_v21  ;;  %v1276_v33 = vmul.f32 %v2211_v18, %v625_v25  ;;  %v1274_v3 = vmul.f32 %v2211_v18, %v617_v29 }
 0x2e5   :  { %v630_v52 = vadd.f32 %v2156_v41, %v2209_v51  ;;  %v641_v57 = vadd.f32 %v2158_v42, %v2209_v51  ;;  %v633_v59 = vadd.f32 %v2160_v43, %v2209_v51  ;;  %v1279_v61 = vmul.f32 %v2211_v18, %v638_v16 }
 0x2e6   :  { %1788 = vmatprep.mubr.msk.bf16.mxu1 %vm144_vm0, %v1097_v26  ;;  %v654_v26 = vadd.f32 %v2162_v44, %v2209_v51  ;;  %v646_v21 = vadd.f32 %v2164_v45, %v2209_v51  ;;  %v670_v16 = vadd.f32 %v2170_v47, %v2209_v51 }
 0x2e7   :  { %1789 = vmatmul.mubr.msk.bf16.gmra.mrb[40].mxu1 %vm144_vm0, %v1098_v10  ;;  %v1277_v1 = vmul.f32 %v2211_v18, %v630_v52  ;;  %v1280_v4 = vmul.f32 %v2211_v18, %v641_v57  ;;  %v1278_v9 = vmul.f32 %v2211_v18, %v633_v59  ;;  %v662_v52 = vadd.f32 %v2172_v48, %v2209_v51 }
 0x2e8   :  { %v673_v57 = vadd.f32 %v2174_v49, %v2209_v51 }
 0x3a2   :  { %v1778_v22 = vpop.f32.mrb[48].mxu0 }
 0x3a3   :  { %v1194_v27 = vadd.f32 %v1778_v22, %v2214_v19  ;;  %v1185_v24 = vpop.f32.mrb[49].mxu0 }
 0x3a4   :  { %v1186_v55 = vadd.f32 %v1185_v24, %v2214_v19  ;;  %v1779_v30 = vpop.f32.mrb[50].mxu0  ;;  %v657_v24 = vadd.f32 %v2166_v11, %v2209_v51 }
 0x3a5   :  { %1250 = vst.msk [vmem:[%s2432_s6 + $0x10] sm:$0xff] %vm144_vm0, %v1194_v27  ;;  %v1197_v36 = vadd.f32 %v1779_v30, %v2214_v19  ;;  %v1295_v38 = vmul.f32 %v2220_v23, %v1194_v27  ;;  %v1188_v31 = vpop.f32.mrb[51].mxu0  ;;  %v649_v30 = vadd.f32 %v2168_v46, %v2209_v51 }
 0x3a6   :  { %1248 = vst.msk [vmem:[%s2432_s6] sm:$0xff] %vm144_vm0, %v1186_v55  ;;  %v1293_v32 = vmul.f32 %v2220_v23, %v1186_v55  ;;  %v1189_v62 = vadd.f32 %v1188_v31, %v2214_v19 }
 0x3a7   :  { %1251 = vst.msk [vmem:[%s2432_s6 + $0x18] sm:$0xff] %vm144_vm0, %v1197_v36  ;;  %v1296_v34 = vmul.f32 %v2220_v23, %v1197_v36  ;;  %v1311_v35 = vadd.f32 %v1295_v38, %v1275_v37  ;;  %v1283_v37 = vmul.f32 %v2211_v18, %v654_v26 }
 0x3a8   :  { %v1309_v7 = vadd.f32 %v1293_v32, %v1273_v39  ;;  %1249 = vst.msk [vmem:[%s2432_s6 + $0x8] sm:$0xff] %vm144_vm0, %v1189_v62  ;;  %v1294_v8 = vmul.f32 %v2220_v23, %v1189_v62  ;;  %v1281_v39 = vmul.f32 %v2211_v18, %v646_v21 }
 0x3a9   :  { %v1312_v17 = vadd.f32 %v1296_v34, %v1276_v33  ;;  %v1538_v28 = vpack.c.bf16 %v1311_v35, %v1311_v35  ;;  %v1284_v33 = vmul.f32 %v2211_v18, %v657_v24 }
 0x3aa   :  { %v1536_v53 = vpack.c.bf16 %v1309_v7, %v1309_v7  ;;  %v1310_v54 = vadd.f32 %v1294_v8, %v1274_v3  ;;  %v1782_v56 = vpop.f32.mrb[32].mxu1  ;;  %v1282_v3 = vmul.f32 %v2211_v18, %v649_v30 }
 0x3ab   :  { %v1539_v12 = vpack.c.bf16 %v1312_v17, %v1312_v17  ;;  %1392 = vst.msk [vmem:[%s2433_s7 + $0x8] sm:$0xf] %vm1389_vm5, %v1538_v28  ;;  %v1210_v58 = vadd.f32 %v1782_v56, %v2214_v19  ;;  %v1201_v40 = vpop.f32.mrb[33].mxu1 }
 0x3ac   :  { %1390 = vst.msk [vmem:[%s2433_s7] sm:$0xf] %vm1389_vm5, %v1536_v53  ;;  %v1537_v41 = vpack.c.bf16 %v1310_v54, %v1310_v54  ;;  %v1202_v42 = vadd.f32 %v1201_v40, %v2214_v19  ;;  %v1783_v60 = vpop.f32.mrb[34].mxu1  ;;  %v665_v40 = vadd.f32 %v2176_v50, %v2209_v51 }
 0x3ad   :  { %1393 = vst.msk [vmem:[%s2433_s7 + $0xc] sm:$0xf] %vm1389_vm5, %v1539_v12  ;;  %v1299_v43 = vmul.f32 %v2220_v23, %v1210_v58  ;;  %v1213_v63 = vadd.f32 %v1783_v60, %v2214_v19  ;;  %v1204_v0 = vpop.f32.mrb[35].mxu1  ;;  %v1285_v60 = vmul.f32 %v2211_v18, %v662_v52 }
 0x3ae   :  { %1254 = vst.msk [vmem:[%s2432_s6 + $0x30] sm:$0xff] %vm144_vm0, %v1210_v58  ;;  %1252 = vst.msk [vmem:[%s2432_s6 + $0x20] sm:$0xff] %vm144_vm0, %v1202_v42  ;;  %v1297_v15 = vmul.f32 %v2220_v23, %v1202_v42  ;;  %v1205_v2 = vadd.f32 %v1204_v0, %v2214_v19 }
 0x3af   :  { %1391 = vst.msk [vmem:[%s2433_s7 + $0x4] sm:$0xf] %vm1389_vm5, %v1537_v41  ;;  %v1315_v5 = vadd.f32 %v1299_v43, %v1279_v61  ;;  %v1300_v6 = vmul.f32 %v2220_v23, %v1213_v63  ;;  %v1287_v41 = vmul.f32 %v2211_v18, %v670_v16 }
 0x3b0   :  { %1255 = vst.msk [vmem:[%s2432_s6 + $0x38] sm:$0xff] %vm144_vm0, %v1213_v63  ;;  %v1313_v10 = vadd.f32 %v1297_v15, %v1277_v1  ;;  %1253 = vst.msk [vmem:[%s2432_s6 + $0x28] sm:$0xff] %vm144_vm0, %v1205_v2  ;;  %v1298_v13 = vmul.f32 %v2220_v23, %v1205_v2  ;;  %v1288_v63 = vmul.f32 %v2211_v18, %v673_v57 }
 0x3b1   :  { %v1542_v14 = vpack.c.bf16 %v1315_v5, %v1315_v5  ;;  %v1316_v20 = vadd.f32 %v1300_v6, %v1280_v4  ;;  %v1286_v15 = vmul.f32 %v2211_v18, %v665_v40 }
 0x3b2   :  { %v1540_v22 = vpack.c.bf16 %v1313_v10, %v1313_v10  ;;  %v1314_v25 = vadd.f32 %v1298_v13, %v1278_v9  ;;  %v1786_v27 = vpop.f32.mrb[36].mxu1 }
 0x3b3   :  { %1396 = vst.msk [vmem:[%s2433_s7 + $0x18] sm:$0xf] %vm1389_vm5, %v1542_v14  ;;  %v1543_v29 = vpack.c.bf16 %v1316_v20, %v1316_v20  ;;  %v1226_v55 = vadd.f32 %v1786_v27, %v2214_v19  ;;  %v1217_v44 = vpop.f32.mrb[37].mxu1 }
 0x3b4   :  { %1394 = vst.msk [vmem:[%s2433_s7 + $0x10] sm:$0xf] %vm1389_vm5, %v1540_v22  ;;  %v1541_v45 = vpack.c.bf16 %v1314_v25, %v1314_v25  ;;  %v1218_v11 = vadd.f32 %v1217_v44, %v2214_v19  ;;  %v1787_v36 = vpop.f32.mrb[38].mxu1 }
 0x3b5   :  { %1397 = vst.msk [vmem:[%s2433_s7 + $0x1c] sm:$0xf] %vm1389_vm5, %v1543_v29  ;;  %v1303_v46 = vmul.f32 %v2220_v23, %v1226_v55  ;;  %v1229_v38 = vadd.f32 %v1787_v36, %v2214_v19  ;;  %v1220_v31 = vpop.f32.mrb[39].mxu1 }
 0x3b6   :  { %1258 = vst.msk [vmem:[%s2432_s6 + $0x50] sm:$0xff] %vm144_vm0, %v1226_v55  ;;  %1256 = vst.msk [vmem:[%s2432_s6 + $0x40] sm:$0xff] %vm144_vm0, %v1218_v11  ;;  %v1301_v32 = vmul.f32 %v2220_v23, %v1218_v11  ;;  %v1221_v62 = vadd.f32 %v1220_v31, %v2214_v19 }
 0x3b7   :  { %1395 = vst.msk [vmem:[%s2433_s7 + $0x14] sm:$0xf] %vm1389_vm5, %v1541_v45  ;;  %v1319_v34 = vadd.f32 %v1303_v46, %v1283_v37  ;;  %v1304_v35 = vmul.f32 %v2220_v23, %v1229_v38 }
 0x3b8   :  { %1259 = vst.msk [vmem:[%s2432_s6 + $0x58] sm:$0xff] %vm144_vm0, %v1229_v38  ;;  %v1317_v7 = vadd.f32 %v1301_v32, %v1281_v39  ;;  %1257 = vst.msk [vmem:[%s2432_s6 + $0x48] sm:$0xff] %vm144_vm0, %v1221_v62  ;;  %v1302_v8 = vmul.f32 %v2220_v23, %v1221_v62 }
 0x3b9   :  { %v1546_v17 = vpack.c.bf16 %v1319_v34, %v1319_v34  ;;  %v1320_v28 = vadd.f32 %v1304_v35, %v1284_v33 }
 0x3ba   :  { %v1544_v53 = vpack.c.bf16 %v1317_v7, %v1317_v7  ;;  %v1318_v54 = vadd.f32 %v1302_v8, %v1282_v3  ;;  %v1790_v56 = vpop.f32.mrb[40].mxu1 }
 0x3bb   :  { %1400 = vst.msk [vmem:[%s2433_s7 + $0x28] sm:$0xf] %vm1389_vm5, %v1546_v17  ;;  %v1547_v12 = vpack.c.bf16 %v1320_v28, %v1320_v28  ;;  %v1242_v58 = vadd.f32 %v1790_v56, %v2214_v19  ;;  %v1233_v47 = vpop.f32.mrb[41].mxu1 }
 0x3bc   :  { %1398 = vst.msk [vmem:[%s2433_s7 + $0x20] sm:$0xf] %vm1389_vm5, %v1544_v53  ;;  %v1545_v48 = vpack.c.bf16 %v1318_v54, %v1318_v54  ;;  %v1234_v49 = vadd.f32 %v1233_v47, %v2214_v19  ;;  %v1791_v59 = vpop.f32.mrb[42].mxu1 }
 0x3bd   :  { %1401 = vst.msk [vmem:[%s2433_s7 + $0x2c] sm:$0xf] %vm1389_vm5, %v1547_v12  ;;  %v1307_v50 = vmul.f32 %v2220_v23, %v1242_v58  ;;  %v1245_v51 = vadd.f32 %v1791_v59, %v2214_v19  ;;  %v1236_v42 = vpop.f32.mrb[43].mxu1 }
 0x3be   :  { %1262 = vst.msk [vmem:[%s2432_s6 + $0x70] sm:$0xff] %vm144_vm0, %v1242_v58  ;;  %1260 = vst.msk [vmem:[%s2432_s6 + $0x60] sm:$0xff] %vm144_vm0, %v1234_v49  ;;  %v1305_v61 = vmul.f32 %v2220_v23, %v1234_v49  ;;  %v1237_v43 = vadd.f32 %v1236_v42, %v2214_v19 }
 0x3bf   :  { %1399 = vst.msk [vmem:[%s2433_s7 + $0x24] sm:$0xf] %vm1389_vm5, %v1545_v48  ;;  %v1323_v0 = vadd.f32 %v1307_v50, %v1287_v41  ;;  %v1308_v1 = vmul.f32 %v2220_v23, %v1245_v51 }
 0x3c0   :  { %1263 = vst.msk [vmem:[%s2432_s6 + $0x78] sm:$0xff] %vm144_vm0, %v1245_v51  ;;  %v1321_v2 = vadd.f32 %v1305_v61, %v1285_v60  ;;  %1261 = vst.msk [vmem:[%s2432_s6 + $0x68] sm:$0xff] %vm144_vm0, %v1237_v43  ;;  %v1306_v19 = vmul.f32 %v2220_v23, %v1237_v43 }
 0x3c1   :  { %v1550_v4 = vpack.c.bf16 %v1323_v0, %v1323_v0  ;;  %v1324_v5 = vadd.f32 %v1308_v1, %v1288_v63 }
 0x3c2   :  { %v1548_v6 = vpack.c.bf16 %v1321_v2, %v1321_v2  ;;  %v1322_v9 = vadd.f32 %v1306_v19, %v1286_v15 }
 0x3c3   :  { %1404 = vst.msk [vmem:[%s2433_s7 + $0x38] sm:$0xf] %vm1389_vm5, %v1550_v4  ;;  %v1551_v10 = vpack.c.bf16 %v1324_v5, %v1324_v5 }
 0x3c4   :  { %1402 = vst.msk [vmem:[%s2433_s7 + $0x30] sm:$0xf] %vm1389_vm5, %v1548_v6  ;;  %v1549_v18 = vpack.c.bf16 %v1322_v9, %v1322_v9 }
 0x3c5   :  { %1405 = vst.msk [vmem:[%s2433_s7 + $0x3c] sm:$0xf] %vm1389_vm5, %v1551_v10 }
 0x3c6   :  { %1403 = vst.msk [vmem:[%s2433_s7 + $0x34] sm:$0xf] %vm1389_vm5, %v1549_v18 }

// kernel: informax_forward.4
= control target key start
LH: loop header
LB: loop body
LE: loop exit
PB: predicated region body
PF: predicated region fallthrough
CT: control target
= control target key end

     0   :  { %vm30_vm0 = vcmask 523264   ;;  %v2066_v1 = vmov 0.0   ;;  %s2560_s1 = inlined_call_operand.vmem [shape: bf16[128,64], index: 1, kind: input, shape index: {}]   ;;  %s2561_s0 = inlined_call_operand.vmem [shape: bf16[128,128], index: 0, kind: input, shape index: {}]   ;;  %s2562_s2 = inlined_call_operand.vmem [shape: bf16[2,64,128], index: 2, kind: input, shape index: {}]   ;;  %s2563_s3 = inlined_call_operand.vmem [shape: bf16[2,128,128], index: 3, kind: input, shape index: {}]   ;;  %s2564_s4 = inlined_call_operand.vmem [shape: bf16[2,128,128], index: 4, kind: input, shape index: {}]   ;;  %s2565_s5 = inlined_call_operand.vmem [shape: f32[2,3,128], index: 5, kind: input, shape index: {}]   ;;  %s2566_s6 = inlined_call_operand.vmem [shape: f32[128,128], index: 6, kind: output, shape index: {0}]   ;;  %s2567_s7 = inlined_call_operand.vmem [shape: f32[128,128], index: 7, kind: output, shape index: {1}]  }
   0x1   :  { %v2010_v0 = vld [vmem:[%s2560_s1] sm:$0xff]   ;;  %33 = vst.msk [vmem:[#allocation2 + $0x10] sm:$0xff] %vm30_vm0, %v2066_v1  ;;  %31 = vst.msk [vmem:[#allocation2] sm:$0xff] %vm30_vm0, %v2066_v1  ;;  %v2011_v2 = vld [vmem:[%s2560_s1 + $0x8] sm:$0xff]  }
   0x2   :  { %32 = vst.msk [vmem:[#allocation2 + $0x8] sm:$0xff] %vm30_vm0, %v2066_v1  ;;  %34 = vst.msk [vmem:[#allocation2 + $0x18] sm:$0xff] %vm30_vm0, %v2066_v1  ;;  %1785 = vmatprep.subr.bf16.mxu0 %v2010_v0  ;;  %v2012_v3 = vld [vmem:[%s2560_s1 + $0x10] sm:$0xff]   ;;  %v2013_v4 = vld [vmem:[%s2560_s1 + $0x18] sm:$0xff]  }
   0x3   :  { %35 = vst.msk [vmem:[#allocation2 + $0x20] sm:$0xff] %vm30_vm0, %v2066_v1  ;;  %36 = vst.msk [vmem:[#allocation2 + $0x28] sm:$0xff] %vm30_vm0, %v2066_v1  ;;  %1786 = vmatpush3.bf16.msra.mxu0 %v2010_v0  ;;  %v2018_v5 = vld [vmem:[%s2561_s0] sm:$0xff]   ;;  %v2015_v7 = vld [vmem:[%s2560_s1 + $0x28] sm:$0xff]  }
   0x4   :  { %37 = vst.msk [vmem:[#allocation2 + $0x30] sm:$0xff] %vm30_vm0, %v2066_v1  ;;  %38 = vst.msk [vmem:[#allocation2 + $0x38] sm:$0xff] %vm30_vm0, %v2066_v1  ;;  %1787 = vmatprep.subr.bf16.mxu0 %v2011_v2  ;;  %1801 = vmatprep.mubr.bf16.mxu0 %v2018_v5  ;;  %v2014_v6 = vld [vmem:[%s2560_s1 + $0x20] sm:$0xff]   ;;  %v2016_v8 = vld [vmem:[%s2560_s1 + $0x30] sm:$0xff]  }
   0x5   :  { %39 = vst.msk [vmem:[#allocation2 + $0x40] sm:$0xff] %vm30_vm0, %v2066_v1  ;;  %40 = vst.msk [vmem:[#allocation2 + $0x48] sm:$0xff] %vm30_vm0, %v2066_v1  ;;  %v2017_v9 = vld [vmem:[%s2560_s1 + $0x38] sm:$0xff]   ;;  %v2019_v10 = vld [vmem:[%s2561_s0 + $0x8] sm:$0xff]  }
   0x6   :  { %41 = vst.msk [vmem:[#allocation2 + $0x50] sm:$0xff] %vm30_vm0, %v2066_v1  ;;  %42 = vst.msk [vmem:[#allocation2 + $0x58] sm:$0xff] %vm30_vm0, %v2066_v1  ;;  %v2020_v11 = vld [vmem:[%s2561_s0 + $0x10] sm:$0xff]   ;;  %v2021_v12 = vld [vmem:[%s2561_s0 + $0x18] sm:$0xff]  }
   0x7   :  { %43 = vst.msk [vmem:[#allocation2 + $0x60] sm:$0xff] %vm30_vm0, %v2066_v1  ;;  %44 = vst.msk [vmem:[#allocation2 + $0x68] sm:$0xff] %vm30_vm0, %v2066_v1  ;;  %1788 = vmatpush3.bf16.msra.mxu0 %v2011_v2  ;;  %v2022_v13 = vld [vmem:[%s2561_s0 + $0x20] sm:$0xff]   ;;  %v2023_v14 = vld [vmem:[%s2561_s0 + $0x28] sm:$0xff]  }
   0x8   :  { %45 = vst.msk [vmem:[#allocation2 + $0x70] sm:$0xff] %vm30_vm0, %v2066_v1  ;;  %46 = vst.msk [vmem:[#allocation2 + $0x78] sm:$0xff] %vm30_vm0, %v2066_v1  ;;  %1789 = vmatprep.subr.bf16.mxu0 %v2012_v3  ;;  %v2024_v15 = vld [vmem:[%s2561_s0 + $0x30] sm:$0xff]   ;;  %v2025_v16 = vld [vmem:[%s2561_s0 + $0x38] sm:$0xff]  }
   0x9   :  { %v2026_v17 = vld [vmem:[%s2562_s2] sm:$0xff]   ;;  %v2027_v18 = vld [vmem:[%s2562_s2 + $0x8] sm:$0xff]   ;;  %v2028_v19 = vld [vmem:[%s2562_s2 + $0x10] sm:$0xff]  }
   0xa   :  { %1817 = vmatprep.subr.bf16.mxu1 %v2026_v17  ;;  %v2029_v20 = vld [vmem:[%s2562_s2 + $0x18] sm:$0xff]   ;;  %v2030_v21 = vld [vmem:[%s2563_s3] sm:$0xff]   ;;  %v49_v22 = vld [vmem:[#allocation2 + $0x10] sm:$0xff] }
   0xb   :  { %1790 = vmatpush3.bf16.msra.mxu0 %v2012_v3  ;;  %1818 = vmatpush3.bf16.msra.mxu1 %v2026_v17  ;;  %v47_v23 = vld [vmem:[#allocation2] sm:$0xff]  ;;  %v50_v25 = vld [vmem:[#allocation2 + $0x18] sm:$0xff]  ;;  %v48_v28 = vld [vmem:[#allocation2 + $0x8] sm:$0xff] }
   0xc   :  { %1791 = vmatprep.subr.bf16.mxu0 %v2013_v4  ;;  %1819 = vmatprep.subr.bf16.mxu1 %v2027_v18  ;;  %v53_v34 = vld [vmem:[#allocation2 + $0x30] sm:$0xff]  ;;  %v51_v35 = vld [vmem:[#allocation2 + $0x20] sm:$0xff]  ;;  %v54_v37 = vld [vmem:[#allocation2 + $0x38] sm:$0xff] }
   0xd   :  { %v52_v40 = vld [vmem:[#allocation2 + $0x28] sm:$0xff]  ;;  %v57_v49 = vld [vmem:[#allocation2 + $0x50] sm:$0xff]  ;;  %v55_v52 = vld [vmem:[#allocation2 + $0x40] sm:$0xff] }
   0xe   :  { %v2031_v54 = vld [vmem:[%s2563_s3 + $0x8] sm:$0xff]   ;;  %v58_v56 = vld [vmem:[#allocation2 + $0x58] sm:$0xff]  ;;  %v2032_v0 = vld [vmem:[%s2563_s3 + $0x10] sm:$0xff]  }
   0xf   :  { %1792 = vmatpush3.bf16.msra.mxu0 %v2013_v4  ;;  %1820 = vmatpush3.bf16.msra.mxu1 %v2027_v18  ;;  %v56_v59 = vld [vmem:[#allocation2 + $0x48] sm:$0xff]  ;;  %v61_v5 = vld [vmem:[#allocation2 + $0x70] sm:$0xff] }
  0x10   :  { %1793 = vmatprep.subr.bf16.mxu0 %v2014_v6  ;;  %1821 = vmatprep.subr.bf16.mxu1 %v2028_v19 }
  0x13   :  { %1794 = vmatpush3.bf16.msra.mxu0 %v2014_v6  ;;  %1822 = vmatpush3.bf16.msra.mxu1 %v2028_v19 }
  0x14   :  { %1795 = vmatprep.subr.bf16.mxu0 %v2015_v7  ;;  %1823 = vmatprep.subr.bf16.mxu1 %v2029_v20 }
  0x17   :  { %1796 = vmatpush3.bf16.msra.mxu0 %v2015_v7  ;;  %1824 = vmatpush3.bf16.msra.mxu1 %v2029_v20  ;;  %v2034_v20 = vld [vmem:[%s2563_s3 + $0x20] sm:$0xff]  }
  0x18   :  { %1797 = vmatprep.subr.bf16.mxu0 %v2016_v8  ;;  %1841 = vmatprep.subr.bf16.mxu1 %v2030_v21 }
  0x1b   :  { %1798 = vmatpush3.bf16.msra.mxu0 %v2016_v8  ;;  %v59_v8 = vld [vmem:[#allocation2 + $0x60] sm:$0xff] }
  0x1c   :  { %1799 = vmatprep.subr.bf16.mxu0 %v2017_v9 }
  0x1f   :  { %1800 = vmatpush3.bf16.msra.mxu0 %v2017_v9 }
  0x22   :  { %1802 = vmatmul.mubr.bf16.vlgmr.msra.gmra.mrb[0].mxu0 %v2019_v10  ;;  %v2033_v10 = vld [vmem:[%s2563_s3 + $0x18] sm:$0xff]  }
  0x23   :  { %1805 = vmatprep.mubr.bf16.mxu0 %v2020_v11 }
  0x2a   :  { %1806 = vmatmul.mubr.bf16.gmra.mrb[4].mxu0 %v2021_v12  ;;  %v62_v12 = vld [vmem:[#allocation2 + $0x78] sm:$0xff] }
  0x2b   :  { %1809 = vmatprep.mubr.bf16.mxu0 %v2022_v13 }
  0x32   :  { %1810 = vmatmul.mubr.bf16.gmra.mrb[8].mxu0 %v2023_v14 }
  0x33   :  { %1813 = vmatprep.mubr.bf16.mxu0 %v2024_v15  ;;  %v60_v15 = vld [vmem:[#allocation2 + $0x68] sm:$0xff] }
  0x3a   :  { %1814 = vmatmul.mubr.bf16.gmra.mrb[12].mxu0 %v2025_v16 }
  0xf5   :  { %v1803_v24 = vpop.f32.mrb[0].mxu0 }
  0xf6   :  { %v290_v26 = vadd.f32 %v1803_v24, %v49_v22  ;;  %v225_v27 = vpop.f32.mrb[1].mxu0 }
  0xf7   :  { %v288_v29 = vadd.f32 %v225_v27, %v47_v23  ;;  %v1804_v30 = vpop.f32.mrb[2].mxu0 }
  0xf8   :  { %307 = vst.msk [vmem:[#allocation2 + $0x10] sm:$0xff] %vm30_vm0, %v290_v26  ;;  %v291_v31 = vadd.f32 %v1804_v30, %v50_v25  ;;  %v228_v32 = vpop.f32.mrb[3].mxu0 }
  0xf9   :  { %305 = vst.msk [vmem:[#allocation2] sm:$0xff] %vm30_vm0, %v288_v29  ;;  %v289_v33 = vadd.f32 %v228_v32, %v48_v28  ;;  %v2035_v28 = vld [vmem:[%s2563_s3 + $0x28] sm:$0xff]  }
  0xfa   :  { %308 = vst.msk [vmem:[#allocation2 + $0x18] sm:$0xff] %vm30_vm0, %v291_v31 }
  0xfb   :  { %306 = vst.msk [vmem:[#allocation2 + $0x8] sm:$0xff] %vm30_vm0, %v289_v33 }
  0xfd   :  { %v1807_v36 = vpop.f32.mrb[4].mxu0 }
  0xfe   :  { %v294_v38 = vadd.f32 %v1807_v36, %v53_v34  ;;  %v241_v39 = vpop.f32.mrb[5].mxu0  ;;  %v2037_v36 = vld [vmem:[%s2563_s3 + $0x38] sm:$0xff]  }
  0xff   :  { %v292_v41 = vadd.f32 %v241_v39, %v51_v35  ;;  %v1808_v42 = vpop.f32.mrb[6].mxu0  ;;  %v326_v51 = vld [vmem:[#allocation2 + $0x10] sm:$0xff]  ;;  %v2043_v39 = vld [vmem:[%s2564_s4 + $0x8] sm:$0xff]  }
 0x100   :  { %311 = vst.msk [vmem:[#allocation2 + $0x30] sm:$0xff] %vm30_vm0, %v294_v38  ;;  %v295_v43 = vadd.f32 %v1808_v42, %v54_v37  ;;  %v244_v44 = vpop.f32.mrb[7].mxu0  ;;  %v324_v47 = vld [vmem:[#allocation2] sm:$0xff]  ;;  %v2036_v35 = vld [vmem:[%s2563_s3 + $0x30] sm:$0xff]  }
 0x101   :  { %309 = vst.msk [vmem:[#allocation2 + $0x20] sm:$0xff] %vm30_vm0, %v292_v41  ;;  %v293_v45 = vadd.f32 %v244_v44, %v52_v40  ;;  %v327_v46 = vld [vmem:[#allocation2 + $0x18] sm:$0xff]  ;;  %v2258_v37 = vld [vmem:[%s2562_s2 + $0x20] sm:$0xff]   ;;  %v2044_v40 = vld [vmem:[%s2564_s4 + $0x10] sm:$0xff]   ;;  %v389_v44 = vlaneseq }
 0x102   :  { %312 = vst.msk [vmem:[#allocation2 + $0x38] sm:$0xff] %vm30_vm0, %v295_v43  ;;  %v325_v48 = vld [vmem:[#allocation2 + $0x8] sm:$0xff]  ;;  %v2196_v53 = vpack.c.bf16 %v327_v46, %v326_v51  ;;  %v2042_v38 = vld [vmem:[%s2564_s4] sm:$0xff]   ;;  %v2045_v41 = vld [vmem:[%s2564_s4 + $0x18] sm:$0xff]  }
 0x103   :  { %310 = vst.msk [vmem:[#allocation2 + $0x28] sm:$0xff] %vm30_vm0, %v293_v45  ;;  %v2194_v50 = vpack.c.bf16 %v325_v48, %v324_v47  ;;  %1873 = vmatprep.subr.bf16.mxu0 %v2042_v38  ;;  %v2046_v42 = vld [vmem:[%s2564_s4 + $0x20] sm:$0xff]   ;;  %v2047_v43 = vld [vmem:[%s2564_s4 + $0x28] sm:$0xff]   ;;  %v2279_v45 = vshrl.u32 %v389_v44, 7 }
 0x104   :  { %1874 = vmatpush3.bf16.msra.mxu0 %v2042_v38  ;;  %v2285_v47 = vld [vmem:[%s2565_s5] sm:$0x7] }
 0x105   :  { %v1811_v55 = vpop.f32.mrb[8].mxu0  ;;  %1825 = vmatprep.mubr.msk.bf16.mxu1 %vm30_vm0, %v2194_v50  ;;  %1875 = vmatprep.subr.bf16.mxu0 %v2043_v39  ;;  %v391_v46 = vsub.s32 0, %v2279_v45 }
 0x106   :  { %v298_v57 = vadd.f32 %v1811_v55, %v57_v49  ;;  %v257_v58 = vpop.f32.mrb[9].mxu0  ;;  %1826 = vmatmul.mubr.msk.bf16.vlgmr.msra.gmra.mrb[0].mxu1 %vm30_vm0, %v2196_v53 }
 0x107   :  { %v296_v60 = vadd.f32 %v257_v58, %v55_v52  ;;  %v1812_v61 = vpop.f32.mrb[10].mxu0  ;;  %1842 = vmatpush3.bf16.msra.mxu1 %v2030_v21  ;;  %v330_v7 = vld [vmem:[#allocation2 + $0x30] sm:$0xff]  ;;  %v2290_v48 = vrot.slane %v2285_v47, %v391_v46 }
 0x108   :  { %315 = vst.msk [vmem:[#allocation2 + $0x50] sm:$0xff] %vm30_vm0, %v298_v57  ;;  %v299_v62 = vadd.f32 %v1812_v61, %v58_v56  ;;  %v260_v63 = vpop.f32.mrb[11].mxu0  ;;  %1843 = vmatprep.subr.bf16.mxu1 %v2031_v54  ;;  %v328_v3 = vld [vmem:[#allocation2 + $0x20] sm:$0xff]  ;;  %1876 = vmatpush3.bf16.msra.mxu0 %v2043_v39 }
 0x109   :  { %313 = vst.msk [vmem:[#allocation2 + $0x40] sm:$0xff] %vm30_vm0, %v296_v60  ;;  %v297_v1 = vadd.f32 %v260_v63, %v56_v59  ;;  %v331_v2 = vld [vmem:[#allocation2 + $0x38] sm:$0xff]  ;;  %1877 = vmatprep.subr.bf16.mxu0 %v2044_v40 }
 0x10a   :  { %316 = vst.msk [vmem:[#allocation2 + $0x58] sm:$0xff] %vm30_vm0, %v299_v62  ;;  %v329_v4 = vld [vmem:[#allocation2 + $0x28] sm:$0xff]  ;;  %v2214_v9 = vpack.c.bf16 %v331_v2, %v330_v7 }
 0x10b   :  { %314 = vst.msk [vmem:[#allocation2 + $0x48] sm:$0xff] %vm30_vm0, %v297_v1  ;;  %v2212_v6 = vpack.c.bf16 %v329_v4, %v328_v3  ;;  %1844 = vmatpush3.bf16.msra.mxu1 %v2031_v54 }
 0x10c   :  { %1845 = vmatprep.subr.bf16.mxu1 %v2032_v0  ;;  %1878 = vmatpush3.bf16.msra.mxu0 %v2044_v40 }
 0x10d   :  { %v1815_v11 = vpop.f32.mrb[12].mxu0  ;;  %1829 = vmatprep.mubr.msk.bf16.mxu1 %vm30_vm0, %v2212_v6  ;;  %1879 = vmatprep.subr.bf16.mxu0 %v2045_v41 }
 0x10e   :  { %v302_v13 = vadd.f32 %v1815_v11, %v61_v5  ;;  %v273_v14 = vpop.f32.mrb[13].mxu0  ;;  %1830 = vmatmul.mubr.msk.bf16.gmra.mrb[4].mxu1 %vm30_vm0, %v2214_v9 }
 0x10f   :  { %v300_v16 = vadd.f32 %v273_v14, %v59_v8  ;;  %v1816_v17 = vpop.f32.mrb[14].mxu0  ;;  %1846 = vmatpush3.bf16.msra.mxu1 %v2032_v0  ;;  %v334_v26 = vld [vmem:[#allocation2 + $0x50] sm:$0xff] }
 0x110   :  { %319 = vst.msk [vmem:[#allocation2 + $0x70] sm:$0xff] %vm30_vm0, %v302_v13  ;;  %v303_v18 = vadd.f32 %v1816_v17, %v62_v12  ;;  %v276_v19 = vpop.f32.mrb[15].mxu0  ;;  %1847 = vmatprep.subr.bf16.mxu1 %v2033_v10  ;;  %v332_v23 = vld [vmem:[#allocation2 + $0x40] sm:$0xff]  ;;  %1880 = vmatpush3.bf16.msra.mxu0 %v2045_v41  ;;  %v2039_v12 = vld [vmem:[%s2562_s2 + $0x28] sm:$0xff]  }
 0x111   :  { %317 = vst.msk [vmem:[#allocation2 + $0x60] sm:$0xff] %vm30_vm0, %v300_v16  ;;  %v301_v21 = vadd.f32 %v276_v19, %v60_v15  ;;  %v335_v22 = vld [vmem:[#allocation2 + $0x58] sm:$0xff]  ;;  %1881 = vmatprep.subr.bf16.mxu0 %v2046_v42 }
 0x112   :  { %320 = vst.msk [vmem:[#allocation2 + $0x78] sm:$0xff] %vm30_vm0, %v303_v18  ;;  %v333_v24 = vld [vmem:[#allocation2 + $0x48] sm:$0xff]  ;;  %v2232_v27 = vpack.c.bf16 %v335_v22, %v334_v26 }
 0x113   :  { %318 = vst.msk [vmem:[#allocation2 + $0x68] sm:$0xff] %vm30_vm0, %v301_v21  ;;  %v2230_v25 = vpack.c.bf16 %v333_v24, %v332_v23  ;;  %1848 = vmatpush3.bf16.msra.mxu1 %v2033_v10 }
 0x114   :  { %1849 = vmatprep.subr.bf16.mxu1 %v2034_v20  ;;  %1882 = vmatpush3.bf16.msra.mxu0 %v2046_v42 }
 0x115   :  { %1833 = vmatprep.mubr.msk.bf16.mxu1 %vm30_vm0, %v2230_v25  ;;  %1883 = vmatprep.subr.bf16.mxu0 %v2047_v43 }
 0x116   :  { %1834 = vmatmul.mubr.msk.bf16.gmra.mrb[8].mxu1 %vm30_vm0, %v2232_v27 }
 0x117   :  { %1850 = vmatpush3.bf16.msra.mxu1 %v2034_v20  ;;  %v338_v33 = vld [vmem:[#allocation2 + $0x70] sm:$0xff] }
 0x118   :  { %1851 = vmatprep.subr.bf16.mxu1 %v2035_v28  ;;  %v336_v30 = vld [vmem:[#allocation2 + $0x60] sm:$0xff]  ;;  %1884 = vmatpush3.bf16.msra.mxu0 %v2047_v43  ;;  %v2040_v20 = vld [vmem:[%s2562_s2 + $0x30] sm:$0xff]  }
 0x119   :  { %v339_v29 = vld [vmem:[#allocation2 + $0x78] sm:$0xff] }
 0x11a   :  { %v337_v31 = vld [vmem:[#allocation2 + $0x68] sm:$0xff]  ;;  %v2243_v34 = vpack.c.bf16 %v339_v29, %v338_v33 }
 0x11b   :  { %v2241_v32 = vpack.c.bf16 %v337_v31, %v336_v30  ;;  %1852 = vmatpush3.bf16.msra.mxu1 %v2035_v28 }
 0x11c   :  { %1853 = vmatprep.subr.bf16.mxu1 %v2036_v35 }
 0x11d   :  { %1837 = vmatprep.mubr.msk.bf16.mxu1 %vm30_vm0, %v2241_v32 }
 0x11e   :  { %1838 = vmatmul.mubr.msk.bf16.gmra.mrb[12].mxu1 %vm30_vm0, %v2243_v34 }
 0x11f   :  { %1854 = vmatpush3.bf16.msra.mxu1 %v2036_v35 }
 0x120   :  { %1855 = vmatprep.subr.bf16.mxu1 %v2037_v36 }
 0x123   :  { %1856 = vmatpush3.bf16.msra.mxu1 %v2037_v36  ;;  %v2041_v36 = vld [vmem:[%s2562_s2 + $0x38] sm:$0xff]  }
 0x124   :  { %1905 = vmatprep.subr.bf16.mxu1 %v2258_v37 }
 0x1d9   :  { %v1827_v49 = vpop.f32.mrb[0].mxu1 }
 0x1da   :  { %v484_v51 = vadd.f32 %v1827_v49, %v2290_v48  ;;  %v475_v52 = vpop.f32.mrb[1].mxu1 }
 0x1db   :  { %v476_v54 = vadd.f32 %v475_v52, %v2290_v48  ;;  %v1828_v55 = vpop.f32.mrb[2].mxu1 }
 0x1dc   :  { %v556_v56 = vmul.f32 0.2, %v484_v51  ;;  %v487_v57 = vadd.f32 %v1828_v55, %v2290_v48  ;;  %v478_v58 = vpop.f32.mrb[3].mxu1  ;;  %vm540_vm1 = vcmp.gt.f32.partialorder %v484_v51, 0.0 }
 0x1dd   :  { %v554_v59 = vmul.f32 0.2, %v476_v54  ;;  %v479_v60 = vadd.f32 %v478_v58, %v2290_v48  ;;  %vm538_vm2 = vcmp.gt.f32.partialorder %v476_v54, 0.0 }
 0x1de   :  { %vm541_vm3 = vcmp.gt.f32.partialorder %v487_v57, 0.0  ;;  %v557_v61 = vmul.f32 0.2, %v487_v57  ;;  %v572_v63 = vsel %vm540_vm1, %v484_v51, %v556_v56 }
 0x1df   :  { %vm539_vm4 = vcmp.gt.f32.partialorder %v479_v60, 0.0  ;;  %v555_v62 = vmul.f32 0.2, %v479_v60  ;;  %v570_v3 = vsel %vm538_vm2, %v476_v54, %v554_v59 }
 0x1e0   :  { %v573_v0 = vsel %vm541_vm3, %v487_v57, %v557_v61 }
 0x1e1   :  { %v587_v1 = vpack.c.bf16 %v573_v0, %v572_v63  ;;  %v1831_v2 = vpop.f32.mrb[4].mxu1  ;;  %v571_v4 = vsel %vm539_vm4, %v479_v60, %v555_v62 }
 0x1e2   :  { %v500_v5 = vadd.f32 %v1831_v2, %v2290_v48  ;;  %v491_v7 = vpop.f32.mrb[5].mxu1  ;;  %v586_v8 = vpack.c.bf16 %v571_v4, %v570_v3 }
 0x1e3   :  { %v492_v10 = vadd.f32 %v491_v7, %v2290_v48  ;;  %v1832_v11 = vpop.f32.mrb[6].mxu1 }
 0x1e4   :  { %v560_v13 = vmul.f32 0.2, %v500_v5  ;;  %v503_v14 = vadd.f32 %v1832_v11, %v2290_v48  ;;  %v494_v15 = vpop.f32.mrb[7].mxu1  ;;  %1857 = vmatprep.mubr.bf16.mxu1 %v586_v8  ;;  %vm544_vm5 = vcmp.gt.f32.partialorder %v500_v5, 0.0 }
 0x1e5   :  { %v558_v16 = vmul.f32 0.2, %v492_v10  ;;  %v495_v17 = vadd.f32 %v494_v15, %v2290_v48  ;;  %1858 = vmatmul.mubr.bf16.vlgmr.msra.gmra.mrb[16].mxu1 %v587_v1  ;;  %vm542_vm6 = vcmp.gt.f32.partialorder %v492_v10, 0.0 }
 0x1e6   :  { %vm545_vm7 = vcmp.gt.f32.partialorder %v503_v14, 0.0  ;;  %v561_v18 = vmul.f32 0.2, %v503_v14  ;;  %1906 = vmatpush3.bf16.msra.mxu1 %v2258_v37  ;;  %v576_v21 = vsel %vm544_vm5, %v500_v5, %v560_v13 }
 0x1e7   :  { %vm543_vm8 = vcmp.gt.f32.partialorder %v495_v17, 0.0  ;;  %v559_v19 = vmul.f32 0.2, %v495_v17  ;;  %1907 = vmatprep.subr.bf16.mxu1 %v2039_v12  ;;  %v574_v24 = vsel %vm542_vm6, %v492_v10, %v558_v16 }
 0x1e8   :  { %v577_v22 = vsel %vm545_vm7, %v503_v14, %v561_v18 }
 0x1e9   :  { %v1835_v23 = vpop.f32.mrb[8].mxu1  ;;  %v575_v26 = vsel %vm543_vm8, %v495_v17, %v559_v19  ;;  %v589_v28 = vpack.c.bf16 %v577_v22, %v576_v21 }
 0x1ea   :  { %v516_v29 = vadd.f32 %v1835_v23, %v2290_v48  ;;  %v507_v30 = vpop.f32.mrb[9].mxu1  ;;  %v588_v31 = vpack.c.bf16 %v575_v26, %v574_v24  ;;  %1908 = vmatpush3.bf16.msra.mxu1 %v2039_v12 }
 0x1eb   :  { %v508_v33 = vadd.f32 %v507_v30, %v2290_v48  ;;  %v1836_v35 = vpop.f32.mrb[10].mxu1  ;;  %1909 = vmatprep.subr.bf16.mxu1 %v2040_v20 }
 0x1ec   :  { %v564_v37 = vmul.f32 0.2, %v516_v29  ;;  %v519_v38 = vadd.f32 %v1836_v35, %v2290_v48  ;;  %v510_v39 = vpop.f32.mrb[11].mxu1  ;;  %1861 = vmatprep.mubr.bf16.mxu1 %v588_v31  ;;  %vm548_vm9 = vcmp.gt.f32.partialorder %v516_v29, 0.0  ;;  %v2051_v35 = vld [vmem:[%s2563_s3 + $0x48] sm:$0xff]  }
 0x1ed   :  { %v562_v40 = vmul.f32 0.2, %v508_v33  ;;  %v511_v41 = vadd.f32 %v510_v39, %v2290_v48  ;;  %1862 = vmatmul.mubr.bf16.gmra.mrb[20].mxu1 %v589_v28  ;;  %vm546_vm10 = vcmp.gt.f32.partialorder %v508_v33, 0.0 }
 0x1ee   :  { %vm549_vm11 = vcmp.gt.f32.partialorder %v519_v38, 0.0  ;;  %v565_v42 = vmul.f32 0.2, %v519_v38  ;;  %1910 = vmatpush3.bf16.msra.mxu1 %v2040_v20  ;;  %v580_v44 = vsel %vm548_vm9, %v516_v29, %v564_v37 }
 0x1ef   :  { %vm547_vm12 = vcmp.gt.f32.partialorder %v511_v41, 0.0  ;;  %v563_v43 = vmul.f32 0.2, %v511_v41  ;;  %1911 = vmatprep.subr.bf16.mxu1 %v2041_v36  ;;  %v578_v52 = vsel %vm546_vm10, %v508_v33, %v562_v40 }
 0x1f0   :  { %v581_v49 = vsel %vm549_vm11, %v519_v38, %v565_v42 }
 0x1f1   :  { %v1839_v51 = vpop.f32.mrb[12].mxu1  ;;  %v579_v54 = vsel %vm547_vm12, %v511_v41, %v563_v43  ;;  %v591_v55 = vpack.c.bf16 %v581_v49, %v580_v44  ;;  %v2052_v43 = vld [vmem:[%s2563_s3 + $0x50] sm:$0xff]  }
 0x1f2   :  { %v532_v56 = vadd.f32 %v1839_v51, %v2290_v48  ;;  %v523_v57 = vpop.f32.mrb[13].mxu1  ;;  %v590_v58 = vpack.c.bf16 %v579_v54, %v578_v52  ;;  %1912 = vmatpush3.bf16.msra.mxu1 %v2041_v36 }
 0x1f3   :  { %v524_v59 = vadd.f32 %v523_v57, %v2290_v48  ;;  %v1840_v60 = vpop.f32.mrb[14].mxu1 }
 0x1f4   :  { %v568_v61 = vmul.f32 0.2, %v532_v56  ;;  %v535_v62 = vadd.f32 %v1840_v60, %v2290_v48  ;;  %v526_v63 = vpop.f32.mrb[15].mxu1  ;;  %1865 = vmatprep.mubr.bf16.mxu1 %v590_v58  ;;  %vm552_vm13 = vcmp.gt.f32.partialorder %v532_v56, 0.0 }
 0x1f5   :  { %v566_v0 = vmul.f32 0.2, %v524_v59  ;;  %v527_v1 = vadd.f32 %v526_v63, %v2290_v48  ;;  %1866 = vmatmul.mubr.bf16.gmra.mrb[24].mxu1 %v591_v55  ;;  %vm550_vm14 = vcmp.gt.f32.partialorder %v524_v59, 0.0 }
 0x1f6   :  { %vm553_vm15 = vcmp.gt.f32.partialorder %v535_v62, 0.0  ;;  %v569_v2 = vmul.f32 0.2, %v535_v62  ;;  %v584_v4 = vsel %vm552_vm13, %v532_v56, %v568_v61  ;;  %v2053_v61 = vld [vmem:[%s2563_s3 + $0x58] sm:$0xff]  }
 0x1f7   :  { %vm551_vm1 = vcmp.gt.f32.partialorder %v527_v1, 0.0  ;;  %v567_v3 = vmul.f32 0.2, %v527_v1  ;;  %v582_v7 = vsel %vm550_vm14, %v524_v59, %v566_v0 }
 0x1f8   :  { %v585_v5 = vsel %vm553_vm15, %v535_v62, %v569_v2 }
 0x1f9   :  { %v583_v8 = vsel %vm551_vm1, %v527_v1, %v567_v3  ;;  %v593_v10 = vpack.c.bf16 %v585_v5, %v584_v4  ;;  %v2054_v5 = vld [vmem:[%s2563_s3 + $0x60] sm:$0xff]  }
 0x1fa   :  { %v592_v11 = vpack.c.bf16 %v583_v8, %v582_v7 }
 0x1fc   :  { %1869 = vmatprep.mubr.bf16.mxu1 %v592_v11 }
 0x1fd   :  { %1870 = vmatmul.mubr.bf16.gmra.mrb[28].mxu1 %v593_v10 }
 0x1fe   :  { %1913 = vmatprep.mubr.msk.bf16.mxu1 %vm30_vm0, %v2194_v50  ;;  %v2048_v50 = vld [vmem:[%s2564_s4 + $0x30] sm:$0xff]  }
 0x1ff   :  { %1885 = vmatprep.subr.bf16.mxu0 %v2048_v50 }
 0x200   :  { %1886 = vmatpush3.bf16.msra.mxu0 %v2048_v50 }
 0x205   :  { %1914 = vmatmul.mubr.msk.bf16.vlgmr.msra.gmra.mrb[32].mxu1 %vm30_vm0, %v2196_v53  ;;  %v2049_v53 = vld [vmem:[%s2564_s4 + $0x38] sm:$0xff]  }
 0x206   :  { %1917 = vmatprep.mubr.msk.bf16.mxu1 %vm30_vm0, %v2212_v6  ;;  %1887 = vmatprep.subr.bf16.mxu0 %v2049_v53  ;;  %v2050_v6 = vld [vmem:[%s2563_s3 + $0x40] sm:$0xff]  }
 0x207   :  { %1888 = vmatpush3.bf16.msra.mxu0 %v2049_v53 }
 0x208   :  { %1929 = vmatprep.subr.bf16.mxu0 %v2050_v6 }
 0x20d   :  { %1918 = vmatmul.mubr.msk.bf16.gmra.mrb[36].mxu1 %vm30_vm0, %v2214_v9  ;;  %v596_v9 = vsub.s32 1, %v2279_v45 }
 0x20e   :  { %1921 = vmatprep.mubr.msk.bf16.mxu1 %vm30_vm0, %v2230_v25 }
 0x20f   :  { %v2347_v25 = vrot.slane %v2285_v47, %v596_v9 }
 0x215   :  { %1922 = vmatmul.mubr.msk.bf16.gmra.mrb[40].mxu1 %vm30_vm0, %v2232_v27 }
 0x216   :  { %1925 = vmatprep.mubr.msk.bf16.mxu1 %vm30_vm0, %v2241_v32 }
 0x21d   :  { %1926 = vmatmul.mubr.msk.bf16.gmra.mrb[44].mxu1 %vm30_vm0, %v2243_v34 }
 0x2b8   :  { %v1859_v27 = vpop.f32.mrb[16].mxu1 }
 0x2b9   :  { %v689_v32 = vadd.f32 %v1859_v27, %v2347_v25  ;;  %v680_v34 = vpop.f32.mrb[17].mxu1 }
 0x2ba   :  { %v681_v48 = vadd.f32 %v680_v34, %v2347_v25  ;;  %v1860_v12 = vpop.f32.mrb[18].mxu1 }
 0x2bb   :  { %v761_v13 = vmul.f32 0.2, %v689_v32  ;;  %v692_v14 = vadd.f32 %v1860_v12, %v2347_v25  ;;  %v683_v15 = vpop.f32.mrb[19].mxu1  ;;  %vm745_vm0 = vcmp.gt.f32.partialorder %v689_v32, 0.0  ;;  %v2055_v12 = vld [vmem:[%s2563_s3 + $0x68] sm:$0xff]  }
 0x2bc   :  { %v759_v16 = vmul.f32 0.2, %v681_v48  ;;  %v684_v17 = vadd.f32 %v683_v15, %v2347_v25  ;;  %vm743_vm2 = vcmp.gt.f32.partialorder %v681_v48, 0.0 }
 0x2bd   :  { %vm746_vm3 = vcmp.gt.f32.partialorder %v692_v14, 0.0  ;;  %v762_v18 = vmul.f32 0.2, %v692_v14  ;;  %v777_v20 = vsel %vm745_vm0, %v689_v32, %v761_v13  ;;  %v2381_v13 = vld [vmem:[%s2565_s5 + $0x4] sm:$0x7] }
 0x2be   :  { %vm744_vm4 = vcmp.gt.f32.partialorder %v684_v17, 0.0  ;;  %v760_v19 = vmul.f32 0.2, %v684_v17  ;;  %v775_v24 = vsel %vm743_vm2, %v681_v48, %v759_v16 }
 0x2bf   :  { %v778_v21 = vsel %vm746_vm3, %v692_v14, %v762_v18 }
 0x2c0   :  { %v792_v22 = vpack.c.bf16 %v778_v21, %v777_v20  ;;  %v1863_v23 = vpop.f32.mrb[20].mxu1  ;;  %v776_v26 = vsel %vm744_vm4, %v684_v17, %v760_v19  ;;  %v2388_v20 = vrot.slane %v2381_v13, %v391_v46 }
 0x2c1   :  { %v705_v28 = vadd.f32 %v1863_v23, %v2347_v25  ;;  %v696_v29 = vpop.f32.mrb[21].mxu1  ;;  %v791_v30 = vpack.c.bf16 %v776_v26, %v775_v24 }
 0x2c2   :  { %v697_v31 = vadd.f32 %v696_v29, %v2347_v25  ;;  %v1864_v33 = vpop.f32.mrb[22].mxu1 }
 0x2c3   :  { %v765_v36 = vmul.f32 0.2, %v705_v28  ;;  %v708_v37 = vadd.f32 %v1864_v33, %v2347_v25  ;;  %v699_v38 = vpop.f32.mrb[23].mxu1  ;;  %1889 = vmatprep.mubr.bf16.mxu0 %v791_v30  ;;  %vm749_vm5 = vcmp.gt.f32.partialorder %v705_v28, 0.0 }
 0x2c4   :  { %v763_v39 = vmul.f32 0.2, %v697_v31  ;;  %v700_v40 = vadd.f32 %v699_v38, %v2347_v25  ;;  %1890 = vmatmul.mubr.bf16.vlgmr.msra.gmra.mrb[16].mxu0 %v792_v22  ;;  %vm747_vm6 = vcmp.gt.f32.partialorder %v697_v31, 0.0  ;;  %v2056_v22 = vld [vmem:[%s2563_s3 + $0x70] sm:$0xff]  }
 0x2c5   :  { %vm750_vm7 = vcmp.gt.f32.partialorder %v708_v37, 0.0  ;;  %v766_v41 = vmul.f32 0.2, %v708_v37  ;;  %1930 = vmatpush3.bf16.msra.mxu0 %v2050_v6  ;;  %v781_v44 = vsel %vm749_vm5, %v705_v28, %v765_v36  ;;  %v2057_v36 = vld [vmem:[%s2563_s3 + $0x78] sm:$0xff]  }
 0x2c6   :  { %vm748_vm8 = vcmp.gt.f32.partialorder %v700_v40, 0.0  ;;  %v764_v42 = vmul.f32 0.2, %v700_v40  ;;  %1931 = vmatprep.subr.bf16.mxu0 %v2051_v35  ;;  %v779_v52 = vsel %vm747_vm6, %v697_v31, %v763_v39 }
 0x2c7   :  { %v782_v49 = vsel %vm750_vm7, %v708_v37, %v766_v41 }
 0x2c8   :  { %v1867_v51 = vpop.f32.mrb[24].mxu1  ;;  %v780_v54 = vsel %vm748_vm8, %v700_v40, %v764_v42  ;;  %v794_v55 = vpack.c.bf16 %v782_v49, %v781_v44 }
 0x2c9   :  { %v721_v56 = vadd.f32 %v1867_v51, %v2347_v25  ;;  %1932 = vmatpush3.bf16.msra.mxu0 %v2051_v35  ;;  %v712_v57 = vpop.f32.mrb[25].mxu1  ;;  %v793_v58 = vpack.c.bf16 %v780_v54, %v779_v52 }
 0x2ca   :  { %v713_v59 = vadd.f32 %v712_v57, %v2347_v25  ;;  %v1868_v60 = vpop.f32.mrb[26].mxu1  ;;  %1933 = vmatprep.subr.bf16.mxu0 %v2052_v43 }
 0x2cb   :  { %v769_v62 = vmul.f32 0.2, %v721_v56  ;;  %v724_v63 = vadd.f32 %v1868_v60, %v2347_v25  ;;  %v715_v0 = vpop.f32.mrb[27].mxu1  ;;  %1893 = vmatprep.mubr.bf16.mxu0 %v793_v58  ;;  %vm753_vm9 = vcmp.gt.f32.partialorder %v721_v56, 0.0 }
 0x2cc   :  { %v767_v1 = vmul.f32 0.2, %v713_v59  ;;  %v716_v2 = vadd.f32 %v715_v0, %v2347_v25  ;;  %1894 = vmatmul.mubr.bf16.gmra.mrb[20].mxu0 %v794_v55  ;;  %vm751_vm10 = vcmp.gt.f32.partialorder %v713_v59, 0.0 }
 0x2cd   :  { %vm754_vm11 = vcmp.gt.f32.partialorder %v724_v63, 0.0  ;;  %v770_v3 = vmul.f32 0.2, %v724_v63  ;;  %1934 = vmatpush3.bf16.msra.mxu0 %v2052_v43  ;;  %v785_v7 = vsel %vm753_vm9, %v721_v56, %v769_v62 }
 0x2ce   :  { %vm752_vm12 = vcmp.gt.f32.partialorder %v716_v2, 0.0  ;;  %v768_v4 = vmul.f32 0.2, %v716_v2  ;;  %1935 = vmatprep.subr.bf16.mxu0 %v2053_v61  ;;  %v783_v11 = vsel %vm751_vm10, %v713_v59, %v767_v1 }
 0x2cf   :  { %v786_v8 = vsel %vm754_vm11, %v724_v63, %v770_v3 }
 0x2d0   :  { %v1871_v10 = vpop.f32.mrb[28].mxu1  ;;  %v784_v50 = vsel %vm752_vm12, %v716_v2, %v768_v4  ;;  %v796_v53 = vpack.c.bf16 %v786_v8, %v785_v7 }
 0x2d1   :  { %v737_v6 = vadd.f32 %v1871_v10, %v2347_v25  ;;  %1936 = vmatpush3.bf16.msra.mxu0 %v2053_v61  ;;  %v728_v27 = vpop.f32.mrb[29].mxu1  ;;  %v795_v32 = vpack.c.bf16 %v784_v50, %v783_v11 }
 0x2d2   :  { %v729_v34 = vadd.f32 %v728_v27, %v2347_v25  ;;  %v1872_v48 = vpop.f32.mrb[30].mxu1  ;;  %1937 = vmatprep.subr.bf16.mxu0 %v2054_v5 }
 0x2d3   :  { %v773_v14 = vmul.f32 0.2, %v737_v6  ;;  %v740_v15 = vadd.f32 %v1872_v48, %v2347_v25  ;;  %v731_v16 = vpop.f32.mrb[31].mxu1  ;;  %1897 = vmatprep.mubr.bf16.mxu0 %v795_v32  ;;  %vm757_vm13 = vcmp.gt.f32.partialorder %v737_v6, 0.0 }
 0x2d4   :  { %v771_v17 = vmul.f32 0.2, %v729_v34  ;;  %v732_v18 = vadd.f32 %v731_v16, %v2347_v25  ;;  %1898 = vmatmul.mubr.bf16.gmra.mrb[24].mxu0 %v796_v53  ;;  %vm755_vm14 = vcmp.gt.f32.partialorder %v729_v34, 0.0 }
 0x2d5   :  { %vm758_vm15 = vcmp.gt.f32.partialorder %v740_v15, 0.0  ;;  %v774_v19 = vmul.f32 0.2, %v740_v15  ;;  %1938 = vmatpush3.bf16.msra.mxu0 %v2054_v5  ;;  %v789_v23 = vsel %vm757_vm13, %v737_v6, %v773_v14 }
 0x2d6   :  { %vm756_vm1 = vcmp.gt.f32.partialorder %v732_v18, 0.0  ;;  %v772_v21 = vmul.f32 0.2, %v732_v18  ;;  %1939 = vmatprep.subr.bf16.mxu0 %v2055_v12  ;;  %v787_v26 = vsel %vm755_vm14, %v729_v34, %v771_v17 }
 0x2d7   :  { %v790_v24 = vsel %vm758_vm15, %v740_v15, %v774_v19 }
 0x2d8   :  { %v1915_v25 = vpop.f32.mrb[32].mxu1  ;;  %v788_v28 = vsel %vm756_vm1, %v732_v18, %v772_v21  ;;  %v798_v29 = vpack.c.bf16 %v790_v24, %v789_v23 }
 0x2d9   :  { %v1080_v30 = vadd.f32 %v1915_v25, %v2388_v20  ;;  %1940 = vmatpush3.bf16.msra.mxu0 %v2055_v12  ;;  %v1071_v31 = vpop.f32.mrb[33].mxu1  ;;  %v797_v33 = vpack.c.bf16 %v788_v28, %v787_v26 }
 0x2da   :  { %v1072_v46 = vadd.f32 %v1071_v31, %v2388_v20  ;;  %v1916_v35 = vpop.f32.mrb[34].mxu1  ;;  %1941 = vmatprep.subr.bf16.mxu0 %v2056_v22 }
 0x2db   :  { %v1152_v37 = vmul.f32 0.2, %v1080_v30  ;;  %v1083_v38 = vadd.f32 %v1916_v35, %v2388_v20  ;;  %1901 = vmatprep.mubr.bf16.mxu0 %v797_v33  ;;  %v1074_v39 = vpop.f32.mrb[35].mxu1  ;;  %vm1136_vm0 = vcmp.gt.f32.partialorder %v1080_v30, 0.0 }
 0x2dc   :  { %v1150_v40 = vmul.f32 0.2, %v1072_v46  ;;  %v1075_v41 = vadd.f32 %v1074_v39, %v2388_v20  ;;  %1902 = vmatmul.mubr.bf16.gmra.mrb[28].mxu0 %v798_v29  ;;  %vm1134_vm2 = vcmp.gt.f32.partialorder %v1072_v46, 0.0 }
 0x2dd   :  { %vm1137_vm3 = vcmp.gt.f32.partialorder %v1083_v38, 0.0  ;;  %v1153_v42 = vmul.f32 0.2, %v1083_v38  ;;  %1942 = vmatpush3.bf16.msra.mxu0 %v2056_v22  ;;  %v1168_v44 = vsel %vm1136_vm0, %v1080_v30, %v1152_v37 }
 0x2de   :  { %vm1135_vm4 = vcmp.gt.f32.partialorder %v1075_v41, 0.0  ;;  %v1151_v43 = vmul.f32 0.2, %v1075_v41  ;;  %1943 = vmatprep.subr.bf16.mxu0 %v2057_v36  ;;  %v1166_v54 = vsel %vm1134_vm2, %v1072_v46, %v1150_v40 }
 0x2df   :  { %v1169_v49 = vsel %vm1137_vm3, %v1083_v38, %v1153_v42 }
 0x2e0   :  { %v1183_v51 = vpack.c.bf16 %v1169_v49, %v1168_v44  ;;  %v1919_v52 = vpop.f32.mrb[36].mxu1  ;;  %v1167_v55 = vsel %vm1135_vm4, %v1075_v41, %v1151_v43  ;;  %v2058_v49 = vld [vmem:[%s2564_s4 + $0x40] sm:$0xff]  }
 0x2e1   :  { %v1096_v56 = vadd.f32 %v1919_v52, %v2388_v20  ;;  %1944 = vmatpush3.bf16.msra.mxu0 %v2057_v36  ;;  %v1087_v57 = vpop.f32.mrb[37].mxu1  ;;  %v1182_v58 = vpack.c.bf16 %v1167_v55, %v1166_v54  ;;  %1993 = vmatprep.subr.bf16.mxu1 %v2058_v49  ;;  %v2061_v52 = vld [vmem:[%s2564_s4 + $0x58] sm:$0xff]   ;;  %v2062_v54 = vld [vmem:[%s2564_s4 + $0x60] sm:$0xff]   ;;  %v2063_v55 = vld [vmem:[%s2564_s4 + $0x68] sm:$0xff]  }
 0x2e2   :  { %v1088_v59 = vadd.f32 %v1087_v57, %v2388_v20  ;;  %v1920_v60 = vpop.f32.mrb[38].mxu1  ;;  %1961 = vmatprep.subr.bf16.mxu0 %v2058_v49  ;;  %2001 = vmatpush3.bf16.msra.mxu1 %v2058_v49  ;;  %v2065_v57 = vld [vmem:[%s2564_s4 + $0x78] sm:$0xff]  }
 0x2e3   :  { %v1156_v61 = vmul.f32 0.2, %v1096_v56  ;;  %v1099_v62 = vadd.f32 %v1920_v60, %v2388_v20  ;;  %v1090_v63 = vpop.f32.mrb[39].mxu1  ;;  %1945 = vmatprep.mubr.bf16.mxu0 %v1182_v58  ;;  %vm1140_vm5 = vcmp.gt.f32.partialorder %v1096_v56, 0.0  ;;  %v801_v58 = vsub.s32 2, %v2279_v45 }
 0x2e4   :  { %v1154_v0 = vmul.f32 0.2, %v1088_v59  ;;  %v1091_v1 = vadd.f32 %v1090_v63, %v2388_v20  ;;  %1946 = vmatmul.mubr.bf16.vlgmr.msra.gmra.mrb[32].mxu0 %v1183_v51  ;;  %vm1138_vm6 = vcmp.gt.f32.partialorder %v1088_v59, 0.0  ;;  %v2060_v51 = vld [vmem:[%s2564_s4 + $0x50] sm:$0xff]  }
 0x2e5   :  { %vm1141_vm7 = vcmp.gt.f32.partialorder %v1099_v62, 0.0  ;;  %v1157_v2 = vmul.f32 0.2, %v1099_v62  ;;  %v1172_v4 = vsel %vm1140_vm5, %v1096_v56, %v1156_v61  ;;  %1962 = vmatpush3.bf16.msra.mxu0 %v2058_v49  ;;  %v2064_v56 = vld [vmem:[%s2564_s4 + $0x70] sm:$0xff]  }
 0x2e6   :  { %vm1139_vm8 = vcmp.gt.f32.partialorder %v1091_v1, 0.0  ;;  %v1155_v3 = vmul.f32 0.2, %v1091_v1  ;;  %v1170_v8 = vsel %vm1138_vm6, %v1088_v59, %v1154_v0  ;;  %v802_v59 = vrot.slane %v2285_v47, %v801_v58 }
 0x2e7   :  { %v1173_v5 = vsel %vm1141_vm7, %v1099_v62, %v1157_v2 }
 0x2e8   :  { %v1923_v7 = vpop.f32.mrb[40].mxu1  ;;  %v1171_v10 = vsel %vm1139_vm8, %v1091_v1, %v1155_v3  ;;  %v1185_v11 = vpack.c.bf16 %v1173_v5, %v1172_v4 }
 0x2e9   :  { %v1112_v50 = vadd.f32 %v1923_v7, %v2388_v20  ;;  %v1103_v53 = vpop.f32.mrb[41].mxu1  ;;  %v1184_v6 = vpack.c.bf16 %v1171_v10, %v1170_v8 }
 0x2ea   :  { %v1104_v27 = vadd.f32 %v1103_v53, %v2388_v20  ;;  %v1924_v32 = vpop.f32.mrb[42].mxu1 }
 0x2eb   :  { %v1160_v34 = vmul.f32 0.2, %v1112_v50  ;;  %v1115_v48 = vadd.f32 %v1924_v32, %v2388_v20  ;;  %v1106_v12 = vpop.f32.mrb[43].mxu1  ;;  %1949 = vmatprep.mubr.bf16.mxu0 %v1184_v6  ;;  %vm1144_vm9 = vcmp.gt.f32.partialorder %v1112_v50, 0.0 }
 0x2ec   :  { %v1158_v14 = vmul.f32 0.2, %v1104_v27  ;;  %v1107_v15 = vadd.f32 %v1106_v12, %v2388_v20  ;;  %1950 = vmatmul.mubr.bf16.gmra.mrb[36].mxu0 %v1185_v11  ;;  %vm1142_vm10 = vcmp.gt.f32.partialorder %v1104_v27, 0.0 }
 0x2ed   :  { %vm1145_vm11 = vcmp.gt.f32.partialorder %v1115_v48, 0.0  ;;  %v1161_v16 = vmul.f32 0.2, %v1115_v48  ;;  %v1176_v18 = vsel %vm1144_vm9, %v1112_v50, %v1160_v34 }
 0x2ee   :  { %vm1143_vm12 = vcmp.gt.f32.partialorder %v1107_v15, 0.0  ;;  %v1159_v17 = vmul.f32 0.2, %v1107_v15  ;;  %v1174_v22 = vsel %vm1142_vm10, %v1104_v27, %v1158_v14 }
 0x2ef   :  { %v1177_v19 = vsel %vm1145_vm11, %v1115_v48, %v1161_v16 }
 0x2f0   :  { %v1927_v21 = vpop.f32.mrb[44].mxu1  ;;  %v1175_v23 = vsel %vm1143_vm12, %v1107_v15, %v1159_v17  ;;  %v1187_v24 = vpack.c.bf16 %v1177_v19, %v1176_v18 }
 0x2f1   :  { %v1128_v25 = vadd.f32 %v1927_v21, %v2388_v20  ;;  %v1119_v26 = vpop.f32.mrb[45].mxu1  ;;  %v1186_v28 = vpack.c.bf16 %v1175_v23, %v1174_v22 }
 0x2f2   :  { %v1120_v29 = vadd.f32 %v1119_v26, %v2388_v20  ;;  %v1928_v30 = vpop.f32.mrb[46].mxu1 }
 0x2f3   :  { %v1164_v31 = vmul.f32 0.2, %v1128_v25  ;;  %v1131_v33 = vadd.f32 %v1928_v30, %v2388_v20  ;;  %v1122_v46 = vpop.f32.mrb[47].mxu1  ;;  %1953 = vmatprep.mubr.bf16.mxu0 %v1186_v28  ;;  %vm1148_vm13 = vcmp.gt.f32.partialorder %v1128_v25, 0.0 }
 0x2f4   :  { %v1162_v35 = vmul.f32 0.2, %v1120_v29  ;;  %v1123_v36 = vadd.f32 %v1122_v46, %v2388_v20  ;;  %1954 = vmatmul.mubr.bf16.gmra.mrb[40].mxu0 %v1187_v24  ;;  %vm1146_vm14 = vcmp.gt.f32.partialorder %v1120_v29, 0.0  ;;  %v2059_v20 = vld [vmem:[%s2564_s4 + $0x48] sm:$0xff]   ;;  %v2488_v24 = vrot.slane %v2381_v13, %v596_v9 }
 0x2f5   :  { %vm1149_vm15 = vcmp.gt.f32.partialorder %v1131_v33, 0.0  ;;  %v1165_v37 = vmul.f32 0.2, %v1131_v33  ;;  %v1180_v39 = vsel %vm1148_vm13, %v1128_v25, %v1164_v31  ;;  %1963 = vmatprep.subr.bf16.mxu0 %v2059_v20  ;;  %1994 = vmatprep.subr.bf16.mxu1 %v2059_v20 }
 0x2f6   :  { %vm1147_vm1 = vcmp.gt.f32.partialorder %v1123_v36, 0.0  ;;  %v1163_v38 = vmul.f32 0.2, %v1123_v36  ;;  %v1178_v41 = vsel %vm1146_vm14, %v1120_v29, %v1162_v35  ;;  %1964 = vmatpush3.bf16.msra.mxu0 %v2059_v20  ;;  %2002 = vmatpush3.bf16.msra.mxu1 %v2059_v20 }
 0x2f7   :  { %v1181_v40 = vsel %vm1149_vm15, %v1131_v33, %v1165_v37  ;;  %1965 = vmatprep.subr.bf16.mxu0 %v2060_v51  ;;  %1995 = vmatprep.subr.bf16.mxu1 %v2060_v51 }
 0x2f8   :  { %v1179_v42 = vsel %vm1147_vm1, %v1123_v36, %v1163_v38  ;;  %v1189_v43 = vpack.c.bf16 %v1181_v40, %v1180_v39 }
 0x2f9   :  { %v1188_v44 = vpack.c.bf16 %v1179_v42, %v1178_v41 }
 0x2fa   :  { %1966 = vmatpush3.bf16.msra.mxu0 %v2060_v51  ;;  %2003 = vmatpush3.bf16.msra.mxu1 %v2060_v51 }
 0x2fb   :  { %1957 = vmatprep.mubr.bf16.mxu0 %v1188_v44  ;;  %1967 = vmatprep.subr.bf16.mxu0 %v2061_v52 }
 0x2fc   :  { %1958 = vmatmul.mubr.bf16.gmra.mrb[44].mxu0 %v1189_v43  ;;  %1996 = vmatprep.subr.bf16.mxu1 %v2061_v52 }
 0x2fe   :  { %1968 = vmatpush3.bf16.msra.mxu0 %v2061_v52  ;;  %2004 = vmatpush3.bf16.msra.mxu1 %v2061_v52 }
 0x2ff   :  { %1969 = vmatprep.subr.bf16.mxu0 %v2062_v54  ;;  %1997 = vmatprep.subr.bf16.mxu1 %v2062_v54 }
 0x302   :  { %1970 = vmatpush3.bf16.msra.mxu0 %v2062_v54  ;;  %2005 = vmatpush3.bf16.msra.mxu1 %v2062_v54 }
 0x303   :  { %1971 = vmatprep.subr.bf16.mxu0 %v2063_v55  ;;  %1998 = vmatprep.subr.bf16.mxu1 %v2063_v55 }
 0x306   :  { %1972 = vmatpush3.bf16.msra.mxu0 %v2063_v55  ;;  %2006 = vmatpush3.bf16.msra.mxu1 %v2063_v55 }
 0x307   :  { %1973 = vmatprep.subr.bf16.mxu0 %v2064_v56  ;;  %1999 = vmatprep.subr.bf16.mxu1 %v2064_v56 }
 0x30a   :  { %1974 = vmatpush3.bf16.msra.mxu0 %v2064_v56  ;;  %2007 = vmatpush3.bf16.msra.mxu1 %v2064_v56 }
 0x30b   :  { %1975 = vmatprep.subr.bf16.mxu0 %v2065_v57  ;;  %2000 = vmatprep.subr.bf16.mxu1 %v2065_v57 }
 0x30e   :  { %1976 = vmatpush3.bf16.msra.mxu0 %v2065_v57  ;;  %2008 = vmatpush3.bf16.msra.mxu1 %v2065_v57 }
 0x397   :  { %v1891_v60 = vpop.f32.mrb[16].mxu0 }
 0x398   :  { %v894_v61 = vadd.f32 %v1891_v60, %v802_v59  ;;  %v885_v62 = vpop.f32.mrb[17].mxu0 }
 0x399   :  { %v886_v63 = vadd.f32 %v885_v62, %v802_v59  ;;  %v1892_v0 = vpop.f32.mrb[18].mxu0 }
 0x39a   :  { %950 = vst [vmem:[%s2566_s6 + $0x10] sm:$0xff] %v894_v61  ;;  %v897_v1 = vadd.f32 %v1892_v0, %v802_v59  ;;  %v888_v2 = vpop.f32.mrb[19].mxu0 }
 0x39b   :  { %948 = vst [vmem:[%s2566_s6] sm:$0xff] %v886_v63  ;;  %v889_v3 = vadd.f32 %v888_v2, %v802_v59 }
 0x39c   :  { %951 = vst [vmem:[%s2566_s6 + $0x18] sm:$0xff] %v897_v1 }
 0x39d   :  { %949 = vst [vmem:[%s2566_s6 + $0x8] sm:$0xff] %v889_v3 }
 0x39f   :  { %v1895_v47 = vpop.f32.mrb[20].mxu0 }
 0x3a0   :  { %v910_v4 = vadd.f32 %v1895_v47, %v802_v59  ;;  %v901_v5 = vpop.f32.mrb[21].mxu0 }
 0x3a1   :  { %v902_v7 = vadd.f32 %v901_v5, %v802_v59  ;;  %v1896_v8 = vpop.f32.mrb[22].mxu0 }
 0x3a2   :  { %954 = vst [vmem:[%s2566_s6 + $0x30] sm:$0xff] %v910_v4  ;;  %v913_v10 = vadd.f32 %v1896_v8, %v802_v59  ;;  %v904_v11 = vpop.f32.mrb[23].mxu0 }
 0x3a3   :  { %952 = vst [vmem:[%s2566_s6 + $0x20] sm:$0xff] %v902_v7  ;;  %v905_v50 = vadd.f32 %v904_v11, %v802_v59 }
 0x3a4   :  { %955 = vst [vmem:[%s2566_s6 + $0x38] sm:$0xff] %v913_v10 }
 0x3a5   :  { %953 = vst [vmem:[%s2566_s6 + $0x28] sm:$0xff] %v905_v50 }
 0x3a7   :  { %v1899_v53 = vpop.f32.mrb[24].mxu0 }
 0x3a8   :  { %v926_v6 = vadd.f32 %v1899_v53, %v802_v59  ;;  %v917_v27 = vpop.f32.mrb[25].mxu0 }
 0x3a9   :  { %v918_v32 = vadd.f32 %v917_v27, %v802_v59  ;;  %v1900_v34 = vpop.f32.mrb[26].mxu0 }
 0x3aa   :  { %958 = vst [vmem:[%s2566_s6 + $0x50] sm:$0xff] %v926_v6  ;;  %v929_v48 = vadd.f32 %v1900_v34, %v802_v59  ;;  %v920_v12 = vpop.f32.mrb[27].mxu0 }
 0x3ab   :  { %956 = vst [vmem:[%s2566_s6 + $0x40] sm:$0xff] %v918_v32  ;;  %v921_v14 = vadd.f32 %v920_v12, %v802_v59 }
 0x3ac   :  { %959 = vst [vmem:[%s2566_s6 + $0x58] sm:$0xff] %v929_v48 }
 0x3ad   :  { %957 = vst [vmem:[%s2566_s6 + $0x48] sm:$0xff] %v921_v14 }
 0x3af   :  { %v1903_v15 = vpop.f32.mrb[28].mxu0 }
 0x3b0   :  { %v942_v16 = vadd.f32 %v1903_v15, %v802_v59  ;;  %v933_v17 = vpop.f32.mrb[29].mxu0 }
 0x3b1   :  { %v934_v18 = vadd.f32 %v933_v17, %v802_v59  ;;  %v1904_v19 = vpop.f32.mrb[30].mxu0 }
 0x3b2   :  { %962 = vst [vmem:[%s2566_s6 + $0x70] sm:$0xff] %v942_v16  ;;  %v945_v21 = vadd.f32 %v1904_v19, %v802_v59  ;;  %v936_v22 = vpop.f32.mrb[31].mxu0 }
 0x3b3   :  { %960 = vst [vmem:[%s2566_s6 + $0x60] sm:$0xff] %v934_v18  ;;  %v937_v23 = vadd.f32 %v936_v22, %v802_v59 }
 0x3b4   :  { %963 = vst [vmem:[%s2566_s6 + $0x78] sm:$0xff] %v945_v21 }
 0x3b5   :  { %961 = vst [vmem:[%s2566_s6 + $0x68] sm:$0xff] %v937_v23 }
 0x3b7   :  { %v1947_v25 = vpop.f32.mrb[32].mxu0 }
 0x3b8   :  { %v1285_v26 = vadd.f32 %v1947_v25, %v2488_v24  ;;  %v1276_v28 = vpop.f32.mrb[33].mxu0 }
 0x3b9   :  { %v1277_v29 = vadd.f32 %v1276_v28, %v2488_v24  ;;  %v1948_v30 = vpop.f32.mrb[34].mxu0 }
 0x3ba   :  { %v1357_v31 = vmul.f32 0.2, %v1285_v26  ;;  %v1288_v33 = vadd.f32 %v1948_v30, %v2488_v24  ;;  %v1279_v46 = vpop.f32.mrb[35].mxu0  ;;  %vm1341_vm0 = vcmp.gt.f32.partialorder %v1285_v26, 0.0 }
 0x3bb   :  { %v1355_v35 = vmul.f32 0.2, %v1277_v29  ;;  %v1280_v9 = vadd.f32 %v1279_v46, %v2488_v24  ;;  %vm1339_vm2 = vcmp.gt.f32.partialorder %v1277_v29, 0.0 }
 0x3bc   :  { %vm1342_vm3 = vcmp.gt.f32.partialorder %v1288_v33, 0.0  ;;  %v1358_v36 = vmul.f32 0.2, %v1288_v33  ;;  %v1373_v38 = vsel %vm1341_vm0, %v1285_v26, %v1357_v31 }
 0x3bd   :  { %vm1340_vm4 = vcmp.gt.f32.partialorder %v1280_v9, 0.0  ;;  %v1356_v37 = vmul.f32 0.2, %v1280_v9  ;;  %v1371_v42 = vsel %vm1339_vm2, %v1277_v29, %v1355_v35 }
 0x3be   :  { %v1374_v39 = vsel %vm1342_vm3, %v1288_v33, %v1358_v36 }
 0x3bf   :  { %v1388_v40 = vpack.c.bf16 %v1374_v39, %v1373_v38  ;;  %v1951_v41 = vpop.f32.mrb[36].mxu0  ;;  %v1372_v43 = vsel %vm1340_vm4, %v1280_v9, %v1356_v37  ;;  %v1398_v38 = vrot.slane %v2381_v13, %v801_v58 }
 0x3c0   :  { %v1301_v44 = vadd.f32 %v1951_v41, %v2488_v24  ;;  %v1292_v49 = vpop.f32.mrb[37].mxu0  ;;  %v1387_v20 = vpack.c.bf16 %v1372_v43, %v1371_v42 }
 0x3c1   :  { %v1293_v51 = vadd.f32 %v1292_v49, %v2488_v24  ;;  %v1952_v52 = vpop.f32.mrb[38].mxu0 }
 0x3c2   :  { %v1361_v54 = vmul.f32 0.2, %v1301_v44  ;;  %v1304_v55 = vadd.f32 %v1952_v52, %v2488_v24  ;;  %v1295_v56 = vpop.f32.mrb[39].mxu0  ;;  %1977 = vmatprep.mubr.bf16.mxu0 %v1387_v20  ;;  %vm1345_vm5 = vcmp.gt.f32.partialorder %v1301_v44, 0.0 }
 0x3c3   :  { %v1359_v57 = vmul.f32 0.2, %v1293_v51  ;;  %v1296_v59 = vadd.f32 %v1295_v56, %v2488_v24  ;;  %1978 = vmatmul.mubr.bf16.vlgmr.msra.gmra.mrb[48].mxu0 %v1388_v40  ;;  %vm1343_vm6 = vcmp.gt.f32.partialorder %v1293_v51, 0.0 }
 0x3c4   :  { %vm1346_vm7 = vcmp.gt.f32.partialorder %v1304_v55, 0.0  ;;  %v1362_v60 = vmul.f32 0.2, %v1304_v55  ;;  %v1377_v62 = vsel %vm1345_vm5, %v1301_v44, %v1361_v54 }
 0x3c5   :  { %vm1344_vm8 = vcmp.gt.f32.partialorder %v1296_v59, 0.0  ;;  %v1360_v61 = vmul.f32 0.2, %v1296_v59  ;;  %v1375_v2 = vsel %vm1343_vm6, %v1293_v51, %v1359_v57 }
 0x3c6   :  { %v1378_v63 = vsel %vm1346_vm7, %v1304_v55, %v1362_v60 }
 0x3c7   :  { %v1390_v0 = vpack.c.bf16 %v1378_v63, %v1377_v62  ;;  %v1955_v1 = vpop.f32.mrb[40].mxu0  ;;  %v1376_v3 = vsel %vm1344_vm8, %v1296_v59, %v1360_v61 }
 0x3c8   :  { %v1317_v47 = vadd.f32 %v1955_v1, %v2488_v24  ;;  %v1308_v4 = vpop.f32.mrb[41].mxu0  ;;  %v1389_v5 = vpack.c.bf16 %v1376_v3, %v1375_v2 }
 0x3c9   :  { %v1309_v7 = vadd.f32 %v1308_v4, %v2488_v24  ;;  %v1956_v8 = vpop.f32.mrb[42].mxu0 }
 0x3ca   :  { %v1365_v10 = vmul.f32 0.2, %v1317_v47  ;;  %v1320_v11 = vadd.f32 %v1956_v8, %v2488_v24  ;;  %v1311_v50 = vpop.f32.mrb[43].mxu0  ;;  %1981 = vmatprep.mubr.bf16.mxu1 %v1389_v5  ;;  %vm1349_vm9 = vcmp.gt.f32.partialorder %v1317_v47, 0.0 }
 0x3cb   :  { %v1363_v53 = vmul.f32 0.2, %v1309_v7  ;;  %v1312_v6 = vadd.f32 %v1311_v50, %v2488_v24  ;;  %1982 = vmatmul.mubr.bf16.vlgmr.msra.gmra.mrb[48].mxu1 %v1390_v0  ;;  %vm1347_vm10 = vcmp.gt.f32.partialorder %v1309_v7, 0.0 }
 0x3cc   :  { %vm1350_vm11 = vcmp.gt.f32.partialorder %v1320_v11, 0.0  ;;  %v1366_v27 = vmul.f32 0.2, %v1320_v11  ;;  %v1381_v34 = vsel %vm1349_vm9, %v1317_v47, %v1365_v10 }
 0x3cd   :  { %vm1348_vm12 = vcmp.gt.f32.partialorder %v1312_v6, 0.0  ;;  %v1364_v32 = vmul.f32 0.2, %v1312_v6  ;;  %v1379_v14 = vsel %vm1347_vm10, %v1309_v7, %v1363_v53 }
 0x3ce   :  { %v1382_v48 = vsel %vm1350_vm11, %v1320_v11, %v1366_v27 }
 0x3cf   :  { %v1959_v12 = vpop.f32.mrb[44].mxu0  ;;  %v1380_v15 = vsel %vm1348_vm12, %v1312_v6, %v1364_v32  ;;  %v1392_v16 = vpack.c.bf16 %v1382_v48, %v1381_v34 }
 0x3d0   :  { %v1333_v17 = vadd.f32 %v1959_v12, %v2488_v24  ;;  %v1324_v18 = vpop.f32.mrb[45].mxu0  ;;  %v1391_v19 = vpack.c.bf16 %v1380_v15, %v1379_v14 }
 0x3d1   :  { %v1325_v21 = vadd.f32 %v1324_v18, %v2488_v24  ;;  %v1960_v22 = vpop.f32.mrb[46].mxu0 }
 0x3d2   :  { %v1369_v23 = vmul.f32 0.2, %v1333_v17  ;;  %v1336_v25 = vadd.f32 %v1960_v22, %v2488_v24  ;;  %v1327_v26 = vpop.f32.mrb[47].mxu0  ;;  %1985 = vmatprep.mubr.bf16.mxu1 %v1391_v19  ;;  %vm1353_vm13 = vcmp.gt.f32.partialorder %v1333_v17, 0.0 }
 0x3d3   :  { %v1367_v28 = vmul.f32 0.2, %v1325_v21  ;;  %v1328_v29 = vadd.f32 %v1327_v26, %v2488_v24  ;;  %1986 = vmatmul.mubr.bf16.gmra.mrb[52].mxu1 %v1392_v16  ;;  %vm1351_vm14 = vcmp.gt.f32.partialorder %v1325_v21, 0.0 }
 0x3d4   :  { %vm1354_vm15 = vcmp.gt.f32.partialorder %v1336_v25, 0.0  ;;  %v1370_v30 = vmul.f32 0.2, %v1336_v25  ;;  %v1385_v33 = vsel %vm1353_vm13, %v1333_v17, %v1369_v23 }
 0x3d5   :  { %vm1352_vm1 = vcmp.gt.f32.partialorder %v1328_v29, 0.0  ;;  %v1368_v31 = vmul.f32 0.2, %v1328_v29  ;;  %v1383_v35 = vsel %vm1351_vm14, %v1325_v21, %v1367_v28 }
 0x3d6   :  { %v1386_v46 = vsel %vm1354_vm15, %v1336_v25, %v1370_v30 }
 0x3d7   :  { %v1384_v9 = vsel %vm1352_vm1, %v1328_v29, %v1368_v31  ;;  %v1394_v36 = vpack.c.bf16 %v1386_v46, %v1385_v33 }
 0x3d8   :  { %v1393_v37 = vpack.c.bf16 %v1384_v9, %v1383_v35 }
 0x3da   :  { %1989 = vmatprep.mubr.bf16.mxu1 %v1393_v37 }
 0x3db   :  { %1990 = vmatmul.mubr.bf16.gmra.mrb[56].mxu1 %v1394_v36 }
 0x496   :  { %v1979_v39 = vpop.f32.mrb[48].mxu0 }
 0x497   :  { %v1490_v24 = vadd.f32 %v1979_v39, %v1398_v38  ;;  %v1481_v40 = vpop.f32.mrb[49].mxu0 }
 0x498   :  { %v1482_v41 = vadd.f32 %v1481_v40, %v1398_v38  ;;  %v1980_v42 = vpop.f32.mrb[50].mxu0 }
 0x499   :  { %1546 = vst [vmem:[%s2567_s7 + $0x10] sm:$0xff] %v1490_v24  ;;  %v1493_v43 = vadd.f32 %v1980_v42, %v1398_v38  ;;  %v1484_v44 = vpop.f32.mrb[51].mxu0 }
 0x49a   :  { %1544 = vst [vmem:[%s2567_s7] sm:$0xff] %v1482_v41  ;;  %v1485_v49 = vadd.f32 %v1484_v44, %v1398_v38 }
 0x49b   :  { %1547 = vst [vmem:[%s2567_s7 + $0x18] sm:$0xff] %v1493_v43 }
 0x49c   :  { %1545 = vst [vmem:[%s2567_s7 + $0x8] sm:$0xff] %v1485_v49 }
 0x49e   :  { %v1983_v45 = vpop.f32.mrb[48].mxu1 }
 0x49f   :  { %v1506_v13 = vadd.f32 %v1983_v45, %v1398_v38  ;;  %v1497_v58 = vpop.f32.mrb[49].mxu1 }
 0x4a0   :  { %v1498_v20 = vadd.f32 %v1497_v58, %v1398_v38  ;;  %v1984_v51 = vpop.f32.mrb[50].mxu1 }
 0x4a1   :  { %1550 = vst [vmem:[%s2567_s7 + $0x30] sm:$0xff] %v1506_v13  ;;  %v1509_v52 = vadd.f32 %v1984_v51, %v1398_v38  ;;  %v1500_v54 = vpop.f32.mrb[51].mxu1 }
 0x4a2   :  { %1548 = vst [vmem:[%s2567_s7 + $0x20] sm:$0xff] %v1498_v20  ;;  %v1501_v55 = vadd.f32 %v1500_v54, %v1398_v38 }
 0x4a3   :  { %1551 = vst [vmem:[%s2567_s7 + $0x38] sm:$0xff] %v1509_v52 }
 0x4a4   :  { %1549 = vst [vmem:[%s2567_s7 + $0x28] sm:$0xff] %v1501_v55 }
 0x4a6   :  { %v1987_v56 = vpop.f32.mrb[52].mxu1 }
 0x4a7   :  { %v1522_v57 = vadd.f32 %v1987_v56, %v1398_v38  ;;  %v1513_v59 = vpop.f32.mrb[53].mxu1 }
 0x4a8   :  { %v1514_v60 = vadd.f32 %v1513_v59, %v1398_v38  ;;  %v1988_v61 = vpop.f32.mrb[54].mxu1 }
 0x4a9   :  { %1554 = vst [vmem:[%s2567_s7 + $0x50] sm:$0xff] %v1522_v57  ;;  %v1525_v62 = vadd.f32 %v1988_v61, %v1398_v38  ;;  %v1516_v63 = vpop.f32.mrb[55].mxu1 }
 0x4aa   :  { %1552 = vst [vmem:[%s2567_s7 + $0x40] sm:$0xff] %v1514_v60  ;;  %v1517_v0 = vadd.f32 %v1516_v63, %v1398_v38 }
 0x4ab   :  { %1555 = vst [vmem:[%s2567_s7 + $0x58] sm:$0xff] %v1525_v62 }
 0x4ac   :  { %1553 = vst [vmem:[%s2567_s7 + $0x48] sm:$0xff] %v1517_v0 }
 0x4ae   :  { %v1991_v1 = vpop.f32.mrb[56].mxu1 }
 0x4af   :  { %v1538_v2 = vadd.f32 %v1991_v1, %v1398_v38  ;;  %v1529_v3 = vpop.f32.mrb[57].mxu1 }
 0x4b0   :  { %v1530_v47 = vadd.f32 %v1529_v3, %v1398_v38  ;;  %v1992_v4 = vpop.f32.mrb[58].mxu1 }
 0x4b1   :  { %1558 = vst [vmem:[%s2567_s7 + $0x70] sm:$0xff] %v1538_v2  ;;  %v1541_v5 = vadd.f32 %v1992_v4, %v1398_v38  ;;  %v1532_v7 = vpop.f32.mrb[59].mxu1 }
 0x4b2   :  { %1556 = vst [vmem:[%s2567_s7 + $0x60] sm:$0xff] %v1530_v47  ;;  %v1533_v8 = vadd.f32 %v1532_v7, %v1398_v38 }
 0x4b3   :  { %1559 = vst [vmem:[%s2567_s7 + $0x78] sm:$0xff] %v1541_v5 }
 0x4b4   :  { %1557 = vst [vmem:[%s2567_s7 + $0x68] sm:$0xff] %v1533_v8 }

// kernel: informax_forward.5
= control target key start
LH: loop header
LB: loop body
LE: loop exit
PB: predicated region body
PF: predicated region fallthrough
CT: control target
= control target key end

     0   :  { %vm160_vm0 = vcmask 523264   ;;  %v92_v24 = vlaneseq  ;;  %s4768_s3 = inlined_call_operand.vmem [shape: bf16[2,64,128], index: 3, kind: input, shape index: {}]   ;;  %s4769_s1 = inlined_call_operand.vmem [shape: bf16[128,64], index: 1, kind: input, shape index: {}]   ;;  %s4770_s4 = inlined_call_operand.vmem [shape: bf16[2,128,64], index: 4, kind: input, shape index: {}]   ;;  %s4771_s5 = inlined_call_operand.vmem [shape: bf16[2,64,64], index: 5, kind: input, shape index: {}]   ;;  %s4772_s6 = inlined_call_operand.vmem [shape: f32[2,3,128], index: 6, kind: input, shape index: {}]   ;;  %s4773_s0 = inlined_call_operand.vmem [shape: f32[1,2], index: 0, kind: input, shape index: {}]   ;;  %s4774_s7 = inlined_call_operand.vmem [shape: bf16[2,64,128], index: 7, kind: input, shape index: {}]   ;;  %s4775_s2 = inlined_call_operand.vmem [shape: f32[128,64], index: 2, kind: input, shape index: {}]   ;;  %s4776_s8 = inlined_call_operand.vmem [shape: bf16[2,128,128], index: 8, kind: input, shape index: {}]   ;;  %s4777_s13 = inlined_call_operand.vmem [shape: f32[128,128], index: 13, kind: output, shape index: {2}]   ;;  %s4778_s9 = inlined_call_operand.vmem [shape: bf16[2,128,128], index: 9, kind: input, shape index: {}]   ;;  %s4779_s10 = inlined_call_operand.vmem [shape: f32[2,3,128], index: 10, kind: input, shape index: {}]   ;;  %s4780_s11 = inlined_call_operand.vmem [shape: f32[128,128], index: 11, kind: output, shape index: {0}]   ;;  %s4781_s12 = inlined_call_operand.vmem [shape: f32[128,128], index: 12, kind: output, shape index: {1}]  }
   0x1   :  { %v3512_v0 = vld [vmem:[%s4768_s3] sm:$0xff]   ;;  %v3513_v1 = vld [vmem:[%s4768_s3 + $0x8] sm:$0xff]   ;;  %v3514_v2 = vld [vmem:[%s4768_s3 + $0x10] sm:$0xff]  }
   0x2   :  { %3156 = vmatprep.subr.bf16.mxu0 %v3512_v0  ;;  %v3676_v3 = vld [vmem:[%s4769_s1] sm:$0xff]   ;;  %v3515_v4 = vld [vmem:[%s4768_s3 + $0x18] sm:$0xff]   ;;  %v3525_v6 = vld [vmem:[%s4770_s4 + $0x8] sm:$0xff]   ;;  %v3769_v25 = vshrl.u32 %v92_v24, 7 }
   0x3   :  { %3157 = vmatpush3.bf16.msra.mxu0 %v3512_v0  ;;  %3164 = vmatprep.mubr.msk.bf16.mxu0 %vm160_vm0, %v3676_v3  ;;  %v3524_v5 = vld [vmem:[%s4770_s4] sm:$0xff]   ;;  %v3692_v7 = vld [vmem:[%s4769_s1 + $0x8] sm:$0xff]   ;;  %v3697_v8 = vld [vmem:[%s4769_s1 + $0x10] sm:$0xff]  }
   0x4   :  { %3158 = vmatprep.subr.bf16.mxu0 %v3513_v1  ;;  %3180 = vmatprep.subr.bf16.mxu1 %v3524_v5  ;;  %v3526_v9 = vld [vmem:[%s4770_s4 + $0x10] sm:$0xff]   ;;  %v3527_v10 = vld [vmem:[%s4770_s4 + $0x18] sm:$0xff]   ;;  %v3717_v12 = vld [vmem:[%s4769_s1 + $0x20] sm:$0xff]   ;;  %v3772_v26 = vsub.s32 0, %v3769_v25 }
   0x5   :  { %3181 = vmatpush3.bf16.msra.mxu1 %v3524_v5  ;;  %v3712_v11 = vld [vmem:[%s4769_s1 + $0x18] sm:$0xff]   ;;  %v3528_v13 = vld [vmem:[%s4770_s4 + $0x20] sm:$0xff]   ;;  %v3529_v14 = vld [vmem:[%s4770_s4 + $0x28] sm:$0xff]  }
   0x6   :  { %3182 = vmatprep.subr.bf16.mxu1 %v3525_v6  ;;  %v3732_v15 = vld [vmem:[%s4769_s1 + $0x28] sm:$0xff]   ;;  %v3737_v16 = vld [vmem:[%s4769_s1 + $0x30] sm:$0xff]   ;;  %v3746_v17 = vld [vmem:[%s4769_s1 + $0x38] sm:$0xff]  }
   0x7   :  { %3159 = vmatpush3.bf16.msra.mxu0 %v3513_v1  ;;  %v3530_v18 = vld [vmem:[%s4770_s4 + $0x30] sm:$0xff]   ;;  %v3531_v19 = vld [vmem:[%s4770_s4 + $0x38] sm:$0xff]   ;;  %v3532_v20 = vld [vmem:[%s4768_s3 + $0x20] sm:$0xff]  }
   0x8   :  { %3160 = vmatprep.subr.bf16.mxu0 %v3514_v2  ;;  %v3536_v21 = vld [vmem:[%s4771_s5] sm:$0xff]   ;;  %v3537_v22 = vld [vmem:[%s4771_s5 + $0x8] sm:$0xff]   ;;  %v3538_v23 = vld [vmem:[%s4771_s5 + $0x10] sm:$0xff]  }
   0x9   :  { %3183 = vmatpush3.bf16.msra.mxu1 %v3525_v6  ;;  %v3777_v27 = vld [vmem:[%s4772_s6] sm:$0x7]  ;;  %v3533_v52 = vld [vmem:[%s4768_s3 + $0x28] sm:$0xff]   ;;  %v3534_v60 = vld [vmem:[%s4768_s3 + $0x30] sm:$0xff]  }
   0xa   :  { %3184 = vmatprep.subr.bf16.mxu1 %v3526_v9  ;;  %v3781_v28 = vrot.slane %v3777_v27, %v3772_v26 }
   0xb   :  { %3161 = vmatpush3.bf16.msra.mxu0 %v3514_v2 }
   0xc   :  { %3162 = vmatprep.subr.bf16.mxu0 %v3515_v4 }
   0xd   :  { %3185 = vmatpush3.bf16.msra.mxu1 %v3526_v9 }
   0xe   :  { %3186 = vmatprep.subr.bf16.mxu1 %v3527_v10 }
   0xf   :  { %3163 = vmatpush3.bf16.msra.mxu0 %v3515_v4 }
  0x10   :  { %3212 = vmatprep.subr.bf16.mxu0 %v3536_v21 }
  0x11   :  { %3187 = vmatpush3.bf16.msra.mxu1 %v3527_v10 }
  0x12   :  { %3165 = vmatmul.mubr.msk.bf16.vlgmr.msra.gmra.mrb[0].mxu0 %vm160_vm0, %v3692_v7  ;;  %3188 = vmatprep.subr.bf16.mxu1 %v3528_v13 }
  0x13   :  { %3168 = vmatprep.mubr.msk.bf16.mxu0 %vm160_vm0, %v3697_v8  ;;  %3213 = vmatpush3.bf16.msra.mxu0 %v3536_v21 }
  0x14   :  { %3214 = vmatprep.subr.bf16.mxu0 %v3537_v22 }
  0x15   :  { %3189 = vmatpush3.bf16.msra.mxu1 %v3528_v13  ;;  %v3535_v13 = vld [vmem:[%s4768_s3 + $0x38] sm:$0xff]  }
  0x16   :  { %3190 = vmatprep.subr.bf16.mxu1 %v3529_v14 }
  0x17   :  { %3215 = vmatpush3.bf16.msra.mxu0 %v3537_v22 }
  0x18   :  { %3216 = vmatprep.subr.bf16.mxu0 %v3538_v23 }
  0x19   :  { %3191 = vmatpush3.bf16.msra.mxu1 %v3529_v14 }
  0x1a   :  { %3169 = vmatmul.mubr.msk.bf16.gmra.mrb[4].mxu0 %vm160_vm0, %v3712_v11  ;;  %3192 = vmatprep.subr.bf16.mxu1 %v3530_v18 }
  0x1b   :  { %3172 = vmatprep.mubr.msk.bf16.mxu0 %vm160_vm0, %v3717_v12  ;;  %3217 = vmatpush3.bf16.msra.mxu0 %v3538_v23 }
  0x1d   :  { %3193 = vmatpush3.bf16.msra.mxu1 %v3530_v18 }
  0x1e   :  { %3194 = vmatprep.subr.bf16.mxu1 %v3531_v19 }
  0x21   :  { %3195 = vmatpush3.bf16.msra.mxu1 %v3531_v19 }
  0x22   :  { %3173 = vmatmul.mubr.msk.bf16.gmra.mrb[8].mxu0 %vm160_vm0, %v3732_v15  ;;  %3236 = vmatprep.subr.bf16.mxu1 %v3532_v20 }
  0x23   :  { %3176 = vmatprep.mubr.msk.bf16.mxu0 %vm160_vm0, %v3737_v16 }
  0x2a   :  { %3177 = vmatmul.mubr.msk.bf16.gmra.mrb[12].mxu0 %vm160_vm0, %v3746_v17 }
  0xe5   :  { %v3166_v29 = vpop.f32.mrb[0].mxu0 }
  0xe6   :  { %v228_v30 = vadd.f32 %v3166_v29, %v3781_v28  ;;  %v219_v31 = vpop.f32.mrb[1].mxu0 }
  0xe7   :  { %v220_v32 = vadd.f32 %v219_v31, %v3781_v28  ;;  %v3167_v33 = vpop.f32.mrb[2].mxu0 }
  0xe8   :  { %v300_v34 = vmul.f32 0.2, %v228_v30  ;;  %v231_v35 = vadd.f32 %v3167_v33, %v3781_v28  ;;  %v222_v36 = vpop.f32.mrb[3].mxu0  ;;  %vm284_vm1 = vcmp.gt.f32.partialorder %v228_v30, 0.0 }
  0xe9   :  { %v298_v37 = vmul.f32 0.2, %v220_v32  ;;  %v223_v38 = vadd.f32 %v222_v36, %v3781_v28  ;;  %vm282_vm3 = vcmp.gt.f32.partialorder %v220_v32, 0.0 }
  0xea   :  { %vm285_vm2 = vcmp.gt.f32.partialorder %v231_v35, 0.0  ;;  %v301_v39 = vmul.f32 0.2, %v231_v35  ;;  %v316_v41 = vsel %vm284_vm1, %v228_v30, %v300_v34 }
  0xeb   :  { %v299_v40 = vmul.f32 0.2, %v223_v38  ;;  %vm283_vm4 = vcmp.gt.f32.partialorder %v223_v38, 0.0  ;;  %v314_v44 = vsel %vm282_vm3, %v220_v32, %v298_v37 }
  0xec   :  { %v317_v42 = vsel %vm285_vm2, %v231_v35, %v301_v39 }
  0xed   :  { %v3170_v43 = vpop.f32.mrb[4].mxu0  ;;  %v315_v45 = vsel %vm283_vm4, %v223_v38, %v299_v40  ;;  %v331_v46 = vpack.c.bf16 %v317_v42, %v316_v41 }
  0xee   :  { %v244_v47 = vadd.f32 %v3170_v43, %v3781_v28  ;;  %v235_v48 = vpop.f32.mrb[5].mxu0  ;;  %v330_v49 = vpack.c.bf16 %v315_v45, %v314_v44 }
  0xef   :  { %v236_v50 = vadd.f32 %v235_v48, %v3781_v28  ;;  %v3171_v51 = vpop.f32.mrb[6].mxu0 }
  0xf0   :  { %v304_v53 = vmul.f32 0.2, %v244_v47  ;;  %v247_v54 = vadd.f32 %v3171_v51, %v3781_v28  ;;  %v238_v55 = vpop.f32.mrb[7].mxu0  ;;  %3196 = vmatprep.mubr.bf16.mxu1 %v330_v49  ;;  %vm288_vm5 = vcmp.gt.f32.partialorder %v244_v47, 0.0 }
  0xf1   :  { %v302_v56 = vmul.f32 0.2, %v236_v50  ;;  %v239_v57 = vadd.f32 %v238_v55, %v3781_v28  ;;  %3197 = vmatmul.mubr.bf16.vlgmr.msra.gmra.mrb[0].mxu1 %v331_v46  ;;  %vm286_vm6 = vcmp.gt.f32.partialorder %v236_v50, 0.0 }
  0xf2   :  { %vm289_vm7 = vcmp.gt.f32.partialorder %v247_v54, 0.0  ;;  %v305_v58 = vmul.f32 0.2, %v247_v54  ;;  %3237 = vmatpush3.bf16.msra.mxu1 %v3532_v20  ;;  %v320_v61 = vsel %vm288_vm5, %v244_v47, %v304_v53 }
  0xf3   :  { %vm287_vm8 = vcmp.gt.f32.partialorder %v239_v57, 0.0  ;;  %v303_v59 = vmul.f32 0.2, %v239_v57  ;;  %3238 = vmatprep.subr.bf16.mxu1 %v3533_v52  ;;  %v318_v0 = vsel %vm286_vm6, %v236_v50, %v302_v56 }
  0xf4   :  { %v321_v62 = vsel %vm289_vm7, %v247_v54, %v305_v58 }
  0xf5   :  { %v3174_v63 = vpop.f32.mrb[8].mxu0  ;;  %v319_v1 = vsel %vm287_vm8, %v239_v57, %v303_v59  ;;  %v333_v2 = vpack.c.bf16 %v321_v62, %v320_v61 }
  0xf6   :  { %v260_v4 = vadd.f32 %v3174_v63, %v3781_v28  ;;  %v251_v5 = vpop.f32.mrb[9].mxu0  ;;  %v332_v6 = vpack.c.bf16 %v319_v1, %v318_v0  ;;  %3239 = vmatpush3.bf16.msra.mxu1 %v3533_v52 }
  0xf7   :  { %v252_v9 = vadd.f32 %v251_v5, %v3781_v28  ;;  %v3175_v10 = vpop.f32.mrb[10].mxu0  ;;  %3240 = vmatprep.subr.bf16.mxu1 %v3534_v60 }
  0xf8   :  { %v308_v14 = vmul.f32 0.2, %v260_v4  ;;  %v263_v18 = vadd.f32 %v3175_v10, %v3781_v28  ;;  %v254_v19 = vpop.f32.mrb[11].mxu0  ;;  %3200 = vmatprep.mubr.bf16.mxu1 %v332_v6  ;;  %vm292_vm9 = vcmp.gt.f32.partialorder %v260_v4, 0.0 }
  0xf9   :  { %v306_v20 = vmul.f32 0.2, %v252_v9  ;;  %v255_v21 = vadd.f32 %v254_v19, %v3781_v28  ;;  %3201 = vmatmul.mubr.bf16.gmra.mrb[4].mxu1 %v333_v2  ;;  %vm290_vm10 = vcmp.gt.f32.partialorder %v252_v9, 0.0 }
  0xfa   :  { %vm293_vm11 = vcmp.gt.f32.partialorder %v263_v18, 0.0  ;;  %v309_v22 = vmul.f32 0.2, %v263_v18  ;;  %3241 = vmatpush3.bf16.msra.mxu1 %v3534_v60  ;;  %v324_v29 = vsel %vm292_vm9, %v260_v4, %v308_v14  ;;  %v3541_v14 = vld [vmem:[%s4770_s4 + $0x48] sm:$0xff]  }
  0xfb   :  { %vm291_vm12 = vcmp.gt.f32.partialorder %v255_v21, 0.0  ;;  %v307_v23 = vmul.f32 0.2, %v255_v21  ;;  %3242 = vmatprep.subr.bf16.mxu1 %v3535_v13  ;;  %v322_v32 = vsel %vm290_vm10, %v252_v9, %v306_v20 }
  0xfc   :  { %v325_v30 = vsel %vm293_vm11, %v263_v18, %v309_v22 }
  0xfd   :  { %v3178_v31 = vpop.f32.mrb[12].mxu0  ;;  %v323_v33 = vsel %vm291_vm12, %v255_v21, %v307_v23  ;;  %v335_v34 = vpack.c.bf16 %v325_v30, %v324_v29  ;;  %v3542_v30 = vld [vmem:[%s4770_s4 + $0x50] sm:$0xff]  }
  0xfe   :  { %v276_v35 = vadd.f32 %v3178_v31, %v3781_v28  ;;  %v267_v36 = vpop.f32.mrb[13].mxu0  ;;  %v334_v37 = vpack.c.bf16 %v323_v33, %v322_v32  ;;  %3243 = vmatpush3.bf16.msra.mxu1 %v3535_v13 }
  0xff   :  { %v268_v38 = vadd.f32 %v267_v36, %v3781_v28  ;;  %v3179_v39 = vpop.f32.mrb[14].mxu0 }
 0x100   :  { %v312_v40 = vmul.f32 0.2, %v276_v35  ;;  %v279_v41 = vadd.f32 %v3179_v39, %v3781_v28  ;;  %v270_v42 = vpop.f32.mrb[15].mxu0  ;;  %3204 = vmatprep.mubr.bf16.mxu1 %v334_v37  ;;  %vm296_vm13 = vcmp.gt.f32.partialorder %v276_v35, 0.0 }
 0x101   :  { %v310_v43 = vmul.f32 0.2, %v268_v38  ;;  %v271_v44 = vadd.f32 %v270_v42, %v3781_v28  ;;  %3205 = vmatmul.mubr.bf16.gmra.mrb[8].mxu1 %v335_v34  ;;  %vm294_vm14 = vcmp.gt.f32.partialorder %v268_v38, 0.0  ;;  %v3543_v42 = vld [vmem:[%s4770_s4 + $0x58] sm:$0xff]  }
 0x102   :  { %vm297_vm15 = vcmp.gt.f32.partialorder %v279_v41, 0.0  ;;  %v313_v45 = vmul.f32 0.2, %v279_v41  ;;  %v328_v47 = vsel %vm296_vm13, %v276_v35, %v312_v40 }
 0x103   :  { %vm295_vm1 = vcmp.gt.f32.partialorder %v271_v44, 0.0  ;;  %v311_v46 = vmul.f32 0.2, %v271_v44  ;;  %v326_v49 = vsel %vm294_vm14, %v268_v38, %v310_v43 }
 0x104   :  { %v329_v48 = vsel %vm297_vm15, %v279_v41, %v313_v45 }
 0x105   :  { %v327_v50 = vsel %vm295_vm1, %v271_v44, %v311_v46  ;;  %v337_v51 = vpack.c.bf16 %v329_v48, %v328_v47 }
 0x106   :  { %v336_v52 = vpack.c.bf16 %v327_v50, %v326_v49  ;;  %v3544_v50 = vld [vmem:[%s4770_s4 + $0x60] sm:$0xff]  }
 0x108   :  { %3208 = vmatprep.mubr.bf16.mxu1 %v336_v52 }
 0x109   :  { %3209 = vmatmul.mubr.bf16.gmra.mrb[12].mxu1 %v337_v51 }
 0x10a   :  { %3244 = vmatprep.mubr.msk.bf16.mxu1 %vm160_vm0, %v3676_v3  ;;  %v3539_v3 = vld [vmem:[%s4771_s5 + $0x18] sm:$0xff]  }
 0x10b   :  { %3218 = vmatprep.subr.bf16.mxu0 %v3539_v3 }
 0x10c   :  { %3219 = vmatpush3.bf16.msra.mxu0 %v3539_v3 }
 0x111   :  { %3245 = vmatmul.mubr.msk.bf16.vlgmr.msra.gmra.mrb[16].mxu1 %vm160_vm0, %v3692_v7  ;;  %v3540_v7 = vld [vmem:[%s4770_s4 + $0x40] sm:$0xff]  }
 0x112   :  { %3248 = vmatprep.mubr.msk.bf16.mxu1 %vm160_vm0, %v3697_v8  ;;  %3260 = vmatprep.subr.bf16.mxu0 %v3540_v7  ;;  %v3592_v8 = vmov 0  }
 0x113   :  { %3510 = vset.pattern.permute.xlu0 %v3592_v8 }
 0x119   :  { %3249 = vmatmul.mubr.msk.bf16.gmra.mrb[20].mxu1 %vm160_vm0, %v3712_v11  ;;  %v3833_v11 = vld [vmem:[%s4773_s0] ss:$0 sm:$0xff] }
 0x11a   :  { %3252 = vmatprep.mubr.msk.bf16.mxu1 %vm160_vm0, %v3717_v12  ;;  %1270 = vperm.xlu0 %3510, %v3833_v11   ;;  %v3837_v12 = vsub.s32 1, %v3769_v25 }
 0x121   :  { %3253 = vmatmul.mubr.msk.bf16.gmra.mrb[24].mxu1 %vm160_vm0, %v3732_v15  ;;  %v3841_v15 = vrot.slane %v3777_v27, %v3837_v12 }
 0x122   :  { %3256 = vmatprep.mubr.msk.bf16.mxu1 %vm160_vm0, %v3737_v16 }
 0x129   :  { %3257 = vmatmul.mubr.msk.bf16.gmra.mrb[28].mxu1 %vm160_vm0, %v3746_v17 }
 0x1c4   :  { %v3198_v16 = vpop.f32.mrb[0].mxu1 }
 0x1c5   :  { %v433_v17 = vadd.f32 %v3198_v16, %v3841_v15  ;;  %v424_v28 = vpop.f32.mrb[1].mxu1 }
 0x1c6   :  { %v425_v53 = vadd.f32 %v424_v28, %v3841_v15  ;;  %v3199_v54 = vpop.f32.mrb[2].mxu1 }
 0x1c7   :  { %v505_v55 = vmul.f32 0.2, %v433_v17  ;;  %v436_v56 = vadd.f32 %v3199_v54, %v3841_v15  ;;  %v427_v57 = vpop.f32.mrb[3].mxu1  ;;  %vm489_vm2 = vcmp.gt.f32.partialorder %v433_v17, 0.0 }
 0x1c8   :  { %v503_v58 = vmul.f32 0.2, %v425_v53  ;;  %v428_v59 = vadd.f32 %v427_v57, %v3841_v15  ;;  %vm487_vm3 = vcmp.gt.f32.partialorder %v425_v53, 0.0  ;;  %v3879_v57 = vld [vmem:[%s4772_s6 + $0x4] sm:$0x7] }
 0x1c9   :  { %vm490_vm4 = vcmp.gt.f32.partialorder %v436_v56, 0.0  ;;  %v506_v60 = vmul.f32 0.2, %v436_v56  ;;  %v521_v62 = vsel %vm489_vm2, %v433_v17, %v505_v55 }
 0x1ca   :  { %vm488_vm5 = vcmp.gt.f32.partialorder %v428_v59, 0.0  ;;  %v504_v61 = vmul.f32 0.2, %v428_v59  ;;  %v519_v0 = vsel %vm487_vm3, %v425_v53, %v503_v58 }
 0x1cb   :  { %v522_v63 = vsel %vm490_vm4, %v436_v56, %v506_v60  ;;  %v3545_v56 = vld [vmem:[%s4770_s4 + $0x68] sm:$0xff]  }
 0x1cc   :  { %v536_v1 = vpack.c.bf16 %v522_v63, %v521_v62  ;;  %v520_v2 = vsel %vm488_vm5, %v428_v59, %v504_v61  ;;  %v3202_v4 = vpop.f32.mrb[4].mxu1 }
 0x1cd   :  { %v535_v5 = vpack.c.bf16 %v520_v2, %v519_v0  ;;  %v449_v6 = vadd.f32 %v3202_v4, %v3841_v15  ;;  %v440_v9 = vpop.f32.mrb[5].mxu1  ;;  %v3887_v0 = vrot.slane %v3879_v57, %v3772_v26  ;;  %v3546_v2 = vld [vmem:[%s4770_s4 + $0x70] sm:$0xff]  }
 0x1ce   :  { %v441_v10 = vadd.f32 %v440_v9, %v3841_v15  ;;  %v3203_v13 = vpop.f32.mrb[6].mxu1 }
 0x1cf   :  { %v509_v18 = vmul.f32 0.2, %v449_v6  ;;  %v452_v19 = vadd.f32 %v3203_v13, %v3841_v15  ;;  %v443_v20 = vpop.f32.mrb[7].mxu1  ;;  %3220 = vmatprep.mubr.msk.bf16.mxu0 %vm160_vm0, %v535_v5  ;;  %vm493_vm6 = vcmp.gt.f32.partialorder %v449_v6, 0.0 }
 0x1d0   :  { %v507_v21 = vmul.f32 0.2, %v441_v10  ;;  %v444_v22 = vadd.f32 %v443_v20, %v3841_v15  ;;  %3221 = vmatmul.mubr.msk.bf16.vlgmr.msra.gmra.mrb[16].mxu0 %vm160_vm0, %v536_v1  ;;  %vm491_vm7 = vcmp.gt.f32.partialorder %v441_v10, 0.0 }
 0x1d1   :  { %vm494_vm8 = vcmp.gt.f32.partialorder %v452_v19, 0.0  ;;  %v510_v23 = vmul.f32 0.2, %v452_v19  ;;  %3261 = vmatpush3.bf16.msra.mxu0 %v3540_v7  ;;  %v525_v31 = vsel %vm493_vm6, %v449_v6, %v509_v18 }
 0x1d2   :  { %vm492_vm9 = vcmp.gt.f32.partialorder %v444_v22, 0.0  ;;  %v508_v29 = vmul.f32 0.2, %v444_v22  ;;  %3262 = vmatprep.subr.bf16.mxu0 %v3541_v14  ;;  %v523_v33 = vsel %vm491_vm7, %v441_v10, %v507_v21  ;;  %v3547_v21 = vld [vmem:[%s4770_s4 + $0x78] sm:$0xff]  }
 0x1d3   :  { %v526_v32 = vsel %vm494_vm8, %v452_v19, %v510_v23 }
 0x1d4   :  { %v538_v34 = vpack.c.bf16 %v526_v32, %v525_v31  ;;  %v524_v35 = vsel %vm492_vm9, %v444_v22, %v508_v29  ;;  %v3206_v36 = vpop.f32.mrb[8].mxu1 }
 0x1d5   :  { %v537_v37 = vpack.c.bf16 %v524_v35, %v523_v33  ;;  %v465_v38 = vadd.f32 %v3206_v36, %v3841_v15  ;;  %3263 = vmatpush3.bf16.msra.mxu0 %v3541_v14  ;;  %v456_v39 = vpop.f32.mrb[9].mxu1 }
 0x1d6   :  { %v457_v40 = vadd.f32 %v456_v39, %v3841_v15  ;;  %v3207_v41 = vpop.f32.mrb[10].mxu1  ;;  %3264 = vmatprep.subr.bf16.mxu0 %v3542_v30 }
 0x1d7   :  { %v513_v43 = vmul.f32 0.2, %v465_v38  ;;  %v468_v44 = vadd.f32 %v3207_v41, %v3841_v15  ;;  %v459_v45 = vpop.f32.mrb[11].mxu1  ;;  %3224 = vmatprep.mubr.msk.bf16.mxu0 %vm160_vm0, %v537_v37  ;;  %vm497_vm10 = vcmp.gt.f32.partialorder %v465_v38, 0.0 }
 0x1d8   :  { %v511_v46 = vmul.f32 0.2, %v457_v40  ;;  %v460_v47 = vadd.f32 %v459_v45, %v3841_v15  ;;  %3225 = vmatmul.mubr.msk.bf16.gmra.mrb[20].mxu0 %vm160_vm0, %v538_v34  ;;  %vm495_vm11 = vcmp.gt.f32.partialorder %v457_v40, 0.0 }
 0x1d9   :  { %vm498_vm12 = vcmp.gt.f32.partialorder %v468_v44, 0.0  ;;  %v514_v48 = vmul.f32 0.2, %v468_v44  ;;  %3265 = vmatpush3.bf16.msra.mxu0 %v3542_v30  ;;  %v529_v51 = vsel %vm497_vm10, %v465_v38, %v513_v43 }
 0x1da   :  { %vm496_vm13 = vcmp.gt.f32.partialorder %v460_v47, 0.0  ;;  %v512_v49 = vmul.f32 0.2, %v460_v47  ;;  %3266 = vmatprep.subr.bf16.mxu0 %v3543_v42  ;;  %v527_v3 = vsel %vm495_vm11, %v457_v40, %v511_v46 }
 0x1db   :  { %v530_v52 = vsel %vm498_vm12, %v468_v44, %v514_v48 }
 0x1dc   :  { %v540_v7 = vpack.c.bf16 %v530_v52, %v529_v51  ;;  %v528_v8 = vsel %vm496_vm13, %v460_v47, %v512_v49  ;;  %v3210_v16 = vpop.f32.mrb[12].mxu1 }
 0x1dd   :  { %v539_v17 = vpack.c.bf16 %v528_v8, %v527_v3  ;;  %v481_v28 = vadd.f32 %v3210_v16, %v3841_v15  ;;  %3267 = vmatpush3.bf16.msra.mxu0 %v3543_v42  ;;  %v472_v53 = vpop.f32.mrb[13].mxu1 }
 0x1de   :  { %v473_v54 = vadd.f32 %v472_v53, %v3841_v15  ;;  %v3211_v55 = vpop.f32.mrb[14].mxu1  ;;  %3268 = vmatprep.subr.bf16.mxu0 %v3544_v50 }
 0x1df   :  { %v517_v58 = vmul.f32 0.2, %v481_v28  ;;  %v484_v59 = vadd.f32 %v3211_v55, %v3841_v15  ;;  %v475_v60 = vpop.f32.mrb[15].mxu1  ;;  %3228 = vmatprep.mubr.msk.bf16.mxu0 %vm160_vm0, %v539_v17  ;;  %vm501_vm14 = vcmp.gt.f32.partialorder %v481_v28, 0.0 }
 0x1e0   :  { %v515_v61 = vmul.f32 0.2, %v473_v54  ;;  %v476_v62 = vadd.f32 %v475_v60, %v3841_v15  ;;  %3229 = vmatmul.mubr.msk.bf16.gmra.mrb[24].mxu0 %vm160_vm0, %v540_v7  ;;  %vm499_vm15 = vcmp.gt.f32.partialorder %v473_v54, 0.0 }
 0x1e1   :  { %vm502_vm1 = vcmp.gt.f32.partialorder %v484_v59, 0.0  ;;  %v518_v63 = vmul.f32 0.2, %v484_v59  ;;  %3269 = vmatpush3.bf16.msra.mxu0 %v3544_v50  ;;  %v533_v4 = vsel %vm501_vm14, %v481_v28, %v517_v58 }
 0x1e2   :  { %vm500_vm2 = vcmp.gt.f32.partialorder %v476_v62, 0.0  ;;  %v516_v1 = vmul.f32 0.2, %v476_v62  ;;  %3270 = vmatprep.subr.bf16.mxu0 %v3545_v56  ;;  %v531_v15 = vsel %vm499_vm15, %v473_v54, %v515_v61 }
 0x1e3   :  { %v534_v5 = vsel %vm502_vm1, %v484_v59, %v518_v63 }
 0x1e4   :  { %v542_v6 = vpack.c.bf16 %v534_v5, %v533_v4  ;;  %v532_v9 = vsel %vm500_vm2, %v476_v62, %v516_v1  ;;  %v3246_v10 = vpop.f32.mrb[16].mxu1 }
 0x1e5   :  { %v541_v13 = vpack.c.bf16 %v532_v9, %v531_v15  ;;  %v800_v14 = vadd.f32 %v3246_v10, %v3887_v0  ;;  %3271 = vmatpush3.bf16.msra.mxu0 %v3545_v56  ;;  %v791_v18 = vpop.f32.mrb[17].mxu1 }
 0x1e6   :  { %v792_v19 = vadd.f32 %v791_v18, %v3887_v0  ;;  %v3247_v20 = vpop.f32.mrb[18].mxu1  ;;  %3272 = vmatprep.subr.bf16.mxu0 %v3546_v2 }
 0x1e7   :  { %v872_v22 = vmul.f32 0.2, %v800_v14  ;;  %v803_v23 = vadd.f32 %v3247_v20, %v3887_v0  ;;  %3232 = vmatprep.mubr.msk.bf16.mxu0 %vm160_vm0, %v541_v13  ;;  %v794_v29 = vpop.f32.mrb[19].mxu1  ;;  %vm856_vm3 = vcmp.gt.f32.partialorder %v800_v14, 0.0 }
 0x1e8   :  { %v870_v30 = vmul.f32 0.2, %v792_v19  ;;  %v795_v31 = vadd.f32 %v794_v29, %v3887_v0  ;;  %3233 = vmatmul.mubr.msk.bf16.gmra.mrb[28].mxu0 %vm160_vm0, %v542_v6  ;;  %vm854_vm4 = vcmp.gt.f32.partialorder %v792_v19, 0.0 }
 0x1e9   :  { %vm857_vm5 = vcmp.gt.f32.partialorder %v803_v23, 0.0  ;;  %v873_v32 = vmul.f32 0.2, %v803_v23  ;;  %3273 = vmatpush3.bf16.msra.mxu0 %v3546_v2  ;;  %v888_v34 = vsel %vm856_vm3, %v800_v14, %v872_v22 }
 0x1ea   :  { %vm855_vm6 = vcmp.gt.f32.partialorder %v795_v31, 0.0  ;;  %v871_v33 = vmul.f32 0.2, %v795_v31  ;;  %3274 = vmatprep.subr.bf16.mxu0 %v3547_v21  ;;  %v886_v38 = vsel %vm854_vm4, %v792_v19, %v870_v30 }
 0x1eb   :  { %v889_v35 = vsel %vm857_vm5, %v803_v23, %v873_v32 }
 0x1ec   :  { %v903_v36 = vpack.c.bf16 %v889_v35, %v888_v34  ;;  %v3250_v37 = vpop.f32.mrb[20].mxu1  ;;  %v887_v39 = vsel %vm855_vm6, %v795_v31, %v871_v33 }
 0x1ed   :  { %v816_v40 = vadd.f32 %v3250_v37, %v3887_v0  ;;  %3275 = vmatpush3.bf16.msra.mxu0 %v3547_v21  ;;  %v807_v41 = vpop.f32.mrb[21].mxu1  ;;  %v902_v42 = vpack.c.bf16 %v887_v39, %v886_v38  ;;  %v3548_v38 = vld [vmem:[%s4771_s5 + $0x20] sm:$0xff]   ;;  %v3550_v39 = vld [vmem:[%s4771_s5 + $0x30] sm:$0xff]  }
 0x1ee   :  { %v808_v43 = vadd.f32 %v807_v41, %v3887_v0  ;;  %v3251_v44 = vpop.f32.mrb[22].mxu1  ;;  %3292 = vmatprep.subr.bf16.mxu1 %v3548_v38  ;;  %v3593_v41 = vmov 1  }
 0x1ef   :  { %v876_v45 = vmul.f32 0.2, %v816_v40  ;;  %v819_v46 = vadd.f32 %v3251_v44, %v3887_v0  ;;  %v810_v47 = vpop.f32.mrb[23].mxu1  ;;  %3276 = vmatprep.mubr.bf16.mxu0 %v902_v42  ;;  %vm860_vm7 = vcmp.gt.f32.partialorder %v816_v40, 0.0  ;;  %3293 = vmatpush3.bf16.msra.mxu1 %v3548_v38  ;;  %v3552_v42 = vld [vmem:[%s4774_s7] sm:$0xff]   ;;  %v3554_v44 = vld [vmem:[%s4774_s7 + $0x10] sm:$0xff]  }
 0x1f0   :  { %v874_v48 = vmul.f32 0.2, %v808_v43  ;;  %v811_v49 = vadd.f32 %v810_v47, %v3887_v0  ;;  %3277 = vmatmul.mubr.bf16.vlgmr.msra.gmra.mrb[32].mxu0 %v903_v36  ;;  %vm858_vm8 = vcmp.gt.f32.partialorder %v808_v43, 0.0  ;;  %3511 = vset.pattern.permute.xlu0 %v3593_v41 }
 0x1f1   :  { %vm861_vm9 = vcmp.gt.f32.partialorder %v819_v46, 0.0  ;;  %v877_v50 = vmul.f32 0.2, %v819_v46  ;;  %v892_v52 = vsel %vm860_vm7, %v816_v40, %v876_v45  ;;  %v3551_v40 = vld [vmem:[%s4771_s5 + $0x38] sm:$0xff]   ;;  %1290 = vperm.xlu0 %3511, %v3833_v11   ;;  %3316 = vmatprep.subr.bf16.mxu0 %v3552_v42 }
 0x1f2   :  { %vm859_vm10 = vcmp.gt.f32.partialorder %v811_v49, 0.0  ;;  %v875_v51 = vmul.f32 0.2, %v811_v49  ;;  %v890_v8 = vsel %vm858_vm8, %v808_v43, %v874_v48  ;;  %v3553_v43 = vld [vmem:[%s4774_s7 + $0x8] sm:$0xff]   ;;  %3317 = vmatpush3.bf16.msra.mxu0 %v3552_v42 }
 0x1f3   :  { %v893_v3 = vsel %vm861_vm9, %v819_v46, %v877_v50  ;;  %3318 = vmatprep.subr.bf16.mxu0 %v3553_v43 }
 0x1f4   :  { %v3254_v7 = vpop.f32.mrb[24].mxu1  ;;  %v891_v16 = vsel %vm859_vm10, %v811_v49, %v875_v51  ;;  %v905_v17 = vpack.c.bf16 %v893_v3, %v892_v52 }
 0x1f5   :  { %v832_v28 = vadd.f32 %v3254_v7, %v3887_v0  ;;  %v823_v53 = vpop.f32.mrb[25].mxu1  ;;  %v904_v54 = vpack.c.bf16 %v891_v16, %v890_v8 }
 0x1f6   :  { %v824_v55 = vadd.f32 %v823_v53, %v3887_v0  ;;  %v3255_v56 = vpop.f32.mrb[26].mxu1  ;;  %3319 = vmatpush3.bf16.msra.mxu0 %v3553_v43 }
 0x1f7   :  { %v880_v58 = vmul.f32 0.2, %v832_v28  ;;  %v835_v59 = vadd.f32 %v3255_v56, %v3887_v0  ;;  %v826_v60 = vpop.f32.mrb[27].mxu1  ;;  %3280 = vmatprep.mubr.bf16.mxu0 %v904_v54  ;;  %vm864_vm11 = vcmp.gt.f32.partialorder %v832_v28, 0.0  ;;  %3320 = vmatprep.subr.bf16.mxu0 %v3554_v44  ;;  %v3969_v54 = vrot.slane %v3879_v57, %v3837_v12 }
 0x1f8   :  { %v878_v61 = vmul.f32 0.2, %v824_v55  ;;  %v827_v62 = vadd.f32 %v826_v60, %v3887_v0  ;;  %3281 = vmatmul.mubr.bf16.gmra.mrb[36].mxu0 %v905_v17  ;;  %vm862_vm12 = vcmp.gt.f32.partialorder %v824_v55, 0.0 }
 0x1f9   :  { %vm865_vm13 = vcmp.gt.f32.partialorder %v835_v59, 0.0  ;;  %v881_v63 = vmul.f32 0.2, %v835_v59  ;;  %v896_v2 = vsel %vm864_vm11, %v832_v28, %v880_v58 }
 0x1fa   :  { %vm863_vm14 = vcmp.gt.f32.partialorder %v827_v62, 0.0  ;;  %v879_v1 = vmul.f32 0.2, %v827_v62  ;;  %v894_v15 = vsel %vm862_vm12, %v824_v55, %v878_v61  ;;  %3321 = vmatpush3.bf16.msra.mxu0 %v3554_v44 }
 0x1fb   :  { %v897_v4 = vsel %vm865_vm13, %v835_v59, %v881_v63 }
 0x1fc   :  { %v3258_v5 = vpop.f32.mrb[28].mxu1  ;;  %v895_v6 = vsel %vm863_vm14, %v827_v62, %v879_v1  ;;  %v907_v9 = vpack.c.bf16 %v897_v4, %v896_v2 }
 0x1fd   :  { %v848_v10 = vadd.f32 %v3258_v5, %v3887_v0  ;;  %v839_v13 = vpop.f32.mrb[29].mxu1  ;;  %v906_v14 = vpack.c.bf16 %v895_v6, %v894_v15 }
 0x1fe   :  { %v840_v18 = vadd.f32 %v839_v13, %v3887_v0  ;;  %v3259_v19 = vpop.f32.mrb[30].mxu1 }
 0x1ff   :  { %v884_v20 = vmul.f32 0.2, %v848_v10  ;;  %v851_v21 = vadd.f32 %v3259_v19, %v3887_v0  ;;  %v842_v22 = vpop.f32.mrb[31].mxu1  ;;  %3284 = vmatprep.mubr.bf16.mxu0 %v906_v14  ;;  %vm868_vm15 = vcmp.gt.f32.partialorder %v848_v10, 0.0 }
 0x200   :  { %v882_v23 = vmul.f32 0.2, %v840_v18  ;;  %v843_v29 = vadd.f32 %v842_v22, %v3887_v0  ;;  %3285 = vmatmul.mubr.bf16.gmra.mrb[40].mxu0 %v907_v9  ;;  %vm866_vm1 = vcmp.gt.f32.partialorder %v840_v18, 0.0  ;;  %v3549_v0 = vld [vmem:[%s4771_s5 + $0x28] sm:$0xff]  }
 0x201   :  { %vm869_vm2 = vcmp.gt.f32.partialorder %v851_v21, 0.0  ;;  %v885_v30 = vmul.f32 0.2, %v851_v21  ;;  %v900_v32 = vsel %vm868_vm15, %v848_v10, %v884_v20  ;;  %3294 = vmatprep.subr.bf16.mxu1 %v3549_v0 }
 0x202   :  { %vm867_vm3 = vcmp.gt.f32.partialorder %v843_v29, 0.0  ;;  %v883_v31 = vmul.f32 0.2, %v843_v29  ;;  %v898_v34 = vsel %vm866_vm1, %v840_v18, %v882_v23  ;;  %3295 = vmatpush3.bf16.msra.mxu1 %v3549_v0 }
 0x203   :  { %v901_v33 = vsel %vm869_vm2, %v851_v21, %v885_v30  ;;  %3296 = vmatprep.subr.bf16.mxu1 %v3550_v39 }
 0x204   :  { %v899_v35 = vsel %vm867_vm3, %v843_v29, %v883_v31  ;;  %v909_v36 = vpack.c.bf16 %v901_v33, %v900_v32 }
 0x205   :  { %v908_v37 = vpack.c.bf16 %v899_v35, %v898_v34 }
 0x206   :  { %3297 = vmatpush3.bf16.msra.mxu1 %v3550_v39 }
 0x207   :  { %3288 = vmatprep.mubr.bf16.mxu0 %v908_v37  ;;  %3298 = vmatprep.subr.bf16.mxu1 %v3551_v40 }
 0x208   :  { %3289 = vmatmul.mubr.bf16.gmra.mrb[44].mxu0 %v909_v36 }
 0x20a   :  { %3299 = vmatpush3.bf16.msra.mxu1 %v3551_v40 }
 0x2a3   :  { %v3935_v45 = vpop.f32.mrb[16].mxu0 }
 0x2a4   :  { %v3937_v46 = vpop.f32.mrb[17].mxu0 }
 0x2a5   :  { %v3939_v47 = vpop.f32.mrb[18].mxu0 }
 0x2a6   :  { %v3941_v11 = vpop.f32.mrb[19].mxu0 }
 0x2ab   :  { %v3943_v48 = vpop.f32.mrb[20].mxu0 }
 0x2ac   :  { %v3945_v49 = vpop.f32.mrb[21].mxu0 }
 0x2ad   :  { %v3947_v50 = vpop.f32.mrb[22].mxu0 }
 0x2ae   :  { %v3949_v51 = vpop.f32.mrb[23].mxu0 }
 0x2b3   :  { %v3951_v52 = vpop.f32.mrb[24].mxu0 }
 0x2b4   :  { %v3953_v3 = vpop.f32.mrb[25].mxu0 }
 0x2b5   :  { %v3955_v7 = vpop.f32.mrb[26].mxu0 }
 0x2b6   :  { %v3957_v8 = vpop.f32.mrb[27].mxu0 }
 0x2bb   :  { %v3959_v16 = vpop.f32.mrb[28].mxu0 }
 0x2bc   :  { %v3961_v17 = vpop.f32.mrb[29].mxu0 }
 0x2bd   :  { %v3963_v28 = vpop.f32.mrb[30].mxu0 }
 0x2be   :  { %v3965_v53 = vpop.f32.mrb[31].mxu0 }
 0x2c3   :  { %v3278_v55 = vpop.f32.mrb[32].mxu0 }
 0x2c4   :  { %v1005_v56 = vadd.f32 %v3278_v55, %v3969_v54  ;;  %v996_v58 = vpop.f32.mrb[33].mxu0 }
 0x2c5   :  { %v997_v59 = vadd.f32 %v996_v58, %v3969_v54  ;;  %v3279_v60 = vpop.f32.mrb[34].mxu0 }
 0x2c6   :  { %v1077_v61 = vmul.f32 0.2, %v1005_v56  ;;  %v1008_v62 = vadd.f32 %v3279_v60, %v3969_v54  ;;  %v999_v63 = vpop.f32.mrb[35].mxu0  ;;  %vm1061_vm4 = vcmp.gt.f32.partialorder %v1005_v56, 0.0 }
 0x2c7   :  { %v1075_v1 = vmul.f32 0.2, %v997_v59  ;;  %v1000_v2 = vadd.f32 %v999_v63, %v3969_v54  ;;  %vm1059_vm5 = vcmp.gt.f32.partialorder %v997_v59, 0.0 }
 0x2c8   :  { %vm1062_vm6 = vcmp.gt.f32.partialorder %v1008_v62, 0.0  ;;  %v1078_v4 = vmul.f32 0.2, %v1008_v62  ;;  %v1093_v15 = vsel %vm1061_vm4, %v1005_v56, %v1077_v61 }
 0x2c9   :  { %vm1060_vm7 = vcmp.gt.f32.partialorder %v1000_v2, 0.0  ;;  %v1076_v5 = vmul.f32 0.2, %v1000_v2  ;;  %v1091_v9 = vsel %vm1059_vm5, %v997_v59, %v1075_v1 }
 0x2ca   :  { %v1094_v6 = vsel %vm1062_vm6, %v1008_v62, %v1078_v4 }
 0x2cb   :  { %v1108_v10 = vpack.c.bf16 %v1094_v6, %v1093_v15  ;;  %v1092_v13 = vsel %vm1060_vm7, %v1000_v2, %v1076_v5  ;;  %v3282_v14 = vpop.f32.mrb[36].mxu0 }
 0x2cc   :  { %v1107_v18 = vpack.c.bf16 %v1092_v13, %v1091_v9  ;;  %v1021_v19 = vadd.f32 %v3282_v14, %v3969_v54  ;;  %v1012_v20 = vpop.f32.mrb[37].mxu0 }
 0x2cd   :  { %v1013_v21 = vadd.f32 %v1012_v20, %v3969_v54  ;;  %v3283_v22 = vpop.f32.mrb[38].mxu0 }
 0x2ce   :  { %v1081_v23 = vmul.f32 0.2, %v1021_v19  ;;  %v1024_v29 = vadd.f32 %v3283_v22, %v3969_v54  ;;  %v1015_v30 = vpop.f32.mrb[39].mxu0  ;;  %3300 = vmatprep.mubr.msk.bf16.mxu1 %vm160_vm0, %v1107_v18  ;;  %vm1065_vm8 = vcmp.gt.f32.partialorder %v1021_v19, 0.0 }
 0x2cf   :  { %v1079_v31 = vmul.f32 0.2, %v1013_v21  ;;  %v1016_v32 = vadd.f32 %v1015_v30, %v3969_v54  ;;  %3301 = vmatmul.mubr.msk.bf16.vlgmr.msra.gmra.mrb[32].mxu1 %vm160_vm0, %v1108_v10  ;;  %vm1063_vm9 = vcmp.gt.f32.partialorder %v1013_v21, 0.0 }
 0x2d0   :  { %vm1066_vm10 = vcmp.gt.f32.partialorder %v1024_v29, 0.0  ;;  %v1082_v33 = vmul.f32 0.2, %v1024_v29  ;;  %v1097_v35 = vsel %vm1065_vm8, %v1021_v19, %v1081_v23 }
 0x2d1   :  { %vm1064_vm11 = vcmp.gt.f32.partialorder %v1016_v32, 0.0  ;;  %v1080_v34 = vmul.f32 0.2, %v1016_v32  ;;  %v1095_v37 = vsel %vm1063_vm9, %v1013_v21, %v1079_v31 }
 0x2d2   :  { %v1098_v36 = vsel %vm1066_vm10, %v1024_v29, %v1082_v33 }
 0x2d3   :  { %v1110_v38 = vpack.c.bf16 %v1098_v36, %v1097_v35  ;;  %v1096_v0 = vsel %vm1064_vm11, %v1016_v32, %v1080_v34  ;;  %v3286_v39 = vpop.f32.mrb[40].mxu0  ;;  %v3999_v36 = vsub.s32 2, %v3769_v25 }
 0x2d4   :  { %v1109_v40 = vpack.c.bf16 %v1096_v0, %v1095_v37  ;;  %v1037_v41 = vadd.f32 %v3286_v39, %v3969_v54  ;;  %v1028_v42 = vpop.f32.mrb[41].mxu0 }
 0x2d5   :  { %v1029_v43 = vadd.f32 %v1028_v42, %v3969_v54  ;;  %v3287_v44 = vpop.f32.mrb[42].mxu0  ;;  %v4003_v37 = vrot.slane %v3777_v27, %v3999_v36  ;;  %v4019_v27 = vrot.slane %v3879_v57, %v3999_v36 }
 0x2d6   :  { %v1085_v55 = vmul.f32 0.2, %v1037_v41  ;;  %v1040_v56 = vadd.f32 %v3287_v44, %v3969_v54  ;;  %v1031_v58 = vpop.f32.mrb[43].mxu0  ;;  %3304 = vmatprep.mubr.msk.bf16.mxu1 %vm160_vm0, %v1109_v40  ;;  %vm1069_vm12 = vcmp.gt.f32.partialorder %v1037_v41, 0.0  ;;  %v4011_v40 = vpop.permute.xlu0 %1270 }
 0x2d7   :  { %v1083_v59 = vmul.f32 0.2, %v1029_v43  ;;  %v1032_v60 = vadd.f32 %v1031_v58, %v3969_v54  ;;  %3305 = vmatmul.mubr.msk.bf16.gmra.mrb[36].mxu1 %vm160_vm0, %v1110_v38  ;;  %vm1067_vm13 = vcmp.gt.f32.partialorder %v1029_v43, 0.0  ;;  %v638_v38 = vadd.f32 %v3935_v45, %v4003_v37  ;;  %v2547_v45 = vld [vmem:[%s4775_s2 + $0x10] sm:$0xff] }
 0x2d8   :  { %vm1070_vm14 = vcmp.gt.f32.partialorder %v1040_v56, 0.0  ;;  %v1086_v61 = vmul.f32 0.2, %v1040_v56  ;;  %v1101_v63 = vsel %vm1069_vm12, %v1037_v41, %v1085_v55  ;;  %v630_v0 = vadd.f32 %v3937_v46, %v4003_v37  ;;  %v2545_v46 = vld [vmem:[%s4775_s2] sm:$0xff] }
 0x2d9   :  { %vm1068_vm15 = vcmp.gt.f32.partialorder %v1032_v60, 0.0  ;;  %v1084_v62 = vmul.f32 0.2, %v1032_v60  ;;  %v1099_v2 = vsel %vm1067_vm13, %v1029_v43, %v1083_v59  ;;  %v641_v39 = vadd.f32 %v3939_v47, %v4003_v37 }
 0x2da   :  { %v1102_v1 = vsel %vm1070_vm14, %v1040_v56, %v1086_v61  ;;  %v633_v41 = vadd.f32 %v3941_v11, %v4003_v37  ;;  %v654_v25 = vadd.f32 %v3943_v48, %v4003_v37  ;;  %v1273_v47 = vmul.f32 %v4011_v40, %v630_v0  ;;  %v4038_v56 = vpop.permute.xlu0 %1290  ;;  %v2551_v0 = vld [vmem:[%s4775_s2 + $0x30] sm:$0xff] }
 0x2db   :  { %v1112_v4 = vpack.c.bf16 %v1102_v1, %v1101_v63  ;;  %v1100_v5 = vsel %vm1068_vm15, %v1032_v60, %v1084_v62  ;;  %v3290_v15 = vpop.f32.mrb[44].mxu0  ;;  %v1275_v42 = vmul.f32 %v4011_v40, %v638_v38  ;;  %v1276_v11 = vmul.f32 %v4011_v40, %v641_v39 }
 0x2dc   :  { %v1111_v6 = vpack.c.bf16 %v1100_v5, %v1099_v2  ;;  %v1053_v9 = vadd.f32 %v3290_v15, %v3969_v54  ;;  %v1044_v10 = vpop.f32.mrb[45].mxu0  ;;  %v1274_v48 = vmul.f32 %v4011_v40, %v633_v41  ;;  %v4032_v43 = vmul.f32 %v4011_v40, %v654_v25 }
 0x2dd   :  { %v1045_v13 = vadd.f32 %v1044_v10, %v3969_v54  ;;  %v3291_v14 = vpop.f32.mrb[46].mxu0  ;;  %v646_v57 = vadd.f32 %v3945_v49, %v4003_v37  ;;  %v657_v44 = vadd.f32 %v3947_v50, %v4003_v37  ;;  %v649_v58 = vadd.f32 %v3949_v51, %v4003_v37  ;;  %v2548_v51 = vld [vmem:[%s4775_s2 + $0x18] sm:$0xff] }
 0x2de   :  { %v1089_v18 = vmul.f32 0.2, %v1053_v9  ;;  %v1056_v19 = vadd.f32 %v3291_v14, %v3969_v54  ;;  %v1047_v20 = vpop.f32.mrb[47].mxu0  ;;  %3308 = vmatprep.mubr.msk.bf16.mxu1 %vm160_vm0, %v1111_v6  ;;  %vm1073_vm1 = vcmp.gt.f32.partialorder %v1053_v9, 0.0  ;;  %v670_v59 = vadd.f32 %v3951_v52, %v4003_v37 }
 0x2df   :  { %v1087_v21 = vmul.f32 0.2, %v1045_v13  ;;  %v1048_v22 = vadd.f32 %v1047_v20, %v3969_v54  ;;  %3309 = vmatmul.mubr.msk.bf16.gmra.mrb[40].mxu1 %vm160_vm0, %v1112_v4  ;;  %vm1071_vm2 = vcmp.gt.f32.partialorder %v1045_v13, 0.0  ;;  %v3555_v54 = vld [vmem:[%s4774_s7 + $0x18] sm:$0xff]   ;;  %v2643_v62 = vmul.f32 %v2547_v45, %v2547_v45 }
 0x2e0   :  { %vm1074_vm3 = vcmp.gt.f32.partialorder %v1056_v19, 0.0  ;;  %v1090_v23 = vmul.f32 0.2, %v1056_v19  ;;  %v1105_v30 = vsel %vm1073_vm1, %v1053_v9, %v1089_v18  ;;  %3322 = vmatprep.subr.bf16.mxu0 %v3555_v54  ;;  %v662_v63 = vadd.f32 %v3953_v3, %v4003_v37 }
 0x2e1   :  { %vm1072_vm4 = vcmp.gt.f32.partialorder %v1048_v22, 0.0  ;;  %v1088_v29 = vmul.f32 0.2, %v1048_v22  ;;  %v1103_v32 = vsel %vm1071_vm2, %v1045_v13, %v1087_v21  ;;  %3323 = vmatpush3.bf16.msra.mxu0 %v3555_v54  ;;  %v673_v49 = vadd.f32 %v3955_v7, %v4003_v37 }
 0x2e2   :  { %v1106_v31 = vsel %vm1074_vm3, %v1056_v19, %v1090_v23  ;;  %v2641_v2 = vmul.f32 %v2545_v46, %v2545_v46 }
 0x2e3   :  { %v1114_v33 = vpack.c.bf16 %v1106_v31, %v1105_v30  ;;  %v1104_v34 = vsel %vm1072_vm4, %v1048_v22, %v1088_v29  ;;  %v1277_v29 = vmul.f32 %v4011_v40, %v646_v57  ;;  %v1280_v30 = vmul.f32 %v4011_v40, %v657_v44  ;;  %v4099_v44 = vld [vmem:[%s4775_s2 + $0x20] sm:$0xff] }
 0x2e4   :  { %v1113_v35 = vpack.c.bf16 %v1104_v34, %v1103_v32  ;;  %v665_v31 = vadd.f32 %v3957_v8, %v4003_v37  ;;  %v4070_v34 = vmul.f32 %v4011_v40, %v670_v59  ;;  %v4079_v39 = vmul.f32 %v4011_v40, %v673_v49 }
 0x2e6   :  { %3312 = vmatprep.mubr.msk.bf16.mxu1 %vm160_vm0, %v1113_v35  ;;  %v4073_v35 = vmul.f32 %v4011_v40, %v662_v63 }
 0x2e7   :  { %3313 = vmatmul.mubr.msk.bf16.gmra.mrb[44].mxu1 %vm160_vm0, %v1114_v33  ;;  %v1278_v33 = vmul.f32 %v4011_v40, %v649_v58 }
 0x3a2   :  { %v3302_v55 = vpop.f32.mrb[32].mxu1 }
 0x3a3   :  { %v1210_v60 = vadd.f32 %v3302_v55, %v4019_v27  ;;  %v1201_v61 = vpop.f32.mrb[33].mxu1  ;;  %v4102_v55 = vmul.f32 %v4011_v40, %v665_v31 }
 0x3a4   :  { %v1202_v50 = vadd.f32 %v1201_v61, %v4019_v27  ;;  %v3303_v1 = vpop.f32.mrb[34].mxu1 }
 0x3a5   :  { %v1213_v52 = vadd.f32 %v3303_v1, %v4019_v27  ;;  %v1204_v4 = vpop.f32.mrb[35].mxu1  ;;  %v2563_v5 = vmul.f32 %v2547_v45, %v1210_v60  ;;  %v2627_v15 = vmul.f32 %v1210_v60, %v1210_v60  ;;  %v1295_v6 = vmul.f32 %v4038_v56, %v1210_v60 }
 0x3a6   :  { %v4056_v3 = vadd.f32 %v1204_v4, %v4019_v27  ;;  %v2561_v9 = vmul.f32 %v2545_v46, %v1202_v50  ;;  %v1293_v7 = vmul.f32 %v4038_v56, %v1202_v50  ;;  %v2625_v10 = vmul.f32 %v1202_v50, %v1202_v50  ;;  %v2546_v46 = vld [vmem:[%s4775_s2 + $0x8] sm:$0xff] }
 0x3a7   :  { %v2583_v13 = vsel %vm160_vm0, %v2563_v5, 0.0  ;;  %v2659_v14 = vadd.f32 %v2643_v62, %v2627_v15  ;;  %v2564_v18 = vmul.f32 %v2548_v51, %v1213_v52  ;;  %v1296_v19 = vmul.f32 %v4038_v56, %v1213_v52 }
 0x3a8   :  { %v1294_v20 = vmul.f32 %v4038_v56, %v4056_v3  ;;  %2584 = vadd.xlane.f32.xlu0 %v2583_v13  ;;  %v2577_v21 = vsel %vm160_vm0, %v2561_v9, 0.0  ;;  %v1309_v22 = vadd.f32 %v1293_v7, %v1273_v47  ;;  %v1311_v23 = vadd.f32 %v1295_v6, %v1275_v42 }
 0x3a9   :  { %2578 = vadd.xlane.f32.xlu1 %v2577_v21  ;;  %v1312_v32 = vadd.f32 %v1296_v19, %v1276_v11  ;;  %v2679_v25 = vsel %vm160_vm0, %v2659_v14, 0.0  ;;  %v2586_v11 = vsel %vm160_vm0, %v2564_v18, 0.0  ;;  %v2657_v57 = vadd.f32 %v2641_v2, %v2625_v10 }
 0x3aa   :  { %v1310_v54 = vadd.f32 %v1294_v20, %v1274_v48  ;;  %v3306_v38 = vpop.f32.mrb[36].mxu1  ;;  %v2562_v49 = vmul.f32 %v2546_v46, %v4056_v3  ;;  %v2644_v50 = vmul.f32 %v2548_v51, %v2548_v51  ;;  %v2628_v9 = vmul.f32 %v1213_v52, %v1213_v52  ;;  %v4140_v52 = vld [vmem:[%s4775_s2 + $0x50] sm:$0xff] }
 0x3ab   :  { %v4082_v8 = vadd.f32 %v3306_v38, %v4019_v27  ;;  %v1217_v41 = vpop.f32.mrb[37].mxu1  ;;  %v4085_v45 = vpack.c.bf16 %v1312_v32, %v1311_v23  ;;  %v2673_v51 = vsel %vm160_vm0, %v2657_v57, 0.0  ;;  %v678_v7 = vadd.f32 %v3961_v17, %v4003_v37  ;;  %v4147_v17 = vld [vmem:[%s4775_s2 + $0x58] sm:$0xff] }
 0x3ac   :  { %v4091_v47 = vadd.f32 %v1217_v41, %v4019_v27  ;;  %v3307_v42 = vpop.f32.mrb[38].mxu1  ;;  %2680 = vadd.xlane.f32.xlu0 %v2679_v25  ;;  %v4094_v48 = vpack.c.bf16 %v1310_v54, %v1309_v22  ;;  %v689_v10 = vadd.f32 %v3963_v28, %v4003_v37  ;;  %v681_v14 = vadd.f32 %v3965_v53, %v4003_v37  ;;  %v4158_v22 = vld [vmem:[%s4775_s2 + $0x40] sm:$0xff] }
 0x3ad   :  { %v1299_v58 = vmul.f32 %v4038_v56, %v4082_v8  ;;  %v4107_v59 = vadd.f32 %v3307_v42, %v4019_v27  ;;  %v1220_v60 = vpop.f32.mrb[39].mxu1  ;;  %2587 = vadd.xlane.f32.xlu1 %v2586_v11  ;;  %v2567_v61 = vmul.f32 %v2551_v0, %v4082_v8  ;;  %v2642_v20 = vmul.f32 %v2546_v46, %v2546_v46 }
 0x3ae   :  { %v1297_v62 = vmul.f32 %v4038_v56, %v4091_v47  ;;  %v4113_v63 = vadd.f32 %v1220_v60, %v4019_v27  ;;  %3324 = vmatprep.mubr.msk.bf16.mxu0 %vm160_vm0, %v4094_v48  ;;  %v2565_v5 = vmul.f32 %v4099_v44, %v4091_v47  ;;  %v2660_v32 = vadd.f32 %v2644_v50, %v2628_v9 }
 0x3af   :  { %v1315_v1 = vadd.f32 %v1299_v58, %v4032_v43  ;;  %v1300_v2 = vmul.f32 %v4038_v56, %v4107_v59  ;;  %3325 = vmatmul.mubr.msk.bf16.vlgmr.msra.gmra.mrb[48].mxu0 %vm160_vm0, %v4085_v45  ;;  %v2595_v4 = vsel %vm160_vm0, %v2567_v61, 0.0  ;;  %v686_v43 = vadd.f32 %v3959_v16, %v4003_v37 }
 0x3b0   :  { %v1313_v15 = vadd.f32 %v1297_v62, %v1277_v29  ;;  %v1298_v6 = vmul.f32 %v4038_v56, %v4113_v63  ;;  %2596 = vadd.xlane.f32.xlu0 %v2595_v4  ;;  %v2626_v16 = vmul.f32 %v4056_v3, %v4056_v3  ;;  %v2589_v37 = vsel %vm160_vm0, %v2565_v5, 0.0 }
 0x3b1   :  { %v1316_v13 = vadd.f32 %v1300_v2, %v1280_v30  ;;  %2674 = vadd.xlane.f32.xlu1 %v2673_v51  ;;  %v2647_v3 = vmul.f32 %v2551_v0, %v2551_v0  ;;  %v2580_v30 = vsel %vm160_vm0, %v2562_v49, 0.0  ;;  %v2652_v41 = vmul.f32 %v4147_v17, %v4147_v17  ;;  %v4206_v51 = vld [vmem:[%s4775_s2 + $0x78] sm:$0xff] }
 0x3b2   :  { %v1314_v18 = vadd.f32 %v1298_v6, %v1278_v33  ;;  %v3310_v19 = vpop.f32.mrb[40].mxu1  ;;  %v2658_v11 = vadd.f32 %v2642_v20, %v2626_v16  ;;  %v2682_v50 = vsel %vm160_vm0, %v2660_v32, 0.0  ;;  %v1285_v4 = vmul.f32 %v4011_v40, %v678_v7 }
 0x3b3   :  { %v4150_v28 = vadd.f32 %v3310_v19, %v4019_v27  ;;  %v1233_v53 = vpop.f32.mrb[41].mxu1  ;;  %v4153_v21 = vpack.c.bf16 %v1316_v13, %v1315_v1  ;;  %v1287_v1 = vmul.f32 %v4011_v40, %v686_v43  ;;  %v1288_v5 = vmul.f32 %v4011_v40, %v689_v10  ;;  %v4227_v19 = vld [vmem:[%s4775_s2 + $0x60] sm:$0xff] }
 0x3b4   :  { %v4161_v23 = vadd.f32 %v1233_v53, %v4019_v27  ;;  %v3311_v29 = vpop.f32.mrb[42].mxu1  ;;  %2590 = vadd.xlane.f32.xlu0 %v2589_v37  ;;  %v4164_v31 = vpack.c.bf16 %v1314_v18, %v1313_v15  ;;  %v2676_v18 = vsel %vm160_vm0, %v2658_v11, 0.0  ;;  %v2656_v37 = vmul.f32 %v4206_v51, %v4206_v51 }
 0x3b5   :  { %v1303_v33 = vmul.f32 %v4038_v56, %v4150_v28  ;;  %v4169_v54 = vadd.f32 %v3311_v29, %v4019_v27  ;;  %v1236_v38 = vpop.f32.mrb[43].mxu1  ;;  %2581 = vadd.xlane.f32.xlu1 %v2580_v30  ;;  %v2571_v0 = vmul.f32 %v4140_v52, %v4150_v28  ;;  %v2645_v29 = vmul.f32 %v4099_v44, %v4099_v44 }
 0x3b6   :  { %v1301_v25 = vmul.f32 %v4038_v56, %v4161_v23  ;;  %v4178_v46 = vadd.f32 %v1236_v38, %v4019_v27  ;;  %3328 = vmatprep.mubr.msk.bf16.mxu0 %vm160_vm0, %v4164_v31  ;;  %v2569_v42 = vmul.f32 %v4158_v22, %v4161_v23 }
 0x3b7   :  { %v1319_v57 = vadd.f32 %v1303_v33, %v4070_v34  ;;  %v1304_v58 = vmul.f32 %v4038_v56, %v4169_v54  ;;  %3329 = vmatmul.mubr.msk.bf16.gmra.mrb[52].mxu0 %vm160_vm0, %v4153_v21  ;;  %v2607_v60 = vsel %vm160_vm0, %v2571_v0, 0.0  ;;  %v2636_v61 = vmul.f32 %v4169_v54, %v4169_v54 }
 0x3b8   :  { %v1317_v62 = vadd.f32 %v1301_v25, %v4073_v35  ;;  %v1302_v49 = vmul.f32 %v4038_v56, %v4178_v46  ;;  %2608 = vadd.xlane.f32.xlu0 %v2607_v60  ;;  %v2631_v34 = vmul.f32 %v4082_v8, %v4082_v8  ;;  %v1286_v8 = vmul.f32 %v4011_v40, %v681_v14 }
 0x3b9   :  { %v1320_v2 = vadd.f32 %v1304_v58, %v4079_v39  ;;  %2683 = vadd.xlane.f32.xlu1 %v2682_v50  ;;  %v2668_v6 = vadd.f32 %v2652_v41, %v2636_v61  ;;  %v2601_v43 = vsel %vm160_vm0, %v2569_v42, 0.0  ;;  %v4258_v41 = vld [vmem:[%s4775_s2 + $0x68] sm:$0xff] }
 0x3ba   :  { %v1318_v35 = vadd.f32 %v1302_v49, %v4102_v55  ;;  %v3314_v15 = vpop.f32.mrb[44].mxu1  ;;  %v2552_v55 = vld [vmem:[%s4775_s2 + $0x38] sm:$0xff]  ;;  %v2663_v14 = vadd.f32 %v2647_v3, %v2631_v34  ;;  %v2654_v61 = vmul.f32 %v4258_v41, %v4258_v41 }
 0x3bb   :  { %v4210_v9 = vadd.f32 %v3314_v15, %v4019_v27  ;;  %v1249_v39 = vpop.f32.mrb[45].mxu1  ;;  %v4213_v7 = vpack.c.bf16 %v1320_v2, %v1319_v57  ;;  %v2706_v32 = vsel %vm160_vm0, %v2668_v6, 0.0  ;;  %v2568_v33 = vmul.f32 %v2552_v55, %v4107_v59  ;;  %v2550_v2 = vld [vmem:[%s4775_s2 + $0x28] sm:$0xff]  ;;  %v2559_v6 = vld [vmem:[%s4775_s2 + $0x70] sm:$0xff] }
 0x3bc   :  { %v4219_v10 = vadd.f32 %v1249_v39, %v4019_v27  ;;  %v3315_v13 = vpop.f32.mrb[46].mxu1  ;;  %2602 = vadd.xlane.f32.xlu0 %v2601_v43  ;;  %v4222_v40 = vpack.c.bf16 %v1318_v35, %v1317_v62  ;;  %v2691_v11 = vsel %vm160_vm0, %v2663_v14, 0.0  ;;  %v2629_v57 = vmul.f32 %v4091_v47, %v4091_v47 }
 0x3bd   :  { %v1307_v16 = vmul.f32 %v4038_v56, %v4210_v9  ;;  %v4232_v20 = vadd.f32 %v3315_v13, %v4019_v27  ;;  %v1252_v53 = vpop.f32.mrb[47].mxu1  ;;  %2677 = vadd.xlane.f32.xlu1 %v2676_v18  ;;  %v2598_v34 = vsel %vm160_vm0, %v2568_v33, 0.0  ;;  %v2566_v15 = vmul.f32 %v2550_v2, %v4113_v63 }
 0x3be   :  { %v1305_v3 = vmul.f32 %v4038_v56, %v4219_v10  ;;  %v4241_v30 = vadd.f32 %v1252_v53, %v4019_v27  ;;  %3332 = vmatprep.mubr.msk.bf16.mxu0 %vm160_vm0, %v4222_v40  ;;  %v2573_v44 = vmul.f32 %v4227_v19, %v4219_v10  ;;  %v2661_v47 = vadd.f32 %v2645_v29, %v2629_v57 }
 0x3bf   :  { %v1323_v38 = vadd.f32 %v1307_v16, %v1287_v1  ;;  %v1308_v0 = vmul.f32 %v4038_v56, %v4232_v20  ;;  %3333 = vmatmul.mubr.msk.bf16.gmra.mrb[56].mxu0 %vm160_vm0, %v4213_v7  ;;  %v2640_v27 = vmul.f32 %v4232_v20, %v4232_v20  ;;  %v2648_v39 = vmul.f32 %v2552_v55, %v2552_v55 }
 0x3c0   :  { %v1321_v25 = vadd.f32 %v1305_v3, %v1285_v4  ;;  %v1306_v42 = vmul.f32 %v4038_v56, %v4241_v30  ;;  %2707 = vadd.xlane.f32.xlu0 %v2706_v32  ;;  %v2613_v62 = vsel %vm160_vm0, %v2573_v44, 0.0  ;;  %v2638_v56 = vmul.f32 %v4241_v30, %v4241_v30 }
 0x3c1   :  { %v1324_v58 = vadd.f32 %v1308_v0, %v1288_v5  ;;  %2692 = vadd.xlane.f32.xlu1 %v2691_v11  ;;  %v2672_v50 = vadd.f32 %v2656_v37, %v2640_v27  ;;  %v2685_v35 = vsel %vm160_vm0, %v2661_v47, 0.0  ;;  %v2575_v13 = vmul.f32 %v2559_v6, %v4210_v9  ;;  %v2554_v27 = vld [vmem:[%s4775_s2 + $0x48] sm:$0xff]  ;;  %v3558_v47 = vld [vmem:[%s4776_s8 + $0x10] sm:$0xff]  }
 0x3c2   :  { %v1322_v60 = vadd.f32 %v1306_v42, %v1286_v8  ;;  %v2670_v5 = vadd.f32 %v2654_v61, %v2638_v56  ;;  %v2632_v8 = vmul.f32 %v4107_v59, %v4107_v59  ;;  %v2592_v18 = vsel %vm160_vm0, %v2566_v15, 0.0 }
 0x3c3   :  { %v4268_v49 = vpack.c.bf16 %v1324_v58, %v1323_v38  ;;  %v2718_v4 = vsel %vm160_vm0, %v2672_v50, 0.0  ;;  %v2630_v16 = vmul.f32 %v4113_v63, %v4113_v63  ;;  %v2646_v53 = vmul.f32 %v2550_v2, %v2550_v2 }
 0x3c4   :  { %2614 = vadd.xlane.f32.xlu0 %v2613_v62  ;;  %v4273_v1 = vpack.c.bf16 %v1322_v60, %v1321_v25  ;;  %v2712_v43 = vsel %vm160_vm0, %v2670_v5, 0.0  ;;  %v2664_v14 = vadd.f32 %v2648_v39, %v2632_v8  ;;  %v2619_v37 = vsel %vm160_vm0, %v2575_v13, 0.0  ;;  %v3563_v5 = vld [vmem:[%s4776_s8 + $0x38] sm:$0xff]  }
 0x3c5   :  { %2599 = vadd.xlane.f32.xlu1 %v2598_v34  ;;  %v2662_v55 = vadd.f32 %v2646_v53, %v2630_v16  ;;  %v2635_v29 = vmul.f32 %v4150_v28, %v4150_v28  ;;  %v2651_v3 = vmul.f32 %v4140_v52, %v4140_v52  ;;  %v2572_v38 = vmul.f32 %v4147_v17, %v4169_v54 }
 0x3c6   :  { %3336 = vmatprep.mubr.msk.bf16.mxu0 %vm160_vm0, %v4273_v1  ;;  %v2694_v59 = vsel %vm160_vm0, %v2664_v14, 0.0  ;;  %v2633_v0 = vmul.f32 %v4161_v23, %v4161_v23  ;;  %v2649_v44 = vmul.f32 %v4158_v22, %v4158_v22  ;;  %v2570_v42 = vmul.f32 %v2554_v27, %v4178_v46 }
 0x3c7   :  { %3337 = vmatmul.mubr.msk.bf16.gmra.mrb[60].mxu0 %vm160_vm0, %v4268_v49  ;;  %v2688_v32 = vsel %vm160_vm0, %v2662_v55, 0.0  ;;  %v2667_v33 = vadd.f32 %v2651_v3, %v2635_v29  ;;  %v2610_v28 = vsel %vm160_vm0, %v2572_v38, 0.0  ;;  %v2634_v17 = vmul.f32 %v4178_v46, %v4178_v46  ;;  %v3568_v55 = vld [vmem:[%s4778_s9] sm:$0xff]   ;;  %v3569_v3 = vld [vmem:[%s4778_s9 + $0x8] sm:$0xff]   ;;  %v3570_v38 = vld [vmem:[%s4778_s9 + $0x10] sm:$0xff]  }
 0x3c8   :  { %2719 = vadd.xlane.f32.xlu0 %v2718_v4  ;;  %v2665_v52 = vadd.f32 %v2649_v44, %v2633_v0  ;;  %v2650_v23 = vmul.f32 %v2554_v27, %v2554_v27  ;;  %v2604_v22 = vsel %vm160_vm0, %v2570_v42, 0.0  ;;  %v2639_v11 = vmul.f32 %v4210_v9, %v4210_v9  ;;  %v3556_v9 = vld [vmem:[%s4776_s8] sm:$0xff]   ;;  %3372 = vmatprep.subr.bf16.mxu0 %v3568_v55 }
 0x3c9   :  { %2686 = vadd.xlane.f32.xlu1 %v2685_v35  ;;  %v2703_v63 = vsel %vm160_vm0, %v2667_v33, 0.0  ;;  %v2655_v57 = vmul.f32 %v2559_v6, %v2559_v6  ;;  %v2637_v58 = vmul.f32 %v4219_v10, %v4219_v10  ;;  %v2653_v60 = vmul.f32 %v4227_v19, %v4227_v19  ;;  %3340 = vmatprep.subr.bf16.mxu1 %v3556_v9  ;;  %v3557_v19 = vld [vmem:[%s4776_s8 + $0x8] sm:$0xff]   ;;  %v3560_v4 = vld [vmem:[%s4776_s8 + $0x20] sm:$0xff]  }
 0x3ca   :  { %v2697_v25 = vsel %vm160_vm0, %v2665_v52, 0.0  ;;  %v2666_v54 = vadd.f32 %v2650_v23, %v2634_v17  ;;  %v2574_v10 = vmul.f32 %v4258_v41, %v4241_v30  ;;  %3341 = vmatpush3.bf16.msra.mxu1 %v3556_v9  ;;  %v2576_v2 = vmul.f32 %v4206_v51, %v4232_v20  ;;  %v3559_v41 = vld [vmem:[%s4776_s8 + $0x18] sm:$0xff]   ;;  %v3561_v51 = vld [vmem:[%s4776_s8 + $0x28] sm:$0xff]   ;;  %v3562_v20 = vld [vmem:[%s4776_s8 + $0x30] sm:$0xff]   ;;  %3373 = vmatpush3.bf16.msra.mxu0 %v3568_v55 }
 0x3cb   :  { %v2671_v62 = vadd.f32 %v2655_v57, %v2639_v11  ;;  %v2669_v46 = vadd.f32 %v2653_v60, %v2637_v58  ;;  %3342 = vmatprep.subr.bf16.mxu1 %v3557_v19  ;;  %v4360_v35 = vld [vmem:[%s4774_s7 + $0x20] sm:$0xff]   ;;  %v4364_v15 = vand.u32 127, %v92_v24  ;;  %3374 = vmatprep.subr.bf16.mxu0 %v3569_v3  ;;  %v3571_v52 = vld [vmem:[%s4778_s9 + $0x18] sm:$0xff]   ;;  %v3573_v11 = vld [vmem:[%s4778_s9 + $0x28] sm:$0xff]  }
 0x3cc   :  { %2713 = vadd.xlane.f32.xlu0 %v2712_v43  ;;  %v2700_v61 = vsel %vm160_vm0, %v2666_v54, 0.0  ;;  %v2616_v34 = vsel %vm160_vm0, %v2574_v10, 0.0  ;;  %v2622_v30 = vsel %vm160_vm0, %v2576_v2, 0.0  ;;  %v3572_v42 = vld [vmem:[%s4778_s9 + $0x20] sm:$0xff]  }
 0x3cd   :  { %2593 = vadd.xlane.f32.xlu1 %v2592_v18  ;;  %v2715_v50 = vsel %vm160_vm0, %v2671_v62, 0.0  ;;  %v2709_v56 = vsel %vm160_vm0, %v2669_v46, 0.0  ;;  %vm2724_vm5 = vcmp.eq.s32.totalorder %v4364_v15, 1  ;;  %vm2723_vm6 = vcmp.eq.s32.totalorder %v4364_v15, 0 }
 0x3ce   :  { %3343 = vmatpush3.bf16.msra.mxu1 %v3557_v19  ;;  %3375 = vmatpush3.bf16.msra.mxu0 %v3569_v3 }
 0x3cf   :  { %3344 = vmatprep.subr.bf16.mxu1 %v3558_v47  ;;  %3376 = vmatprep.subr.bf16.mxu0 %v3570_v38 }
 0x3d0   :  { %2620 = vadd.xlane.f32.xlu0 %v2619_v37 }
 0x3d1   :  { %2695 = vadd.xlane.f32.xlu1 %v2694_v59 }
 0x3d2   :  { %3345 = vmatpush3.bf16.msra.mxu1 %v3558_v47  ;;  %3377 = vmatpush3.bf16.msra.mxu0 %v3570_v38 }
 0x3d3   :  { %3346 = vmatprep.subr.bf16.mxu1 %v3559_v41  ;;  %3378 = vmatprep.subr.bf16.mxu0 %v3571_v52 }
 0x3d5   :  { %2689 = vadd.xlane.f32.xlu1 %v2688_v32 }
 0x3d6   :  { %3347 = vmatpush3.bf16.msra.mxu1 %v3559_v41  ;;  %3379 = vmatpush3.bf16.msra.mxu0 %v3571_v52 }
 0x3d7   :  { %3348 = vmatprep.subr.bf16.mxu1 %v3560_v4  ;;  %3380 = vmatprep.subr.bf16.mxu0 %v3572_v42 }
 0x3d9   :  { %2704 = vadd.xlane.f32.xlu1 %v2703_v63 }
 0x3da   :  { %3349 = vmatpush3.bf16.msra.mxu1 %v3560_v4  ;;  %3381 = vmatpush3.bf16.msra.mxu0 %v3572_v42 }
 0x3db   :  { %3350 = vmatprep.subr.bf16.mxu1 %v3561_v51  ;;  %3382 = vmatprep.subr.bf16.mxu0 %v3573_v11 }
 0x3dd   :  { %2611 = vadd.xlane.f32.xlu1 %v2610_v28 }
 0x3de   :  { %3351 = vmatpush3.bf16.msra.mxu1 %v3561_v51  ;;  %3383 = vmatpush3.bf16.msra.mxu0 %v3573_v11 }
 0x3df   :  { %3352 = vmatprep.subr.bf16.mxu1 %v3562_v20 }
 0x3e1   :  { %2698 = vadd.xlane.f32.xlu1 %v2697_v25 }
 0x3e2   :  { %3353 = vmatpush3.bf16.msra.mxu1 %v3562_v20 }
 0x3e3   :  { %3354 = vmatprep.subr.bf16.mxu1 %v3563_v5 }
 0x3e5   :  { %2605 = vadd.xlane.f32.xlu1 %v2604_v22 }
 0x3e6   :  { %3355 = vmatpush3.bf16.msra.mxu1 %v3563_v5 }
 0x3e7   :  { %3404 = vmatprep.subr.bf16.mxu1 %v4360_v35 }
 0x3e9   :  { %2701 = vadd.xlane.f32.xlu1 %v2700_v61 }
 0x3ed   :  { %2716 = vadd.xlane.f32.xlu1 %v2715_v50 }
 0x3f1   :  { %2710 = vadd.xlane.f32.xlu1 %v2709_v56 }
 0x3f5   :  { %2617 = vadd.xlane.f32.xlu1 %v2616_v34 }
 0x3f9   :  { %2623 = vadd.xlane.f32.xlu1 %v2622_v30 }
 0x435   :  { %v2585_v6 = vpop.xlane.xlu0 %2584 }
 0x436   :  { %v2579_v8 = vpop.xlane.xlu1 %2578 }
 0x439   :  { %v2681_v39 = vpop.xlane.xlu0 %2680 }
 0x43a   :  { %v2727_v43 = vsel %vm2724_vm5, %v2681_v39, 0.0  ;;  %v2588_v13 = vpop.xlane.xlu1 %2587 }
 0x43b   :  { %v2743_v18 = vsel %vm2723_vm6, %v2585_v6, %v2727_v43 }
 0x43c   :  { %2759 = vst [vmem:[%s4777_s13 + $0x10] sm:$0xff] %v2743_v18 }
 0x43d   :  { %v2597_v33 = vpop.xlane.xlu0 %2596 }
 0x43e   :  { %v2675_v24 = vpop.xlane.xlu1 %2674 }
 0x43f   :  { %v2725_v14 = vsel %vm2724_vm5, %v2675_v24, 0.0 }
 0x440   :  { %v2741_v16 = vsel %vm2723_vm6, %v2579_v8, %v2725_v14 }
 0x441   :  { %2757 = vst [vmem:[%s4777_s13] sm:$0xff] %v2741_v16  ;;  %v2591_v25 = vpop.xlane.xlu0 %2590 }
 0x442   :  { %v2582_v53 = vpop.xlane.xlu1 %2581 }
 0x445   :  { %v2609_v22 = vpop.xlane.xlu0 %2608 }
 0x446   :  { %v2684_v37 = vpop.xlane.xlu1 %2683 }
 0x447   :  { %v2728_v59 = vsel %vm2724_vm5, %v2684_v37, 0.0  ;;  %v4477_v37 = vld [vmem:[%s4779_s10] sm:$0x7] }
 0x448   :  { %v2744_v29 = vsel %vm2723_vm6, %v2588_v13, %v2728_v59 }
 0x449   :  { %2760 = vst [vmem:[%s4777_s13 + $0x18] sm:$0xff] %v2744_v29  ;;  %v2603_v60 = vpop.xlane.xlu0 %2602  ;;  %v4486_v29 = vrot.slane %v4477_v37, %v3772_v26 }
 0x44a   :  { %v2678_v32 = vpop.xlane.xlu1 %2677 }
 0x44b   :  { %v2726_v63 = vsel %vm2724_vm5, %v2678_v32, 0.0 }
 0x44c   :  { %v2742_v0 = vsel %vm2723_vm6, %v2582_v53, %v2726_v63 }
 0x44d   :  { %2758 = vst [vmem:[%s4777_s13 + $0x8] sm:$0xff] %v2742_v0  ;;  %v2708_v56 = vpop.xlane.xlu0 %2707 }
 0x44e   :  { %v2693_v44 = vpop.xlane.xlu1 %2692  ;;  %v2736_v30 = vsel %vm2724_vm5, %v2708_v56, 0.0 }
 0x44f   :  { %v2731_v28 = vsel %vm2724_vm5, %v2693_v44, 0.0 }
 0x450   :  { %v2747_v27 = vsel %vm2723_vm6, %v2597_v33, %v2731_v28 }
 0x451   :  { %2763 = vst [vmem:[%s4777_s13 + $0x30] sm:$0xff] %v2747_v27  ;;  %v2615_v2 = vpop.xlane.xlu0 %2614 }
 0x452   :  { %v2600_v17 = vpop.xlane.xlu1 %2599 }
 0x455   :  { %v2720_v20 = vpop.xlane.xlu0 %2719 }
 0x456   :  { %v2687_v23 = vpop.xlane.xlu1 %2686 }
 0x457   :  { %v2729_v54 = vsel %vm2724_vm5, %v2687_v23, 0.0 }
 0x458   :  { %v2745_v57 = vsel %vm2723_vm6, %v2591_v25, %v2729_v54 }
 0x459   :  { %2761 = vst [vmem:[%s4777_s13 + $0x20] sm:$0xff] %v2745_v57  ;;  %v2714_v39 = vpop.xlane.xlu0 %2713 }
 0x45a   :  { %v2594_v58 = vpop.xlane.xlu1 %2593  ;;  %v2738_v32 = vsel %vm2724_vm5, %v2714_v39, 0.0 }
 0x45d   :  { %v2621_v14 = vpop.xlane.xlu0 %2620 }
 0x45e   :  { %v2696_v61 = vpop.xlane.xlu1 %2695 }
 0x45f   :  { %v2732_v62 = vsel %vm2724_vm5, %v2696_v61, 0.0 }
 0x460   :  { %v2748_v46 = vsel %vm2723_vm6, %v2600_v17, %v2732_v62  ;;  %v2740_v17 = vsel %vm2724_vm5, %v2720_v20, 0.0 }
 0x461   :  { %2764 = vst [vmem:[%s4777_s13 + $0x38] sm:$0xff] %v2748_v46 }
 0x462   :  { %v2690_v50 = vpop.xlane.xlu1 %2689 }
 0x463   :  { %v2730_v9 = vsel %vm2724_vm5, %v2690_v50, 0.0 }
 0x464   :  { %v2746_v10 = vsel %vm2723_vm6, %v2594_v58, %v2730_v9 }
 0x465   :  { %2762 = vst [vmem:[%s4777_s13 + $0x28] sm:$0xff] %v2746_v10 }
 0x466   :  { %v2705_v19 = vpop.xlane.xlu1 %2704 }
 0x467   :  { %v2735_v34 = vsel %vm2724_vm5, %v2705_v19, 0.0 }
 0x468   :  { %v2751_v47 = vsel %vm2723_vm6, %v2609_v22, %v2735_v34 }
 0x469   :  { %2767 = vst [vmem:[%s4777_s13 + $0x50] sm:$0xff] %v2751_v47  ;;  %v3565_v47 = vld [vmem:[%s4774_s7 + $0x28] sm:$0xff]  }
 0x46a   :  { %v2612_v41 = vpop.xlane.xlu1 %2611 }
 0x46b   :  { %v2752_v4 = vsel %vm2723_vm6, %v2612_v41, %v2736_v30 }
 0x46c   :  { %2768 = vst [vmem:[%s4777_s13 + $0x58] sm:$0xff] %v2752_v4 }
 0x46e   :  { %v2699_v51 = vpop.xlane.xlu1 %2698 }
 0x46f   :  { %v2733_v5 = vsel %vm2724_vm5, %v2699_v51, 0.0 }
 0x470   :  { %v2749_v6 = vsel %vm2723_vm6, %v2603_v60, %v2733_v5 }
 0x471   :  { %2765 = vst [vmem:[%s4777_s13 + $0x40] sm:$0xff] %v2749_v6  ;;  %v3566_v6 = vld [vmem:[%s4774_s7 + $0x30] sm:$0xff]  }
 0x472   :  { %v2606_v8 = vpop.xlane.xlu1 %2605 }
 0x476   :  { %v2702_v43 = vpop.xlane.xlu1 %2701 }
 0x477   :  { %v2734_v13 = vsel %vm2724_vm5, %v2702_v43, 0.0 }
 0x478   :  { %v2750_v18 = vsel %vm2723_vm6, %v2606_v8, %v2734_v13 }
 0x479   :  { %2766 = vst [vmem:[%s4777_s13 + $0x48] sm:$0xff] %v2750_v18 }
 0x47a   :  { %v2717_v24 = vpop.xlane.xlu1 %2716 }
 0x47b   :  { %v2739_v16 = vsel %vm2724_vm5, %v2717_v24, 0.0 }
 0x47c   :  { %v2755_v53 = vsel %vm2723_vm6, %v2621_v14, %v2739_v16 }
 0x47d   :  { %2771 = vst [vmem:[%s4777_s13 + $0x70] sm:$0xff] %v2755_v53 }
 0x47e   :  { %v2711_v59 = vpop.xlane.xlu1 %2710 }
 0x47f   :  { %v2737_v55 = vsel %vm2724_vm5, %v2711_v59, 0.0 }
 0x480   :  { %v2753_v3 = vsel %vm2723_vm6, %v2615_v2, %v2737_v55  ;;  %v3567_v55 = vld [vmem:[%s4774_s7 + $0x38] sm:$0xff]  }
 0x481   :  { %2769 = vst [vmem:[%s4777_s13 + $0x60] sm:$0xff] %v2753_v3 }
 0x482   :  { %v2618_v33 = vpop.xlane.xlu1 %2617  ;;  %v3326_v63 = vpop.f32.mrb[48].mxu0 }
 0x483   :  { %v2754_v38 = vsel %vm2723_vm6, %v2618_v33, %v2738_v32  ;;  %v1469_v0 = vadd.f32 %v3326_v63, %v4486_v29  ;;  %v1460_v44 = vpop.f32.mrb[49].mxu0 }
 0x484   :  { %2770 = vst [vmem:[%s4777_s13 + $0x68] sm:$0xff] %v2754_v38  ;;  %v1461_v28 = vadd.f32 %v1460_v44, %v4486_v29  ;;  %v3327_v52 = vpop.f32.mrb[50].mxu0 }
 0x485   :  { %v1541_v27 = vmul.f32 0.2, %v1469_v0  ;;  %v1472_v25 = vadd.f32 %v3327_v52, %v4486_v29  ;;  %v1463_v42 = vpop.f32.mrb[51].mxu0  ;;  %vm1525_vm7 = vcmp.gt.f32.partialorder %v1469_v0, 0.0 }
 0x486   :  { %v1539_v23 = vmul.f32 0.2, %v1461_v28  ;;  %v1464_v22 = vadd.f32 %v1463_v42, %v4486_v29  ;;  %v2624_v54 = vpop.xlane.xlu1 %2623  ;;  %vm1523_vm8 = vcmp.gt.f32.partialorder %v1461_v28, 0.0 }
 0x487   :  { %vm1526_vm9 = vcmp.gt.f32.partialorder %v1472_v25, 0.0  ;;  %v1542_v11 = vmul.f32 0.2, %v1472_v25  ;;  %v2756_v57 = vsel %vm2723_vm6, %v2624_v54, %v2740_v17  ;;  %v1557_v60 = vsel %vm1525_vm7, %v1469_v0, %v1541_v27 }
 0x488   :  { %vm1524_vm10 = vcmp.gt.f32.partialorder %v1464_v22, 0.0  ;;  %v1540_v58 = vmul.f32 0.2, %v1464_v22  ;;  %2772 = vst [vmem:[%s4777_s13 + $0x78] sm:$0xff] %v2756_v57  ;;  %v1555_v50 = vsel %vm1523_vm8, %v1461_v28, %v1539_v23 }
 0x489   :  { %v1558_v61 = vsel %vm1526_vm9, %v1472_v25, %v1542_v11 }
 0x48a   :  { %v1572_v62 = vpack.c.bf16 %v1558_v61, %v1557_v60  ;;  %v3330_v46 = vpop.f32.mrb[52].mxu0  ;;  %v1556_v56 = vsel %vm1524_vm10, %v1464_v22, %v1540_v58 }
 0x48b   :  { %v1485_v9 = vadd.f32 %v3330_v46, %v4486_v29  ;;  %v1476_v10 = vpop.f32.mrb[53].mxu0  ;;  %v1571_v19 = vpack.c.bf16 %v1556_v56, %v1555_v50 }
 0x48c   :  { %v1477_v34 = vadd.f32 %v1476_v10, %v4486_v29  ;;  %v3331_v15 = vpop.f32.mrb[54].mxu0 }
 0x48d   :  { %v1545_v2 = vmul.f32 0.2, %v1485_v9  ;;  %v1488_v30 = vadd.f32 %v3331_v15, %v4486_v29  ;;  %v1479_v41 = vpop.f32.mrb[55].mxu0  ;;  %3356 = vmatprep.mubr.bf16.mxu1 %v1571_v19  ;;  %vm1529_vm11 = vcmp.gt.f32.partialorder %v1485_v9, 0.0 }
 0x48e   :  { %v1543_v4 = vmul.f32 0.2, %v1477_v34  ;;  %v1480_v51 = vadd.f32 %v1479_v41, %v4486_v29  ;;  %3357 = vmatmul.mubr.bf16.vlgmr.msra.gmra.mrb[48].mxu1 %v1572_v62  ;;  %vm1527_vm12 = vcmp.gt.f32.partialorder %v1477_v34, 0.0 }
 0x48f   :  { %vm1530_vm13 = vcmp.gt.f32.partialorder %v1488_v30, 0.0  ;;  %v1546_v20 = vmul.f32 0.2, %v1488_v30  ;;  %3405 = vmatpush3.bf16.msra.mxu1 %v4360_v35  ;;  %v1561_v8 = vsel %vm1529_vm11, %v1485_v9, %v1545_v2 }
 0x490   :  { %vm1528_vm14 = vcmp.gt.f32.partialorder %v1480_v51, 0.0  ;;  %v1544_v5 = vmul.f32 0.2, %v1480_v51  ;;  %3406 = vmatprep.subr.bf16.mxu1 %v3565_v47  ;;  %v1559_v13 = vsel %vm1527_vm12, %v1477_v34, %v1543_v4 }
 0x491   :  { %v1562_v39 = vsel %vm1530_vm13, %v1488_v30, %v1546_v20 }
 0x492   :  { %v3334_v43 = vpop.f32.mrb[56].mxu0  ;;  %v1560_v18 = vsel %vm1528_vm14, %v1480_v51, %v1544_v5  ;;  %v1574_v24 = vpack.c.bf16 %v1562_v39, %v1561_v8 }
 0x493   :  { %v1501_v14 = vadd.f32 %v3334_v43, %v4486_v29  ;;  %v1492_v16 = vpop.f32.mrb[57].mxu0  ;;  %v1573_v53 = vpack.c.bf16 %v1560_v18, %v1559_v13  ;;  %3407 = vmatpush3.bf16.msra.mxu1 %v3565_v47 }
 0x494   :  { %v1493_v35 = vadd.f32 %v1492_v16, %v4486_v29  ;;  %v3335_v59 = vpop.f32.mrb[58].mxu0  ;;  %3408 = vmatprep.subr.bf16.mxu1 %v3566_v6 }
 0x495   :  { %v1549_v3 = vmul.f32 0.2, %v1501_v14  ;;  %v1504_v32 = vadd.f32 %v3335_v59, %v4486_v29  ;;  %v1495_v33 = vpop.f32.mrb[59].mxu0  ;;  %3360 = vmatprep.mubr.bf16.mxu1 %v1573_v53  ;;  %vm1533_vm15 = vcmp.gt.f32.partialorder %v1501_v14, 0.0  ;;  %v3577_v59 = vld [vmem:[%s4776_s8 + $0x48] sm:$0xff]  }
 0x496   :  { %v1547_v63 = vmul.f32 0.2, %v1493_v35  ;;  %v1496_v38 = vadd.f32 %v1495_v33, %v4486_v29  ;;  %3361 = vmatmul.mubr.bf16.gmra.mrb[52].mxu1 %v1574_v24  ;;  %vm1531_vm1 = vcmp.gt.f32.partialorder %v1493_v35, 0.0 }
 0x497   :  { %vm1534_vm2 = vcmp.gt.f32.partialorder %v1504_v32, 0.0  ;;  %v1550_v0 = vmul.f32 0.2, %v1504_v32  ;;  %3409 = vmatpush3.bf16.msra.mxu1 %v3566_v6  ;;  %v1565_v28 = vsel %vm1533_vm15, %v1501_v14, %v1549_v3 }
 0x498   :  { %vm1532_vm3 = vcmp.gt.f32.partialorder %v1496_v38, 0.0  ;;  %v1548_v44 = vmul.f32 0.2, %v1496_v38  ;;  %3410 = vmatprep.subr.bf16.mxu1 %v3567_v55  ;;  %v1563_v25 = vsel %vm1531_vm1, %v1493_v35, %v1547_v63 }
 0x499   :  { %v1566_v52 = vsel %vm1534_vm2, %v1504_v32, %v1550_v0 }
 0x49a   :  { %v3338_v27 = vpop.f32.mrb[60].mxu0  ;;  %v1564_v42 = vsel %vm1532_vm3, %v1496_v38, %v1548_v44  ;;  %v1576_v17 = vpack.c.bf16 %v1566_v52, %v1565_v28  ;;  %v3578_v44 = vld [vmem:[%s4776_s8 + $0x50] sm:$0xff]  }
 0x49b   :  { %v1517_v23 = vadd.f32 %v3338_v27, %v4486_v29  ;;  %v1508_v22 = vpop.f32.mrb[61].mxu0  ;;  %v1575_v54 = vpack.c.bf16 %v1564_v42, %v1563_v25  ;;  %3411 = vmatpush3.bf16.msra.mxu1 %v3567_v55 }
 0x49c   :  { %v1509_v11 = vadd.f32 %v1508_v22, %v4486_v29  ;;  %v3339_v57 = vpop.f32.mrb[62].mxu0 }
 0x49d   :  { %v1553_v58 = vmul.f32 0.2, %v1517_v23  ;;  %v1520_v60 = vadd.f32 %v3339_v57, %v4486_v29  ;;  %v1511_v61 = vpop.f32.mrb[63].mxu0  ;;  %3364 = vmatprep.mubr.bf16.mxu1 %v1575_v54  ;;  %vm1537_vm4 = vcmp.gt.f32.partialorder %v1517_v23, 0.0 }
 0x49e   :  { %v1551_v62 = vmul.f32 0.2, %v1509_v11  ;;  %v1512_v46 = vadd.f32 %v1511_v61, %v4486_v29  ;;  %3365 = vmatmul.mubr.bf16.gmra.mrb[56].mxu1 %v1576_v17  ;;  %vm1535_vm5 = vcmp.gt.f32.partialorder %v1509_v11, 0.0 }
 0x49f   :  { %vm1538_vm6 = vcmp.gt.f32.partialorder %v1520_v60, 0.0  ;;  %v1554_v50 = vmul.f32 0.2, %v1520_v60  ;;  %v1569_v9 = vsel %vm1537_vm4, %v1517_v23, %v1553_v58  ;;  %v3579_v58 = vld [vmem:[%s4776_s8 + $0x58] sm:$0xff]  }
 0x4a0   :  { %vm1536_vm7 = vcmp.gt.f32.partialorder %v1512_v46, 0.0  ;;  %v1552_v56 = vmul.f32 0.2, %v1512_v46  ;;  %v1567_v19 = vsel %vm1535_vm5, %v1509_v11, %v1551_v62 }
 0x4a1   :  { %v1570_v10 = vsel %vm1538_vm6, %v1520_v60, %v1554_v50 }
 0x4a2   :  { %v1568_v34 = vsel %vm1536_vm7, %v1512_v46, %v1552_v56  ;;  %v1578_v15 = vpack.c.bf16 %v1570_v10, %v1569_v9  ;;  %v3580_v10 = vld [vmem:[%s4776_s8 + $0x60] sm:$0xff]  }
 0x4a3   :  { %v1577_v47 = vpack.c.bf16 %v1568_v34, %v1567_v19 }
 0x4a5   :  { %3368 = vmatprep.mubr.bf16.mxu1 %v1577_v47 }
 0x4a6   :  { %3369 = vmatmul.mubr.bf16.gmra.mrb[60].mxu1 %v1578_v15 }
 0x4a7   :  { %3412 = vmatprep.mubr.msk.bf16.mxu1 %vm160_vm0, %v4094_v48  ;;  %v3575_v48 = vld [vmem:[%s4778_s9 + $0x38] sm:$0xff]  }
 0x4ae   :  { %3413 = vmatmul.mubr.msk.bf16.vlgmr.msra.gmra.mrb[64].mxu1 %vm160_vm0, %v4085_v45  ;;  %v3574_v45 = vld [vmem:[%s4778_s9 + $0x30] sm:$0xff]  }
 0x4af   :  { %3416 = vmatprep.mubr.msk.bf16.mxu1 %vm160_vm0, %v4164_v31  ;;  %3384 = vmatprep.subr.bf16.mxu0 %v3574_v45  ;;  %v4560_v31 = vrot.slane %v4477_v37, %v3837_v12 }
 0x4b0   :  { %3385 = vmatpush3.bf16.msra.mxu0 %v3574_v45 }
 0x4b1   :  { %3386 = vmatprep.subr.bf16.mxu0 %v3575_v48 }
 0x4b4   :  { %3387 = vmatpush3.bf16.msra.mxu0 %v3575_v48 }
 0x4b6   :  { %3417 = vmatmul.mubr.msk.bf16.gmra.mrb[68].mxu1 %vm160_vm0, %v4153_v21  ;;  %v3576_v21 = vld [vmem:[%s4776_s8 + $0x40] sm:$0xff]  }
 0x4b7   :  { %3420 = vmatprep.mubr.msk.bf16.mxu1 %vm160_vm0, %v4222_v40  ;;  %3428 = vmatprep.subr.bf16.mxu0 %v3576_v21 }
 0x4be   :  { %3421 = vmatmul.mubr.msk.bf16.gmra.mrb[72].mxu1 %vm160_vm0, %v4213_v7 }
 0x4bf   :  { %3424 = vmatprep.mubr.msk.bf16.mxu1 %vm160_vm0, %v4273_v1 }
 0x4c6   :  { %3425 = vmatmul.mubr.msk.bf16.gmra.mrb[76].mxu1 %vm160_vm0, %v4268_v49 }
 0x561   :  { %v3358_v7 = vpop.f32.mrb[48].mxu1 }
 0x562   :  { %v1674_v40 = vadd.f32 %v3358_v7, %v4560_v31  ;;  %v1665_v49 = vpop.f32.mrb[49].mxu1 }
 0x563   :  { %v1666_v1 = vadd.f32 %v1665_v49, %v4560_v31  ;;  %v3359_v29 = vpop.f32.mrb[50].mxu1 }
 0x564   :  { %v1746_v2 = vmul.f32 0.2, %v1674_v40  ;;  %v1677_v30 = vadd.f32 %v3359_v29, %v4560_v31  ;;  %v1668_v41 = vpop.f32.mrb[51].mxu1  ;;  %vm1730_vm0 = vcmp.gt.f32.partialorder %v1674_v40, 0.0  ;;  %v3581_v29 = vld [vmem:[%s4776_s8 + $0x68] sm:$0xff]  }
 0x565   :  { %v1744_v4 = vmul.f32 0.2, %v1666_v1  ;;  %v1669_v51 = vadd.f32 %v1668_v41, %v4560_v31  ;;  %vm1728_vm8 = vcmp.gt.f32.partialorder %v1666_v1, 0.0 }
 0x566   :  { %vm1731_vm9 = vcmp.gt.f32.partialorder %v1677_v30, 0.0  ;;  %v1747_v20 = vmul.f32 0.2, %v1677_v30  ;;  %v1762_v6 = vsel %vm1730_vm0, %v1674_v40, %v1746_v2  ;;  %v4594_v2 = vld [vmem:[%s4779_s10 + $0x4] sm:$0x7] }
 0x567   :  { %vm1729_vm10 = vcmp.gt.f32.partialorder %v1669_v51, 0.0  ;;  %v1745_v5 = vmul.f32 0.2, %v1669_v51  ;;  %v1760_v13 = vsel %vm1728_vm8, %v1666_v1, %v1744_v4 }
 0x568   :  { %v1763_v8 = vsel %vm1731_vm9, %v1677_v30, %v1747_v20 }
 0x569   :  { %v1777_v39 = vpack.c.bf16 %v1763_v8, %v1762_v6  ;;  %v3362_v43 = vpop.f32.mrb[52].mxu1  ;;  %v1761_v18 = vsel %vm1729_vm10, %v1669_v51, %v1745_v5  ;;  %v4600_v6 = vrot.slane %v4594_v2, %v3772_v26 }
 0x56a   :  { %v1690_v24 = vadd.f32 %v3362_v43, %v4560_v31  ;;  %v1681_v14 = vpop.f32.mrb[53].mxu1  ;;  %v1776_v16 = vpack.c.bf16 %v1761_v18, %v1760_v13 }
 0x56b   :  { %v1682_v53 = vadd.f32 %v1681_v14, %v4560_v31  ;;  %v3363_v35 = vpop.f32.mrb[54].mxu1 }
 0x56c   :  { %v1750_v55 = vmul.f32 0.2, %v1690_v24  ;;  %v1693_v3 = vadd.f32 %v3363_v35, %v4560_v31  ;;  %v1684_v32 = vpop.f32.mrb[55].mxu1  ;;  %3388 = vmatprep.mubr.bf16.mxu0 %v1776_v16  ;;  %vm1734_vm11 = vcmp.gt.f32.partialorder %v1690_v24, 0.0 }
 0x56d   :  { %v1748_v33 = vmul.f32 0.2, %v1682_v53  ;;  %v1685_v63 = vadd.f32 %v1684_v32, %v4560_v31  ;;  %3389 = vmatmul.mubr.bf16.vlgmr.msra.gmra.mrb[64].mxu0 %v1777_v39  ;;  %vm1732_vm12 = vcmp.gt.f32.partialorder %v1682_v53, 0.0  ;;  %v3582_v39 = vld [vmem:[%s4776_s8 + $0x70] sm:$0xff]  }
 0x56e   :  { %vm1735_vm13 = vcmp.gt.f32.partialorder %v1693_v3, 0.0  ;;  %v1751_v38 = vmul.f32 0.2, %v1693_v3  ;;  %3429 = vmatpush3.bf16.msra.mxu0 %v3576_v21  ;;  %v1766_v28 = vsel %vm1734_vm11, %v1690_v24, %v1750_v55  ;;  %v3583_v55 = vld [vmem:[%s4776_s8 + $0x78] sm:$0xff]  }
 0x56f   :  { %vm1733_vm14 = vcmp.gt.f32.partialorder %v1685_v63, 0.0  ;;  %v1749_v0 = vmul.f32 0.2, %v1685_v63  ;;  %3430 = vmatprep.subr.bf16.mxu0 %v3577_v59  ;;  %v1764_v25 = vsel %vm1732_vm12, %v1682_v53, %v1748_v33 }
 0x570   :  { %v1767_v52 = vsel %vm1735_vm13, %v1693_v3, %v1751_v38 }
 0x571   :  { %v3366_v27 = vpop.f32.mrb[56].mxu1  ;;  %v1765_v42 = vsel %vm1733_vm14, %v1685_v63, %v1749_v0  ;;  %v1779_v17 = vpack.c.bf16 %v1767_v52, %v1766_v28 }
 0x572   :  { %v1706_v23 = vadd.f32 %v3366_v27, %v4560_v31  ;;  %3431 = vmatpush3.bf16.msra.mxu0 %v3577_v59  ;;  %v1697_v22 = vpop.f32.mrb[57].mxu1  ;;  %v1778_v54 = vpack.c.bf16 %v1765_v42, %v1764_v25 }
 0x573   :  { %v1698_v11 = vadd.f32 %v1697_v22, %v4560_v31  ;;  %v3367_v57 = vpop.f32.mrb[58].mxu1  ;;  %3432 = vmatprep.subr.bf16.mxu0 %v3578_v44 }
 0x574   :  { %v1754_v60 = vmul.f32 0.2, %v1706_v23  ;;  %v1709_v61 = vadd.f32 %v3367_v57, %v4560_v31  ;;  %v1700_v62 = vpop.f32.mrb[59].mxu1  ;;  %3392 = vmatprep.mubr.bf16.mxu0 %v1778_v54  ;;  %vm1738_vm15 = vcmp.gt.f32.partialorder %v1706_v23, 0.0 }
 0x575   :  { %v1752_v46 = vmul.f32 0.2, %v1698_v11  ;;  %v1701_v50 = vadd.f32 %v1700_v62, %v4560_v31  ;;  %3393 = vmatmul.mubr.bf16.gmra.mrb[68].mxu0 %v1779_v17  ;;  %vm1736_vm1 = vcmp.gt.f32.partialorder %v1698_v11, 0.0 }
 0x576   :  { %vm1739_vm2 = vcmp.gt.f32.partialorder %v1709_v61, 0.0  ;;  %v1755_v56 = vmul.f32 0.2, %v1709_v61  ;;  %3433 = vmatpush3.bf16.msra.mxu0 %v3578_v44  ;;  %v1770_v19 = vsel %vm1738_vm15, %v1706_v23, %v1754_v60 }
 0x577   :  { %vm1737_vm3 = vcmp.gt.f32.partialorder %v1701_v50, 0.0  ;;  %v1753_v9 = vmul.f32 0.2, %v1701_v50  ;;  %3434 = vmatprep.subr.bf16.mxu0 %v3579_v58  ;;  %v1768_v47 = vsel %vm1736_vm1, %v1698_v11, %v1752_v46 }
 0x578   :  { %v1771_v34 = vsel %vm1739_vm2, %v1709_v61, %v1755_v56 }
 0x579   :  { %v3370_v15 = vpop.f32.mrb[60].mxu1  ;;  %v1769_v45 = vsel %vm1737_vm3, %v1701_v50, %v1753_v9  ;;  %v1781_v48 = vpack.c.bf16 %v1771_v34, %v1770_v19 }
 0x57a   :  { %v1722_v21 = vadd.f32 %v3370_v15, %v4560_v31  ;;  %3435 = vmatpush3.bf16.msra.mxu0 %v3579_v58  ;;  %v1713_v7 = vpop.f32.mrb[61].mxu1  ;;  %v1780_v40 = vpack.c.bf16 %v1769_v45, %v1768_v47 }
 0x57b   :  { %v1714_v49 = vadd.f32 %v1713_v7, %v4560_v31  ;;  %v3371_v1 = vpop.f32.mrb[62].mxu1  ;;  %3436 = vmatprep.subr.bf16.mxu0 %v3580_v10 }
 0x57c   :  { %v1758_v30 = vmul.f32 0.2, %v1722_v21  ;;  %v1725_v41 = vadd.f32 %v3371_v1, %v4560_v31  ;;  %v1716_v4 = vpop.f32.mrb[63].mxu1  ;;  %3396 = vmatprep.mubr.bf16.mxu0 %v1780_v40  ;;  %vm1742_vm4 = vcmp.gt.f32.partialorder %v1722_v21, 0.0 }
 0x57d   :  { %v1756_v51 = vmul.f32 0.2, %v1714_v49  ;;  %v1717_v20 = vadd.f32 %v1716_v4, %v4560_v31  ;;  %3397 = vmatmul.mubr.bf16.gmra.mrb[72].mxu0 %v1781_v48  ;;  %vm1740_vm5 = vcmp.gt.f32.partialorder %v1714_v49, 0.0 }
 0x57e   :  { %vm1743_vm6 = vcmp.gt.f32.partialorder %v1725_v41, 0.0  ;;  %v1759_v5 = vmul.f32 0.2, %v1725_v41  ;;  %3437 = vmatpush3.bf16.msra.mxu0 %v3580_v10  ;;  %v1774_v43 = vsel %vm1742_vm4, %v1722_v21, %v1758_v30 }
 0x57f   :  { %vm1741_vm7 = vcmp.gt.f32.partialorder %v1717_v20, 0.0  ;;  %v1757_v8 = vmul.f32 0.2, %v1717_v20  ;;  %3438 = vmatprep.subr.bf16.mxu0 %v3581_v29  ;;  %v1772_v31 = vsel %vm1740_vm5, %v1714_v49, %v1756_v51 }
 0x580   :  { %v1775_v13 = vsel %vm1743_vm6, %v1725_v41, %v1759_v5 }
 0x581   :  { %v3414_v18 = vpop.f32.mrb[64].mxu1  ;;  %v1773_v24 = vsel %vm1741_vm7, %v1717_v20, %v1757_v8  ;;  %v1783_v14 = vpack.c.bf16 %v1775_v13, %v1774_v43 }
 0x582   :  { %v2065_v16 = vadd.f32 %v3414_v18, %v4600_v6  ;;  %3439 = vmatpush3.bf16.msra.mxu0 %v3581_v29  ;;  %v2056_v53 = vpop.f32.mrb[65].mxu1  ;;  %v1782_v35 = vpack.c.bf16 %v1773_v24, %v1772_v31 }
 0x583   :  { %v2057_v26 = vadd.f32 %v2056_v53, %v4600_v6  ;;  %v3415_v59 = vpop.f32.mrb[66].mxu1  ;;  %3440 = vmatprep.subr.bf16.mxu0 %v3582_v39 }
 0x584   :  { %v2137_v3 = vmul.f32 0.2, %v2065_v16  ;;  %v2068_v32 = vadd.f32 %v3415_v59, %v4600_v6  ;;  %3400 = vmatprep.mubr.bf16.mxu0 %v1782_v35  ;;  %v2059_v33 = vpop.f32.mrb[67].mxu1  ;;  %vm2121_vm0 = vcmp.gt.f32.partialorder %v2065_v16, 0.0 }
 0x585   :  { %v2135_v63 = vmul.f32 0.2, %v2057_v26  ;;  %v2060_v38 = vadd.f32 %v2059_v33, %v4600_v6  ;;  %3401 = vmatmul.mubr.bf16.gmra.mrb[76].mxu0 %v1783_v14  ;;  %vm2119_vm8 = vcmp.gt.f32.partialorder %v2057_v26, 0.0 }
 0x586   :  { %vm2122_vm9 = vcmp.gt.f32.partialorder %v2068_v32, 0.0  ;;  %v2138_v0 = vmul.f32 0.2, %v2068_v32  ;;  %3441 = vmatpush3.bf16.msra.mxu0 %v3582_v39  ;;  %v2153_v28 = vsel %vm2121_vm0, %v2065_v16, %v2137_v3 }
 0x587   :  { %vm2120_vm10 = vcmp.gt.f32.partialorder %v2060_v38, 0.0  ;;  %v2136_v44 = vmul.f32 0.2, %v2060_v38  ;;  %3442 = vmatprep.subr.bf16.mxu0 %v3583_v55  ;;  %v2151_v42 = vsel %vm2119_vm8, %v2057_v26, %v2135_v63 }
 0x588   :  { %v2154_v52 = vsel %vm2122_vm9, %v2068_v32, %v2138_v0 }
 0x589   :  { %v2168_v27 = vpack.c.bf16 %v2154_v52, %v2153_v28  ;;  %v3418_v25 = vpop.f32.mrb[68].mxu1  ;;  %v2152_v17 = vsel %vm2120_vm10, %v2060_v38, %v2136_v44  ;;  %v3584_v52 = vld [vmem:[%s4778_s9 + $0x40] sm:$0xff]  }
 0x58a   :  { %v2081_v23 = vadd.f32 %v3418_v25, %v4600_v6  ;;  %3443 = vmatpush3.bf16.msra.mxu0 %v3583_v55  ;;  %v2072_v22 = vpop.f32.mrb[69].mxu1  ;;  %v2167_v54 = vpack.c.bf16 %v2152_v17, %v2151_v42  ;;  %3492 = vmatprep.subr.bf16.mxu1 %v3584_v52  ;;  %v3587_v25 = vld [vmem:[%s4778_s9 + $0x58] sm:$0xff]   ;;  %v3588_v42 = vld [vmem:[%s4778_s9 + $0x60] sm:$0xff]   ;;  %v3589_v17 = vld [vmem:[%s4778_s9 + $0x68] sm:$0xff]  }
 0x58b   :  { %v2073_v11 = vadd.f32 %v2072_v22, %v4600_v6  ;;  %v3419_v57 = vpop.f32.mrb[70].mxu1  ;;  %3460 = vmatprep.subr.bf16.mxu0 %v3584_v52  ;;  %3500 = vmatpush3.bf16.msra.mxu1 %v3584_v52  ;;  %v3591_v22 = vld [vmem:[%s4778_s9 + $0x78] sm:$0xff]  }
 0x58c   :  { %v2141_v58 = vmul.f32 0.2, %v2081_v23  ;;  %v2084_v60 = vadd.f32 %v3419_v57, %v4600_v6  ;;  %v2075_v61 = vpop.f32.mrb[71].mxu1  ;;  %3444 = vmatprep.mubr.bf16.mxu0 %v2167_v54  ;;  %vm2125_vm11 = vcmp.gt.f32.partialorder %v2081_v23, 0.0  ;;  %v1787_v54 = vrot.slane %v4477_v37, %v3999_v36 }
 0x58d   :  { %v2139_v62 = vmul.f32 0.2, %v2073_v11  ;;  %v2076_v46 = vadd.f32 %v2075_v61, %v4600_v6  ;;  %3445 = vmatmul.mubr.bf16.vlgmr.msra.gmra.mrb[80].mxu0 %v2168_v27  ;;  %vm2123_vm12 = vcmp.gt.f32.partialorder %v2073_v11, 0.0  ;;  %v3586_v27 = vld [vmem:[%s4778_s9 + $0x50] sm:$0xff]  }
 0x58e   :  { %vm2126_vm13 = vcmp.gt.f32.partialorder %v2084_v60, 0.0  ;;  %v2142_v50 = vmul.f32 0.2, %v2084_v60  ;;  %v2157_v9 = vsel %vm2125_vm11, %v2081_v23, %v2141_v58  ;;  %3461 = vmatpush3.bf16.msra.mxu0 %v3584_v52  ;;  %v3590_v23 = vld [vmem:[%s4778_s9 + $0x70] sm:$0xff]  }
 0x58f   :  { %vm2124_vm14 = vcmp.gt.f32.partialorder %v2076_v46, 0.0  ;;  %v2140_v56 = vmul.f32 0.2, %v2076_v46  ;;  %v2155_v34 = vsel %vm2123_vm12, %v2073_v11, %v2139_v62 }
 0x590   :  { %v2158_v10 = vsel %vm2126_vm13, %v2084_v60, %v2142_v50 }
 0x591   :  { %v3422_v19 = vpop.f32.mrb[72].mxu1  ;;  %v2156_v15 = vsel %vm2124_vm14, %v2076_v46, %v2140_v56  ;;  %v2170_v47 = vpack.c.bf16 %v2158_v10, %v2157_v9 }
 0x592   :  { %v2097_v45 = vadd.f32 %v3422_v19, %v4600_v6  ;;  %v2088_v48 = vpop.f32.mrb[73].mxu1  ;;  %v2169_v21 = vpack.c.bf16 %v2156_v15, %v2155_v34 }
 0x593   :  { %v2089_v7 = vadd.f32 %v2088_v48, %v4600_v6  ;;  %v3423_v40 = vpop.f32.mrb[74].mxu1 }
 0x594   :  { %v2145_v49 = vmul.f32 0.2, %v2097_v45  ;;  %v2100_v1 = vadd.f32 %v3423_v40, %v4600_v6  ;;  %v2091_v29 = vpop.f32.mrb[75].mxu1  ;;  %3448 = vmatprep.mubr.bf16.mxu0 %v2169_v21  ;;  %vm2129_vm15 = vcmp.gt.f32.partialorder %v2097_v45, 0.0 }
 0x595   :  { %v2143_v30 = vmul.f32 0.2, %v2089_v7  ;;  %v2092_v41 = vadd.f32 %v2091_v29, %v4600_v6  ;;  %3449 = vmatmul.mubr.bf16.gmra.mrb[84].mxu0 %v2170_v47  ;;  %vm2127_vm1 = vcmp.gt.f32.partialorder %v2089_v7, 0.0 }
 0x596   :  { %vm2130_vm2 = vcmp.gt.f32.partialorder %v2100_v1, 0.0  ;;  %v2146_v4 = vmul.f32 0.2, %v2100_v1  ;;  %v2161_v20 = vsel %vm2129_vm15, %v2097_v45, %v2145_v49 }
 0x597   :  { %vm2128_vm3 = vcmp.gt.f32.partialorder %v2092_v41, 0.0  ;;  %v2144_v51 = vmul.f32 0.2, %v2092_v41  ;;  %v2159_v39 = vsel %vm2127_vm1, %v2089_v7, %v2143_v30 }
 0x598   :  { %v2162_v5 = vsel %vm2130_vm2, %v2100_v1, %v2146_v4 }
 0x599   :  { %v3426_v8 = vpop.f32.mrb[76].mxu1  ;;  %v2160_v43 = vsel %vm2128_vm3, %v2092_v41, %v2144_v51  ;;  %v2172_v13 = vpack.c.bf16 %v2162_v5, %v2161_v20 }
 0x59a   :  { %v2113_v18 = vadd.f32 %v3426_v8, %v4600_v6  ;;  %v2104_v31 = vpop.f32.mrb[77].mxu1  ;;  %v2171_v24 = vpack.c.bf16 %v2160_v43, %v2159_v39  ;;  %v4697_v43 = vrot.slane %v4594_v2, %v3837_v12 }
 0x59b   :  { %v2105_v14 = vadd.f32 %v2104_v31, %v4600_v6  ;;  %v3427_v16 = vpop.f32.mrb[78].mxu1 }
 0x59c   :  { %v2149_v53 = vmul.f32 0.2, %v2113_v18  ;;  %v2116_v35 = vadd.f32 %v3427_v16, %v4600_v6  ;;  %v2107_v26 = vpop.f32.mrb[79].mxu1  ;;  %3452 = vmatprep.mubr.bf16.mxu0 %v2171_v24  ;;  %vm2133_vm4 = vcmp.gt.f32.partialorder %v2113_v18, 0.0 }
 0x59d   :  { %v2147_v59 = vmul.f32 0.2, %v2105_v14  ;;  %v2108_v55 = vadd.f32 %v2107_v26, %v4600_v6  ;;  %3453 = vmatmul.mubr.bf16.gmra.mrb[88].mxu0 %v2172_v13  ;;  %vm2131_vm5 = vcmp.gt.f32.partialorder %v2105_v14, 0.0  ;;  %v3585_v6 = vld [vmem:[%s4778_s9 + $0x48] sm:$0xff]  }
 0x59e   :  { %vm2134_vm6 = vcmp.gt.f32.partialorder %v2116_v35, 0.0  ;;  %v2150_v3 = vmul.f32 0.2, %v2116_v35  ;;  %v2165_v33 = vsel %vm2133_vm4, %v2113_v18, %v2149_v53  ;;  %3462 = vmatprep.subr.bf16.mxu0 %v3585_v6  ;;  %3493 = vmatprep.subr.bf16.mxu1 %v3585_v6 }
 0x59f   :  { %vm2132_vm7 = vcmp.gt.f32.partialorder %v2108_v55, 0.0  ;;  %v2148_v32 = vmul.f32 0.2, %v2108_v55  ;;  %v2163_v38 = vsel %vm2131_vm5, %v2105_v14, %v2147_v59  ;;  %3463 = vmatpush3.bf16.msra.mxu0 %v3585_v6  ;;  %3501 = vmatpush3.bf16.msra.mxu1 %v3585_v6 }
 0x5a0   :  { %v2166_v63 = vsel %vm2134_vm6, %v2116_v35, %v2150_v3  ;;  %3464 = vmatprep.subr.bf16.mxu0 %v3586_v27  ;;  %3494 = vmatprep.subr.bf16.mxu1 %v3586_v27 }
 0x5a1   :  { %v2164_v0 = vsel %vm2132_vm7, %v2108_v55, %v2148_v32  ;;  %v2174_v44 = vpack.c.bf16 %v2166_v63, %v2165_v33 }
 0x5a2   :  { %v2173_v28 = vpack.c.bf16 %v2164_v0, %v2163_v38 }
 0x5a3   :  { %3465 = vmatpush3.bf16.msra.mxu0 %v3586_v27  ;;  %3502 = vmatpush3.bf16.msra.mxu1 %v3586_v27 }
 0x5a4   :  { %3456 = vmatprep.mubr.bf16.mxu0 %v2173_v28  ;;  %3466 = vmatprep.subr.bf16.mxu0 %v3587_v25 }
 0x5a5   :  { %3457 = vmatmul.mubr.bf16.gmra.mrb[92].mxu0 %v2174_v44  ;;  %3495 = vmatprep.subr.bf16.mxu1 %v3587_v25 }
 0x5a7   :  { %3467 = vmatpush3.bf16.msra.mxu0 %v3587_v25  ;;  %3503 = vmatpush3.bf16.msra.mxu1 %v3587_v25 }
 0x5a8   :  { %3468 = vmatprep.subr.bf16.mxu0 %v3588_v42  ;;  %3496 = vmatprep.subr.bf16.mxu1 %v3588_v42 }
 0x5ab   :  { %3469 = vmatpush3.bf16.msra.mxu0 %v3588_v42  ;;  %3504 = vmatpush3.bf16.msra.mxu1 %v3588_v42 }
 0x5ac   :  { %3470 = vmatprep.subr.bf16.mxu0 %v3589_v17  ;;  %3497 = vmatprep.subr.bf16.mxu1 %v3589_v17 }
 0x5af   :  { %3471 = vmatpush3.bf16.msra.mxu0 %v3589_v17  ;;  %3505 = vmatpush3.bf16.msra.mxu1 %v3589_v17 }
 0x5b0   :  { %3472 = vmatprep.subr.bf16.mxu0 %v3590_v23  ;;  %3498 = vmatprep.subr.bf16.mxu1 %v3590_v23 }
 0x5b3   :  { %3473 = vmatpush3.bf16.msra.mxu0 %v3590_v23  ;;  %3506 = vmatpush3.bf16.msra.mxu1 %v3590_v23 }
 0x5b4   :  { %3474 = vmatprep.subr.bf16.mxu0 %v3591_v22  ;;  %3499 = vmatprep.subr.bf16.mxu1 %v3591_v22 }
 0x5b7   :  { %3475 = vmatpush3.bf16.msra.mxu0 %v3591_v22  ;;  %3507 = vmatpush3.bf16.msra.mxu1 %v3591_v22 }
 0x640   :  { %v3390_v11 = vpop.f32.mrb[64].mxu0 }
 0x641   :  { %v1879_v57 = vadd.f32 %v3390_v11, %v1787_v54  ;;  %v1870_v58 = vpop.f32.mrb[65].mxu0 }
 0x642   :  { %v1871_v60 = vadd.f32 %v1870_v58, %v1787_v54  ;;  %v3391_v61 = vpop.f32.mrb[66].mxu0 }
 0x643   :  { %1935 = vst [vmem:[%s4780_s11 + $0x10] sm:$0xff] %v1879_v57  ;;  %v1882_v62 = vadd.f32 %v3391_v61, %v1787_v54  ;;  %v1873_v46 = vpop.f32.mrb[67].mxu0 }
 0x644   :  { %1933 = vst [vmem:[%s4780_s11] sm:$0xff] %v1871_v60  ;;  %v1874_v50 = vadd.f32 %v1873_v46, %v1787_v54 }
 0x645   :  { %1936 = vst [vmem:[%s4780_s11 + $0x18] sm:$0xff] %v1882_v62 }
 0x646   :  { %1934 = vst [vmem:[%s4780_s11 + $0x8] sm:$0xff] %v1874_v50 }
 0x648   :  { %v3394_v37 = vpop.f32.mrb[68].mxu0 }
 0x649   :  { %v1895_v56 = vadd.f32 %v3394_v37, %v1787_v54  ;;  %v1886_v9 = vpop.f32.mrb[69].mxu0 }
 0x64a   :  { %v1887_v10 = vadd.f32 %v1886_v9, %v1787_v54  ;;  %v3395_v19 = vpop.f32.mrb[70].mxu0 }
 0x64b   :  { %1939 = vst [vmem:[%s4780_s11 + $0x30] sm:$0xff] %v1895_v56  ;;  %v1898_v34 = vadd.f32 %v3395_v19, %v1787_v54  ;;  %v1889_v15 = vpop.f32.mrb[71].mxu0 }
 0x64c   :  { %1937 = vst [vmem:[%s4780_s11 + $0x20] sm:$0xff] %v1887_v10  ;;  %v1890_v47 = vadd.f32 %v1889_v15, %v1787_v54 }
 0x64d   :  { %1940 = vst [vmem:[%s4780_s11 + $0x38] sm:$0xff] %v1898_v34 }
 0x64e   :  { %1938 = vst [vmem:[%s4780_s11 + $0x28] sm:$0xff] %v1890_v47 }
 0x650   :  { %v3398_v45 = vpop.f32.mrb[72].mxu0 }
 0x651   :  { %v1911_v48 = vadd.f32 %v3398_v45, %v1787_v54  ;;  %v1902_v21 = vpop.f32.mrb[73].mxu0 }
 0x652   :  { %v1903_v7 = vadd.f32 %v1902_v21, %v1787_v54  ;;  %v3399_v40 = vpop.f32.mrb[74].mxu0 }
 0x653   :  { %1943 = vst [vmem:[%s4780_s11 + $0x50] sm:$0xff] %v1911_v48  ;;  %v1914_v49 = vadd.f32 %v3399_v40, %v1787_v54  ;;  %v1905_v1 = vpop.f32.mrb[75].mxu0 }
 0x654   :  { %1941 = vst [vmem:[%s4780_s11 + $0x40] sm:$0xff] %v1903_v7  ;;  %v1906_v29 = vadd.f32 %v1905_v1, %v1787_v54 }
 0x655   :  { %1944 = vst [vmem:[%s4780_s11 + $0x58] sm:$0xff] %v1914_v49 }
 0x656   :  { %1942 = vst [vmem:[%s4780_s11 + $0x48] sm:$0xff] %v1906_v29 }
 0x658   :  { %v3402_v30 = vpop.f32.mrb[76].mxu0 }
 0x659   :  { %v1927_v41 = vadd.f32 %v3402_v30, %v1787_v54  ;;  %v1918_v4 = vpop.f32.mrb[77].mxu0 }
 0x65a   :  { %v1919_v51 = vadd.f32 %v1918_v4, %v1787_v54  ;;  %v3403_v20 = vpop.f32.mrb[78].mxu0 }
 0x65b   :  { %1947 = vst [vmem:[%s4780_s11 + $0x70] sm:$0xff] %v1927_v41  ;;  %v1930_v5 = vadd.f32 %v3403_v20, %v1787_v54  ;;  %v1921_v8 = vpop.f32.mrb[79].mxu0 }
 0x65c   :  { %1945 = vst [vmem:[%s4780_s11 + $0x60] sm:$0xff] %v1919_v51  ;;  %v1922_v39 = vadd.f32 %v1921_v8, %v1787_v54 }
 0x65d   :  { %1948 = vst [vmem:[%s4780_s11 + $0x78] sm:$0xff] %v1930_v5 }
 0x65e   :  { %1946 = vst [vmem:[%s4780_s11 + $0x68] sm:$0xff] %v1922_v39 }
 0x660   :  { %v3446_v13 = vpop.f32.mrb[80].mxu0 }
 0x661   :  { %v2270_v18 = vadd.f32 %v3446_v13, %v4697_v43  ;;  %v2261_v31 = vpop.f32.mrb[81].mxu0 }
 0x662   :  { %v2262_v24 = vadd.f32 %v2261_v31, %v4697_v43  ;;  %v3447_v14 = vpop.f32.mrb[82].mxu0 }
 0x663   :  { %v2342_v16 = vmul.f32 0.2, %v2270_v18  ;;  %v2273_v53 = vadd.f32 %v3447_v14, %v4697_v43  ;;  %v2264_v35 = vpop.f32.mrb[83].mxu0  ;;  %vm2326_vm0 = vcmp.gt.f32.partialorder %v2270_v18, 0.0 }
 0x664   :  { %v2340_v26 = vmul.f32 0.2, %v2262_v24  ;;  %v2265_v12 = vadd.f32 %v2264_v35, %v4697_v43  ;;  %vm2324_vm8 = vcmp.gt.f32.partialorder %v2262_v24, 0.0 }
 0x665   :  { %vm2327_vm9 = vcmp.gt.f32.partialorder %v2273_v53, 0.0  ;;  %v2343_v59 = vmul.f32 0.2, %v2273_v53  ;;  %v2358_v3 = vsel %vm2326_vm0, %v2270_v18, %v2342_v16 }
 0x666   :  { %vm2325_vm10 = vcmp.gt.f32.partialorder %v2265_v12, 0.0  ;;  %v2341_v55 = vmul.f32 0.2, %v2265_v12  ;;  %v2356_v38 = vsel %vm2324_vm8, %v2262_v24, %v2340_v26 }
 0x667   :  { %v2359_v32 = vsel %vm2327_vm9, %v2273_v53, %v2343_v59 }
 0x668   :  { %v2373_v33 = vpack.c.bf16 %v2359_v32, %v2358_v3  ;;  %v3450_v63 = vpop.f32.mrb[84].mxu0  ;;  %v2357_v0 = vsel %vm2325_vm10, %v2265_v12, %v2341_v55  ;;  %v2383_v55 = vrot.slane %v4594_v2, %v3999_v36 }
 0x669   :  { %v2286_v44 = vadd.f32 %v3450_v63, %v4697_v43  ;;  %v2277_v28 = vpop.f32.mrb[85].mxu0  ;;  %v2372_v52 = vpack.c.bf16 %v2357_v0, %v2356_v38 }
 0x66a   :  { %v2278_v6 = vadd.f32 %v2277_v28, %v4697_v43  ;;  %v3451_v27 = vpop.f32.mrb[86].mxu0 }
 0x66b   :  { %v2346_v25 = vmul.f32 0.2, %v2286_v44  ;;  %v2289_v42 = vadd.f32 %v3451_v27, %v4697_v43  ;;  %v2280_v17 = vpop.f32.mrb[87].mxu0  ;;  %3476 = vmatprep.mubr.bf16.mxu0 %v2372_v52  ;;  %vm2330_vm11 = vcmp.gt.f32.partialorder %v2286_v44, 0.0 }
 0x66c   :  { %v2344_v23 = vmul.f32 0.2, %v2278_v6  ;;  %v2281_v22 = vadd.f32 %v2280_v17, %v4697_v43  ;;  %3477 = vmatmul.mubr.bf16.vlgmr.msra.gmra.mrb[96].mxu0 %v2373_v33  ;;  %vm2328_vm12 = vcmp.gt.f32.partialorder %v2278_v6, 0.0 }
 0x66d   :  { %vm2331_vm13 = vcmp.gt.f32.partialorder %v2289_v42, 0.0  ;;  %v2347_v54 = vmul.f32 0.2, %v2289_v42  ;;  %v2362_v57 = vsel %vm2330_vm11, %v2286_v44, %v2346_v25 }
 0x66e   :  { %vm2329_vm14 = vcmp.gt.f32.partialorder %v2281_v22, 0.0  ;;  %v2345_v11 = vmul.f32 0.2, %v2281_v22  ;;  %v2360_v62 = vsel %vm2328_vm12, %v2278_v6, %v2344_v23 }
 0x66f   :  { %v2363_v58 = vsel %vm2331_vm13, %v2289_v42, %v2347_v54 }
 0x670   :  { %v2375_v60 = vpack.c.bf16 %v2363_v58, %v2362_v57  ;;  %v3454_v61 = vpop.f32.mrb[88].mxu0  ;;  %v2361_v46 = vsel %vm2329_vm14, %v2281_v22, %v2345_v11 }
 0x671   :  { %v2302_v50 = vadd.f32 %v3454_v61, %v4697_v43  ;;  %v2293_v37 = vpop.f32.mrb[89].mxu0  ;;  %v2374_v56 = vpack.c.bf16 %v2361_v46, %v2360_v62 }
 0x672   :  { %v2294_v9 = vadd.f32 %v2293_v37, %v4697_v43  ;;  %v3455_v10 = vpop.f32.mrb[90].mxu0 }
 0x673   :  { %v2350_v19 = vmul.f32 0.2, %v2302_v50  ;;  %v2305_v34 = vadd.f32 %v3455_v10, %v4697_v43  ;;  %v2296_v15 = vpop.f32.mrb[91].mxu0  ;;  %3480 = vmatprep.mubr.bf16.mxu1 %v2374_v56  ;;  %vm2334_vm15 = vcmp.gt.f32.partialorder %v2302_v50, 0.0 }
 0x674   :  { %v2348_v47 = vmul.f32 0.2, %v2294_v9  ;;  %v2297_v45 = vadd.f32 %v2296_v15, %v4697_v43  ;;  %3481 = vmatmul.mubr.bf16.vlgmr.msra.gmra.mrb[80].mxu1 %v2375_v60  ;;  %vm2332_vm1 = vcmp.gt.f32.partialorder %v2294_v9, 0.0 }
 0x675   :  { %vm2335_vm2 = vcmp.gt.f32.partialorder %v2305_v34, 0.0  ;;  %v2351_v48 = vmul.f32 0.2, %v2305_v34  ;;  %v2366_v7 = vsel %vm2334_vm15, %v2302_v50, %v2350_v19 }
 0x676   :  { %vm2333_vm3 = vcmp.gt.f32.partialorder %v2297_v45, 0.0  ;;  %v2349_v21 = vmul.f32 0.2, %v2297_v45  ;;  %v2364_v1 = vsel %vm2332_vm1, %v2294_v9, %v2348_v47 }
 0x677   :  { %v2367_v40 = vsel %vm2335_vm2, %v2305_v34, %v2351_v48 }
 0x678   :  { %v3458_v49 = vpop.f32.mrb[92].mxu0  ;;  %v2365_v29 = vsel %vm2333_vm3, %v2297_v45, %v2349_v21  ;;  %v2377_v30 = vpack.c.bf16 %v2367_v40, %v2366_v7 }
 0x679   :  { %v2318_v41 = vadd.f32 %v3458_v49, %v4697_v43  ;;  %v2309_v4 = vpop.f32.mrb[93].mxu0  ;;  %v2376_v51 = vpack.c.bf16 %v2365_v29, %v2364_v1 }
 0x67a   :  { %v2310_v20 = vadd.f32 %v2309_v4, %v4697_v43  ;;  %v3459_v5 = vpop.f32.mrb[94].mxu0 }
 0x67b   :  { %v2354_v8 = vmul.f32 0.2, %v2318_v41  ;;  %v2321_v39 = vadd.f32 %v3459_v5, %v4697_v43  ;;  %v2312_v13 = vpop.f32.mrb[95].mxu0  ;;  %3484 = vmatprep.mubr.bf16.mxu1 %v2376_v51  ;;  %vm2338_vm4 = vcmp.gt.f32.partialorder %v2318_v41, 0.0 }
 0x67c   :  { %v2352_v18 = vmul.f32 0.2, %v2310_v20  ;;  %v2313_v31 = vadd.f32 %v2312_v13, %v4697_v43  ;;  %3485 = vmatmul.mubr.bf16.gmra.mrb[84].mxu1 %v2377_v30  ;;  %vm2336_vm5 = vcmp.gt.f32.partialorder %v2310_v20, 0.0 }
 0x67d   :  { %vm2339_vm6 = vcmp.gt.f32.partialorder %v2321_v39, 0.0  ;;  %v2355_v24 = vmul.f32 0.2, %v2321_v39  ;;  %v2370_v16 = vsel %vm2338_vm4, %v2318_v41, %v2354_v8 }
 0x67e   :  { %vm2337_vm7 = vcmp.gt.f32.partialorder %v2313_v31, 0.0  ;;  %v2353_v14 = vmul.f32 0.2, %v2313_v31  ;;  %v2368_v35 = vsel %vm2336_vm5, %v2310_v20, %v2352_v18 }
 0x67f   :  { %v2371_v53 = vsel %vm2339_vm6, %v2321_v39, %v2355_v24 }
 0x680   :  { %v2369_v26 = vsel %vm2337_vm7, %v2313_v31, %v2353_v14  ;;  %v2379_v12 = vpack.c.bf16 %v2371_v53, %v2370_v16 }
 0x681   :  { %v2378_v59 = vpack.c.bf16 %v2369_v26, %v2368_v35 }
 0x683   :  { %3488 = vmatprep.mubr.bf16.mxu1 %v2378_v59 }
 0x684   :  { %3489 = vmatmul.mubr.bf16.gmra.mrb[88].mxu1 %v2379_v12 }
 0x73f   :  { %v3478_v3 = vpop.f32.mrb[96].mxu0 }
 0x740   :  { %v2475_v32 = vadd.f32 %v3478_v3, %v2383_v55  ;;  %v2466_v43 = vpop.f32.mrb[97].mxu0 }
 0x741   :  { %v2467_v33 = vadd.f32 %v2466_v43, %v2383_v55  ;;  %v3479_v63 = vpop.f32.mrb[98].mxu0 }
 0x742   :  { %2531 = vst [vmem:[%s4781_s12 + $0x10] sm:$0xff] %v2475_v32  ;;  %v2478_v38 = vadd.f32 %v3479_v63, %v2383_v55  ;;  %v2469_v0 = vpop.f32.mrb[99].mxu0 }
 0x743   :  { %2529 = vst [vmem:[%s4781_s12] sm:$0xff] %v2467_v33  ;;  %v2470_v44 = vadd.f32 %v2469_v0, %v2383_v55 }
 0x744   :  { %2532 = vst [vmem:[%s4781_s12 + $0x18] sm:$0xff] %v2478_v38 }
 0x745   :  { %2530 = vst [vmem:[%s4781_s12 + $0x8] sm:$0xff] %v2470_v44 }
 0x747   :  { %v3482_v36 = vpop.f32.mrb[80].mxu1 }
 0x748   :  { %v2491_v2 = vadd.f32 %v3482_v36, %v2383_v55  ;;  %v2482_v28 = vpop.f32.mrb[81].mxu1 }
 0x749   :  { %v2483_v52 = vadd.f32 %v2482_v28, %v2383_v55  ;;  %v3483_v6 = vpop.f32.mrb[82].mxu1 }
 0x74a   :  { %2535 = vst [vmem:[%s4781_s12 + $0x30] sm:$0xff] %v2491_v2  ;;  %v2494_v27 = vadd.f32 %v3483_v6, %v2383_v55  ;;  %v2485_v25 = vpop.f32.mrb[83].mxu1 }
 0x74b   :  { %2533 = vst [vmem:[%s4781_s12 + $0x20] sm:$0xff] %v2483_v52  ;;  %v2486_v42 = vadd.f32 %v2485_v25, %v2383_v55 }
 0x74c   :  { %2536 = vst [vmem:[%s4781_s12 + $0x38] sm:$0xff] %v2494_v27 }
 0x74d   :  { %2534 = vst [vmem:[%s4781_s12 + $0x28] sm:$0xff] %v2486_v42 }
 0x74f   :  { %v3486_v17 = vpop.f32.mrb[84].mxu1 }
 0x750   :  { %v2507_v23 = vadd.f32 %v3486_v17, %v2383_v55  ;;  %v2498_v22 = vpop.f32.mrb[85].mxu1 }
 0x751   :  { %v2499_v54 = vadd.f32 %v2498_v22, %v2383_v55  ;;  %v3487_v11 = vpop.f32.mrb[86].mxu1 }
 0x752   :  { %2539 = vst [vmem:[%s4781_s12 + $0x50] sm:$0xff] %v2507_v23  ;;  %v2510_v57 = vadd.f32 %v3487_v11, %v2383_v55  ;;  %v2501_v58 = vpop.f32.mrb[87].mxu1 }
 0x753   :  { %2537 = vst [vmem:[%s4781_s12 + $0x40] sm:$0xff] %v2499_v54  ;;  %v2502_v60 = vadd.f32 %v2501_v58, %v2383_v55 }
 0x754   :  { %2540 = vst [vmem:[%s4781_s12 + $0x58] sm:$0xff] %v2510_v57 }
 0x755   :  { %2538 = vst [vmem:[%s4781_s12 + $0x48] sm:$0xff] %v2502_v60 }
 0x757   :  { %v3490_v61 = vpop.f32.mrb[88].mxu1 }
 0x758   :  { %v2523_v62 = vadd.f32 %v3490_v61, %v2383_v55  ;;  %v2514_v46 = vpop.f32.mrb[89].mxu1 }
 0x759   :  { %v2515_v50 = vadd.f32 %v2514_v46, %v2383_v55  ;;  %v3491_v37 = vpop.f32.mrb[90].mxu1 }
 0x75a   :  { %2543 = vst [vmem:[%s4781_s12 + $0x70] sm:$0xff] %v2523_v62  ;;  %v2526_v56 = vadd.f32 %v3491_v37, %v2383_v55  ;;  %v2517_v9 = vpop.f32.mrb[91].mxu1 }
 0x75b   :  { %2541 = vst [vmem:[%s4781_s12 + $0x60] sm:$0xff] %v2515_v50  ;;  %v2518_v10 = vadd.f32 %v2517_v9, %v2383_v55 }
 0x75c   :  { %2544 = vst [vmem:[%s4781_s12 + $0x78] sm:$0xff] %v2526_v56 }
 0x75d   :  { %2542 = vst [vmem:[%s4781_s12 + $0x68] sm:$0xff] %v2518_v10 }

</bundles_post_ra>
